<compile_context>
chip_gen: v7x
topology: tpu7x:2x2x1
jax: 0.10.0
libtpu: 0.0.40
codegen_flags: <defaults>
</compile_context>

<pallas_src>
import functools

import jax
import jax.numpy as jnp
from jax.experimental import pallas as pl
from jax.experimental.pallas import tpu as pltpu

_LANES = 128            # vreg lane width
_ROW_ALIGN = 16         # MXU / bf16 sublane-friendly row alignment (packed path)
_SUBL = 8               # f32 sublane tile (direct path)
_MIB = 1024 * 1024


# --------------------------------- kernels ----------------------------------


def _packed_kernel(t_ref, e_ref, w_ref, o_ref):
    """Lane-dense TimeEncode_exp tile.

    t_ref : (TM, 128)        f32   128 timestamps per packed row (lane-dense)
    e_ref : (128, 128*dim)   bf16  selector: e[j, j*dim + d] = 1, else 0 (resident)
    w_ref : (1,   128*dim)   f32   w tiled 128x: w_ref[0, j*dim + d] = w[d] (resident)
    o_ref : (TM,  128*dim)   f32   out[r, j*dim + d] = exp(t[r, j] * w[d])

    The lane expansion t[r, j] -> lanes [j*dim, (j+1)*dim) runs on the MXU
    (otherwise idle in this memory-bound kernel) instead of the VPU.  t is
    split into three bf16 pieces whose sum is exactly t (8+8+8 mantissa bits;
    each residual subtraction is exact by Sterbenz), so the selector dots +
    f32 accumulation reproduce t exactly; the f32 multiply by w and the EUP
    exp then match the reference computation.
    """
    t = t_ref[...]
    t_hi = t.astype(jnp.bfloat16)
    r1 = t - t_hi.astype(jnp.float32)                 # exact
    t_mid = r1.astype(jnp.bfloat16)
    t_lo = (r1 - t_mid.astype(jnp.float32)).astype(jnp.bfloat16)

    e = e_ref[...]
    x = jnp.dot(t_hi, e, preferred_element_type=jnp.float32)
    x = x + jnp.dot(t_mid, e, preferred_element_type=jnp.float32)
    x = x + jnp.dot(t_lo, e, preferred_element_type=jnp.float32)
    # x[r, j*dim + d] == t[r, j] exactly.  1 VPU mul + EUP exp per output vreg,
    # then unmasked full-lane stores (lane width is a multiple of 128).
    o_ref[...] = jnp.exp(x * w_ref[...])


def _direct_kernel(t_ref, w_ref, o_ref):
    # t_ref: (TN, 1) f32, w_ref: (1, dim) f32, o_ref: (TN, dim) f32.
    # Used only when dim is a multiple of 128 (already lane-dense) or > 256.
    o_ref[...] = jnp.exp(t_ref[...] * w_ref[...])


# ------------------------------ tile selection -------------------------------


def _packed_tiles(rows: int, lane: int):
    """Pick the packed-path row tile and a matching scoped-VMEM limit."""
    e_bytes = _LANES * lane * 2              # bf16 selector, resident
    out_row = lane * 4                       # bytes of output per packed row
    in_row = _LANES * 4                      # bytes of (lane-dense) t per row
    # Footprint model per tile row: 2x double-buffered output + ~3 output-sized
    # in-kernel temporaries (dot results / accumulator) + 2x double-buffered t.
    per_row = 5 * out_row + 2 * in_row
    budget = max(per_row * _ROW_ALIGN, 36 * _MIB - 2 * e_bytes - 2 * lane * 4)
    cap = max(_ROW_ALIGN, budget // per_row)
    tm = min(6 * _MIB // out_row, cap)       # ~6 MiB output block target
    if rows >= 4 * _ROW_ALIGN:
        tm = min(tm, -(-rows // 4))          # keep >=4 grid steps (v7x: 2 TCs)
    tm = max(_ROW_ALIGN, min(tm, rows))
    tm = max(_ROW_ALIGN, (tm // _ROW_ALIGN) * _ROW_ALIGN)
    footprint = tm * per_row + 2 * e_bytes + 2 * lane * 4
    vmem_limit = int(min(52 * _MIB, max(24 * _MIB, footprint + 12 * _MIB)))
    return int(tm), vmem_limit


def _direct_tiles(n: int, dim: int):
    out_row = dim * 4
    in_row = _LANES * 4                      # (TN, 1) block lane-pads to 128 lanes
    per_row = 5 * out_row + 2 * in_row
    cap = max(_SUBL, (40 * _MIB) // per_row)
    tn = min(6 * _MIB // out_row, cap)
    if n >= 4 * _SUBL:
        tn = min(tn, -(-n // 4))             # keep >=4 grid steps for megacore
    tn = min(tn, n)
    if tn < n:
        tn = max(_SUBL, (tn // _SUBL) * _SUBL)
    footprint = tn * per_row + 2 * dim * 4
    vmem_limit = int(min(52 * _MIB, max(24 * _MIB, footprint + 12 * _MIB)))
    return max(1, int(tn)), vmem_limit


# ------------------------------ pallas wrappers ------------------------------


@functools.partial(jax.jit, static_argnames=("lane", "tile_m", "vmem_limit"))
def _time_encode_packed(t_rows, e_sel, w_rep, *, lane, tile_m, vmem_limit):
    rows = t_rows.shape[0]
    dim = lane // _LANES
    n_out = rows * _LANES * dim
    return pl.pallas_call(
        _packed_kernel,
        out_shape=jax.ShapeDtypeStruct((rows, lane), jnp.float32),
        grid_spec=pltpu.PrefetchScalarGridSpec(
            num_scalar_prefetch=0,
            grid=(pl.cdiv(rows, tile_m),),
            in_specs=[
                pl.BlockSpec((tile_m, _LANES), lambda i: (i, 0)),   # t, lane-dense
                pl.BlockSpec((_LANES, lane), lambda i: (0, 0)),     # selector (resident)
                pl.BlockSpec((1, lane), lambda i: (0, 0)),          # tiled w (resident)
            ],
            out_specs=pl.BlockSpec((tile_m, lane), lambda i: (i, 0)),
        ),
        compiler_params=pltpu.CompilerParams(
            dimension_semantics=("parallel",),
            vmem_limit_bytes=vmem_limit,
        ),
        cost_estimate=pl.CostEstimate(
            flops=2 * n_out,
            transcendentals=n_out,
            bytes_accessed=4 * n_out + 4 * rows * _LANES + 2 * _LANES * lane + 4 * lane,
        ),
    )(t_rows, e_sel, w_rep)


@functools.partial(jax.jit, static_argnames=("dim", "tile_n", "vmem_limit"))
def _time_encode_direct(t_col, w_row, *, dim, tile_n, vmem_limit):
    n = t_col.shape[0]
    n_out = n * dim
    return pl.pallas_call(
        _direct_kernel,
        out_shape=jax.ShapeDtypeStruct((n, dim), jnp.float32),
        grid_spec=pltpu.PrefetchScalarGridSpec(
            num_scalar_prefetch=0,
            grid=(pl.cdiv(n, tile_n),),
            in_specs=[
                pl.BlockSpec((tile_n, 1), lambda i: (i, 0)),        # t column tile
                pl.BlockSpec((1, dim), lambda i: (0, 0)),           # w row (resident)
            ],
            out_specs=pl.BlockSpec((tile_n, dim), lambda i: (i, 0)),
        ),
        compiler_params=pltpu.CompilerParams(
            dimension_semantics=("parallel",),
            vmem_limit_bytes=vmem_limit,
        ),
        cost_estimate=pl.CostEstimate(
            flops=2 * n_out,
            transcendentals=n_out,
            bytes_accessed=4 * n_out + 4 * n + 4 * dim,
        ),
    )(t_col, w_row)


# --------------------------------- module ------------------------------------


class TimeEncodeExp:
    """JAX/Pallas port of the PyTorch TimeEncode_exp module."""

    def __init__(self, dim: int, a: float = 1.0, base_value: float = 2.0):
        self.dim = int(dim)
        self.a = float(a)
        self.base_value = base_value     # stored for parity; unused in forward
        # reset_parameters(): weight = linspace(-a, -0.1*a, dim), bias = zeros(dim)
        self.w = jnp.linspace(-self.a, -0.1 * self.a, self.dim, dtype=jnp.float32)
        self.b = jnp.zeros((self.dim,), dtype=jnp.float32)   # frozen zeros -> folded out
        self.w_row = self.w.reshape(1, self.dim)

        # Lane-dense packed (MXU-expand) path for any dim that is not already a
        # multiple of 128, while the resident selector stays modest (<= 8 MiB).
        self._use_packed = (self.dim % _LANES != 0) and (self.dim <= 256)
        if self._use_packed:
            self._lane = _LANES * self.dim
            # e_sel[j, j*dim + d] = 1 (exact in bf16), else 0.
            self._e_sel = jnp.repeat(jnp.eye(_LANES, dtype=jnp.bfloat16),
                                     self.dim, axis=1)
            # w_rep[0, j*dim + d] = w[d]
            self._w_rep = jnp.tile(self.w, _LANES).reshape(1, self._lane)
        else:
            self._lane = None
            self._e_sel = None
            self._w_rep = None

    def __call__(self, t: jax.Array, *, unpad: bool = True) -> jax.Array:
        t_flat = jnp.reshape(t, (-1,)).astype(jnp.float32)
        n = t_flat.shape[0]
        if n == 0:
            return jnp.zeros((0, self.dim), jnp.float32)

        if self._use_packed:
            rows = max(-(-n // _LANES), _ROW_ALIGN)     # >=16 rows keeps MXU M aligned
            n_pad = rows * _LANES
            if n_pad != n:                               # pad <= max(2047, 127) timestamps of t only
                t_flat = jnp.pad(t_flat, (0, n_pad - n))
            t_rows = t_flat.reshape(rows, _LANES)        # lane-dense input (no VMEM lane padding)
            tile_m, vmem_limit = _packed_tiles(rows, self._lane)
            out = _time_encode_packed(t_rows, self._e_sel, self._w_rep,
                                      lane=self._lane, tile_m=tile_m,
                                      vmem_limit=vmem_limit)
            out = out.reshape(n_pad, self.dim)           # free contiguous reshape
            if n_pad != n and unpad:
                # NOTE: this slice is a full-size XLA copy of the result.  Callers
                # that can ignore a <=2047-row padded tail (or size N to a multiple
                # of 128) should pass unpad=False / pad upstream to avoid it.
                out = out[:n]
            return out

        # dim is a multiple of 128 (already lane-dense) or > 256: simple
        # broadcast kernel; no padding and no output slice.
        t_col = t_flat.reshape(n, 1)
        tile_n, vmem_limit = _direct_tiles(n, self.dim)
        return _time_encode_direct(t_col, self.w_row, dim=self.dim,
                                   tile_n=tile_n, vmem_limit=vmem_limit)


# ---------------------------------- demo --------------------------------------


if __name__ == "__main__":
    key = jax.random.PRNGKey(0)

    # dim=32: packed / MXU-expand path.  Small (2, 8) batch of timestamps.
    dim = 32
    enc = TimeEncodeExp(dim=dim, a=1.0, base_value=2.0)
    t = jax.random.uniform(key, (2, 8), dtype=jnp.float32, minval=0.0, maxval=10.0)
    out = jax.block_until_ready(enc(t))
    assert out.shape == (16, dim), out.shape
    ref = jnp.exp(t.reshape(-1, 1) * enc.w.reshape(1, dim) + enc.b.reshape(1, dim))
    assert jnp.allclose(out, ref, rtol=1e-5, atol=1e-6), "mismatch vs reference (packed)"

    # dim=48 (does not divide 128): previously the lane-sparse fallback, now packed.
    enc2 = TimeEncodeExp(dim=48, a=2.0, base_value=2.0)
    t2 = jax.random.uniform(jax.random.PRNGKey(1), (13,), dtype=jnp.float32,
                            minval=0.0, maxval=5.0)
    out2 = jax.block_until_ready(enc2(t2))
    ref2 = jnp.exp(t2.reshape(-1, 1) * enc2.w.reshape(1, 48))
    assert out2.shape == (13, 48), out2.shape
    assert jnp.allclose(out2, ref2, rtol=1e-5, atol=1e-6), "mismatch vs reference (dim=48)"

    # dim=128 (multiple of 128): direct, already lane-dense path.
    enc3 = TimeEncodeExp(dim=128, a=1.0, base_value=2.0)
    t3 = jax.random.uniform(jax.random.PRNGKey(2), (7,), dtype=jnp.float32,
                            minval=0.0, maxval=10.0)
    out3 = jax.block_until_ready(enc3(t3))
    ref3 = jnp.exp(t3.reshape(-1, 1) * enc3.w.reshape(1, 128))
    assert out3.shape == (7, 128), out3.shape
    assert jnp.allclose(out3, ref3, rtol=1e-5, atol=1e-6), "mismatch vs reference (direct)"

    print("KERNEL_OK")
</pallas_src>

<mosaic_0001>
module attributes {stable_mosaic.version = 11 : i64} {
  func.func @_packed_kernel(%arg0: i32, %arg1: memref<16x128xf32, #tpu.memory_space<vmem>>, %arg2: memref<128x4096xbf16, #tpu.memory_space<vmem>>, %arg3: memref<1x4096xf32, #tpu.memory_space<vmem>>, %arg4: memref<16x4096xf32, #tpu.memory_space<vmem>>) attributes {dimension_semantics = [#tpu.dimension_semantics<parallel>], iteration_bounds = array<i64: 1>, scalar_prefetch = 0 : i64, scratch_operands = 0 : i64, tpu.core_type = #tpu.core_type<tc>, window_params = [{transform_indices = @transform_0, window_bounds = array<i64: 16, 128>}, {pipeline_mode = #tpu.pipeline_mode<synchronous>, transform_indices = @transform_1, window_bounds = array<i64: 128, 4096>}, {pipeline_mode = #tpu.pipeline_mode<synchronous>, transform_indices = @transform_2, window_bounds = array<i64: 1, 4096>}, {transform_indices = @transform_3, window_bounds = array<i64: 16, 4096>}]} {
    %c0 = arith.constant 0 : index
    %c0_0 = arith.constant 0 : index
    %0 = vector.load %arg1[%c0, %c0_0] : memref<16x128xf32, #tpu.memory_space<vmem>>, vector<16x128xf32>
    %1 = arith.truncf %0 : vector<16x128xf32> to vector<16x128xbf16>
    %2 = arith.extf %1 : vector<16x128xbf16> to vector<16x128xf32>
    %3 = arith.subf %0, %2 : vector<16x128xf32>
    %4 = arith.truncf %3 : vector<16x128xf32> to vector<16x128xbf16>
    %5 = arith.extf %4 : vector<16x128xbf16> to vector<16x128xf32>
    %6 = arith.subf %3, %5 : vector<16x128xf32>
    %7 = arith.truncf %6 : vector<16x128xf32> to vector<16x128xbf16>
    %c0_1 = arith.constant 0 : index
    %c0_2 = arith.constant 0 : index
    %8 = vector.load %arg2[%c0_1, %c0_2] : memref<128x4096xbf16, #tpu.memory_space<vmem>>, vector<128x4096xbf16>
    %cst = arith.constant dense<0.000000e+00> : vector<16x4096xf32>
    %9 = tpu.matmul %1, %8, %cst {dimension_numbers = #tpu.dot_dimension_numbers<[1], [0], [0], [1], [0, 0, 1, 1], [], []>} : vector<16x128xbf16>, vector<128x4096xbf16>, vector<16x4096xf32> -> vector<16x4096xf32>
    %cst_3 = arith.constant dense<0.000000e+00> : vector<16x4096xf32>
    %10 = tpu.matmul %4, %8, %cst_3 {dimension_numbers = #tpu.dot_dimension_numbers<[1], [0], [0], [1], [0, 0, 1, 1], [], []>} : vector<16x128xbf16>, vector<128x4096xbf16>, vector<16x4096xf32> -> vector<16x4096xf32>
    %11 = arith.addf %9, %10 : vector<16x4096xf32>
    %cst_4 = arith.constant dense<0.000000e+00> : vector<16x4096xf32>
    %12 = tpu.matmul %7, %8, %cst_4 {dimension_numbers = #tpu.dot_dimension_numbers<[1], [0], [0], [1], [0, 0, 1, 1], [], []>} : vector<16x128xbf16>, vector<128x4096xbf16>, vector<16x4096xf32> -> vector<16x4096xf32>
    %13 = arith.addf %11, %12 : vector<16x4096xf32>
    %c0_5 = arith.constant 0 : index
    %c0_6 = arith.constant 0 : index
    %14 = vector.load %arg3[%c0_5, %c0_6] : memref<1x4096xf32, #tpu.memory_space<vmem>>, vector<1x4096xf32>
    %15 = vector.broadcast %14 : vector<1x4096xf32> to vector<16x4096xf32>
    %16 = arith.mulf %13, %15 : vector<16x4096xf32>
    %17 = math.exp %16 : vector<16x4096xf32>
    %c0_7 = arith.constant 0 : index
    %c0_8 = arith.constant 0 : index
    %18 = vector.load %arg4[%c0_7, %c0_8] : memref<16x4096xf32, #tpu.memory_space<vmem>>, vector<16x4096xf32>
    tpu.vector_store %arg4[%c0_7, %c0_8], %17 {strides = array<i32>} : memref<16x4096xf32, #tpu.memory_space<vmem>>, vector<16x4096xf32>,
    return
  }
  func.func @transform_0(%arg0: i32) -> (i32, i32) {
    %c0_i32 = arith.constant 0 : i32
    %c0_i32_0 = arith.constant 0 : i32
    return %arg0, %c0_i32 : i32, i32
  }
  func.func @transform_1(%arg0: i32) -> (i32, i32) {
    %c0_i32 = arith.constant 0 : i32
    %c0_i32_0 = arith.constant 0 : i32
    %c0_i32_1 = arith.constant 0 : i32
    return %c0_i32, %c0_i32_0 : i32, i32
  }
  func.func @transform_2(%arg0: i32) -> (i32, i32) {
    %c0_i32 = arith.constant 0 : i32
    %c0_i32_0 = arith.constant 0 : i32
    %c0_i32_1 = arith.constant 0 : i32
    return %c0_i32, %c0_i32_0 : i32, i32
  }
  func.func @transform_3(%arg0: i32) -> (i32, i32) {
    %c0_i32 = arith.constant 0 : i32
    %c0_i32_0 = arith.constant 0 : i32
    return %arg0, %c0_i32 : i32, i32
  }
}

</mosaic_0001>

<bundles_post_ra>
// kernel: _time_encode_packed.1
= control target key start
LH: loop header
LB: loop body
LE: loop exit
PB: predicated region body
PF: predicated region fallthrough
CT: control target
= control target key end

     0   :  { %8 = vsyncpa [#allocation3], 0  ;;  %s6330_s0 = inlined_call_operand.hbm [shape: f32[16,128], index: 0, kind: input, shape index: {}]   ;;  %s6331_s1 = inlined_call_operand.hbm [shape: bf16[128,4096], index: 1, kind: input, shape index: {}]   ;;  %s6332_s2 = inlined_call_operand.hbm [shape: f32[1,4096], index: 2, kind: input, shape index: {}]   ;;  %s6333_s3 = inlined_call_operand.hbm [shape: f32[16,4096], index: 3, kind: output, shape index: {}]  }
   0x1   :  { %9 = vsyncpa [#allocation6], 0 }
   0x2   :  { %10 = vsyncpa [#allocation4], 0  ;;  %s4790_s12 = smov [#allocation5]   ;;  %s4696_s16 = scalar_lea.hbm %s6331_s1, 32768 }
   0x3   :  { %s28_s13 = sshll.u32 %s4790_s12, 4  ;;  %p4697_p0 = scmp.ne.s32.totalorder %s6331_s1, %s4696_s16  ;;  %s29_s13 = int_to_ptr.vmem [resolvable:$true] %s28_s13 }
   0x4   :  { %p4700_p1 = scmp.lt.u32.totalorder %s4696_s16, %s6331_s1 }
   0x6   :  { %p4702_p2 = pnand %p4700_p1, %p4697_p0 }
   0x8   :  { %4705 = shalt.err (!%p4702_p2)
}
   0x9   :  { %s4706_s21 = scalar_lea.vmem %s29_s13, 32768  ;;  %p4711_p4 = scmp.lt.s32.totalorder %s29_s13, %s29_s13 }
   0xa   :  { %p4707_p3 = scmp.ne.s32.totalorder %s29_s13, %s4706_s21  ;;  %p4712_p5 = scmp.lt.s32.totalorder %s4706_s21, %s4706_s21 }
   0xc   :  { %p4713_p6 = por %p4712_p5, %p4711_p4 }
   0xe   :  { %p4714_p7 = pnand %p4713_p6, %p4707_p3 }
  0x10   :  { %4717 = shalt.err (!%p4714_p7)
}
  0x11   :  { %s4791_s22 = smov 2048   ;;  %s4792_s23 = smov 128  }
  0x12   :  { %34 = dma.hbm_to_vmem [thread:$0]  %s6331_s1, 32768, %s29_s13, [#allocation6], %s4791_s22, %s4791_s22, %s4792_s23  }
  0x13   :  { %s4793_s26 = smov [#allocation2]   ;;  %s4718_s30 = scalar_lea.hbm %s6330_s0, 256 }
  0x14   :  { %s16_s27 = sshll.u32 %s4793_s26, 4  ;;  %p4719_p8 = scmp.ne.s32.totalorder %s6330_s0, %s4718_s30  ;;  %s17_s27 = int_to_ptr.vmem [resolvable:$true] %s16_s27 }
  0x15   :  { %p4722_p9 = scmp.lt.u32.totalorder %s4718_s30, %s6330_s0 }
  0x17   :  { %p4724_p10 = pnand %p4722_p9, %p4719_p8 }
  0x19   :  { %4727 = shalt.err (!%p4724_p10)
}
  0x1a   :  { %s4728_s8 = scalar_lea.vmem %s17_s27, 256  ;;  %p4733_p12 = scmp.lt.s32.totalorder %s17_s27, %s17_s27 }
  0x1b   :  { %p4729_p11 = scmp.ne.s32.totalorder %s17_s27, %s4728_s8  ;;  %p4734_p13 = scmp.lt.s32.totalorder %s4728_s8, %s4728_s8 }
  0x1d   :  { %p4735_p0 = por %p4734_p13, %p4733_p12 }
  0x1f   :  { %p4736_p1 = pnand %p4735_p0, %p4729_p11 }
  0x21   :  { %4739 = shalt.err (!%p4736_p1)
}
  0x22   :  { %s4794_s1 = smov 8   ;;  %s4795_s11 = smov [#allocation7]  }
  0x23   :  { %22 = dma.hbm_to_vmem [thread:$0]  %s6330_s0, 256, %s17_s27, [#allocation3], %s4792_s23, %s4792_s23, %s4794_s1  }
  0x24   :  { %s41_s12 = sshll.u32 %s4795_s11, 4  ;;  %s4740_s15 = scalar_lea.hbm %s6332_s2, 512  ;;  %s42_s12 = int_to_ptr.vmem [resolvable:$true] %s41_s12 }
  0x25   :  { %p4741_p2 = scmp.ne.s32.totalorder %s6332_s2, %s4740_s15  ;;  %p4744_p3 = scmp.lt.u32.totalorder %s4740_s15, %s6332_s2 }
  0x27   :  { %p4746_p4 = pnand %p4744_p3, %p4741_p2 }
  0x29   :  { %4749 = shalt.err (!%p4746_p4)
}
  0x2a   :  { %s4750_s20 = scalar_lea.vmem %s42_s12, 512  ;;  %p4755_p6 = scmp.lt.s32.totalorder %s42_s12, %s42_s12 }
  0x2b   :  { %p4751_p5 = scmp.ne.s32.totalorder %s42_s12, %s4750_s20  ;;  %p4756_p7 = scmp.lt.s32.totalorder %s4750_s20, %s4750_s20 }
  0x2d   :  { %p4757_p8 = por %p4756_p7, %p4755_p6 }
  0x2f   :  { %p4758_p9 = pnand %p4757_p8, %p4751_p5 }
  0x31   :  { %4761 = shalt.err (!%p4758_p9)
}
  0x32   :  { %44 = dma.hbm_to_vmem [thread:$0]  %s6332_s2, 512, %s42_s12, [#allocation6]  }
  0x33   :  { %4784 = dma.done.wait [#allocation3], 256  }
  0x34   :  { %4785 = vsyncadd [#allocation3], 4294967040 }
  0x35   :  { %4786 = dma.done.wait [#allocation6], 33280  }
  0x36   :  { %4787 = vsyncadd [#allocation6], 4294934016  ;;  %v6334_v0 = vmov 0   ;;  %v68_v1 = vld [vmem:[#allocation5] sm:$0xff]  ;;  %v69_v3 = vld [vmem:[#allocation5 + $0x8] sm:$0xff]  ;;  %s4797_s2 = smov [#allocation8]  }
  0x37   :  { %1636 = vmatprep.mubr.bf16.mxu0 %v6334_v0  ;;  %1679 = vmatprep.mubr.bf16.mxu1 %v6334_v0  ;;  %v84_v2 = vld [vmem:[#allocation5 + $0x80] sm:$0xff]  ;;  %v85_v5 = vld [vmem:[#allocation5 + $0x88] sm:$0xff]  ;;  %v55_v44 = vld [vmem:[#allocation2] sm:$0xff]  ;;  %s4161_s22 = sshll.u32 %s4797_s2, 4  ;;  %s4162_s22 = int_to_ptr.vmem [resolvable:$true] %s4161_s22 }
  0x38   :  { %v4858_v4 = vcombine.high %v68_v1, %v84_v2  ;;  %v4860_v6 = vcombine.low %v68_v1, %v84_v2  ;;  %v100_v7 = vld [vmem:[#allocation5 + $0x100] sm:$0xff]  ;;  %v4862_v9 = vcombine.high %v69_v3, %v85_v5  ;;  %v4864_v10 = vcombine.low %v69_v3, %v85_v5  ;;  %v101_v12 = vld [vmem:[#allocation5 + $0x108] sm:$0xff]  ;;  %v56_v45 = vld [vmem:[#allocation2 + $0x8] sm:$0xff]  ;;  %s4762_s23 = scalar_lea.vmem %s4162_s22, 8192  ;;  %p4767_p11 = scmp.lt.s32.totalorder %s4162_s22, %s4162_s22 }
  0x39   :  { %v116_v8 = vld [vmem:[#allocation5 + $0x180] sm:$0xff]  ;;  %v117_v13 = vld [vmem:[#allocation5 + $0x188] sm:$0xff]  ;;  %v4920_v53 = vpack.c.bf16 %v56_v45, %v55_v44  ;;  %p4763_p10 = scmp.ne.s32.totalorder %s4162_s22, %s4762_s23  ;;  %p4768_p12 = scmp.lt.s32.totalorder %s4762_s23, %s4762_s23 }
  0x3a   :  { %v4866_v11 = vcombine.high %v100_v7, %v116_v8  ;;  %v132_v14 = vld [vmem:[#allocation5 + $0x200] sm:$0xff]  ;;  %1604 = vmatprep.subr.bf16.mxu0 %v4858_v4  ;;  %v4869_v15 = vcombine.high %v101_v12, %v117_v13  ;;  %v133_v17 = vld [vmem:[#allocation5 + $0x208] sm:$0xff]  ;;  %1647 = vmatprep.subr.bf16.mxu1 %v4862_v9  ;;  %v4873_v19 = vcombine.low %v100_v7, %v116_v8  ;;  %v70_v7 = vld [vmem:[#allocation5 + $0x10] sm:$0xff] }
  0x3b   :  { %v148_v16 = vld [vmem:[#allocation5 + $0x280] sm:$0xff]  ;;  %v149_v18 = vld [vmem:[#allocation5 + $0x288] sm:$0xff]  ;;  %1605 = vmatpush1.bf16.msra.mxu0 %v4860_v6  ;;  %1648 = vmatpush1.bf16.msra.mxu1 %v4864_v10  ;;  %v4877_v20 = vcombine.low %v101_v12, %v117_v13  ;;  %v58_v62 = vunpack.c.l.bf16 %v4920_v53  ;;  %v59_v63 = vunpack.c.h.bf16 %v4920_v53  ;;  %v86_v8 = vld [vmem:[#allocation5 + $0x90] sm:$0xff]  ;;  %p4769_p13 = por %p4768_p12, %p4767_p11 }
  0x3c   :  { %1606 = vmatprep.subr.bf16.mxu0 %v4866_v11  ;;  %v4879_v21 = vcombine.high %v132_v14, %v148_v16  ;;  %1649 = vmatprep.subr.bf16.mxu1 %v4869_v15  ;;  %v4882_v22 = vcombine.high %v133_v17, %v149_v18  ;;  %v164_v23 = vld [vmem:[#allocation5 + $0x300] sm:$0xff]  ;;  %v165_v25 = vld [vmem:[#allocation5 + $0x308] sm:$0xff]  ;;  %v4885_v27 = vcombine.low %v132_v14, %v148_v16  ;;  %v71_v12 = vld [vmem:[#allocation5 + $0x18] sm:$0xff] }
  0x3d   :  { %v180_v24 = vld [vmem:[#allocation5 + $0x380] sm:$0xff]  ;;  %v181_v26 = vld [vmem:[#allocation5 + $0x388] sm:$0xff]  ;;  %v4889_v28 = vcombine.low %v133_v17, %v149_v18  ;;  %v87_v13 = vld [vmem:[#allocation5 + $0x98] sm:$0xff]  ;;  %v4948_v14 = vsub.f32 %v55_v44, %v58_v62  ;;  %v4950_v16 = vsub.f32 %v56_v45, %v59_v63  ;;  %p4770_p0 = pnand %p4769_p13, %p4763_p10 }
  0x3e   :  { %v4891_v29 = vcombine.high %v164_v23, %v180_v24  ;;  %v4894_v30 = vcombine.high %v165_v25, %v181_v26  ;;  %v196_v31 = vld [vmem:[#allocation5 + $0x400] sm:$0xff]  ;;  %v197_v33 = vld [vmem:[#allocation5 + $0x408] sm:$0xff]  ;;  %v4897_v35 = vcombine.low %v164_v23, %v180_v24  ;;  %v4901_v36 = vcombine.low %v165_v25, %v181_v26  ;;  %v102_v25 = vld [vmem:[#allocation5 + $0x110] sm:$0xff] }
  0x3f   :  { %1607 = vmatpush1.bf16.msra.mxu0 %v4873_v19  ;;  %1650 = vmatpush1.bf16.msra.mxu1 %v4877_v20  ;;  %v212_v32 = vld [vmem:[#allocation5 + $0x480] sm:$0xff]  ;;  %v213_v34 = vld [vmem:[#allocation5 + $0x488] sm:$0xff]  ;;  %6746 = vst [vmem:[#allocation12_spill] sm:$0xff] %v4948_v14  ;;  %6747 = vst [vmem:[#allocation13_spill] sm:$0xff] %v4950_v16  ;;  %v4959_v23 = vcombine.high %v70_v7, %v86_v8  ;;  %v4962_v24 = vcombine.high %v71_v12, %v87_v13 }
  0x40   :  { %1608 = vmatprep.subr.bf16.mxu0 %v4879_v21  ;;  %1651 = vmatprep.subr.bf16.mxu1 %v4882_v22  ;;  %v4903_v37 = vcombine.high %v196_v31, %v212_v32  ;;  %v4906_v38 = vcombine.high %v197_v33, %v213_v34  ;;  %v228_v39 = vld [vmem:[#allocation5 + $0x500] sm:$0xff]  ;;  %v229_v41 = vld [vmem:[#allocation5 + $0x508] sm:$0xff]  ;;  %v4909_v43 = vcombine.low %v196_v31, %v212_v32  ;;  %v118_v26 = vld [vmem:[#allocation5 + $0x190] sm:$0xff] }
  0x41   :  { %v244_v40 = vld [vmem:[#allocation5 + $0x580] sm:$0xff]  ;;  %v245_v42 = vld [vmem:[#allocation5 + $0x588] sm:$0xff]  ;;  %v4913_v46 = vcombine.low %v197_v33, %v213_v34  ;;  %v4966_v31 = vpack.c.bf16 %v4950_v16, %v4948_v14  ;;  %v103_v32 = vld [vmem:[#allocation5 + $0x118] sm:$0xff]  ;;  %v4969_v34 = vcombine.low %v70_v7, %v86_v8 }
  0x42   :  { %v4915_v47 = vcombine.high %v228_v39, %v244_v40  ;;  %v4918_v48 = vcombine.high %v229_v41, %v245_v42  ;;  %v260_v49 = vld [vmem:[#allocation5 + $0x600] sm:$0xff]  ;;  %v261_v51 = vld [vmem:[#allocation5 + $0x608] sm:$0xff]  ;;  %v4923_v54 = vcombine.low %v228_v39, %v244_v40  ;;  %v4927_v55 = vcombine.low %v229_v41, %v245_v42  ;;  %v119_v33 = vld [vmem:[#allocation5 + $0x198] sm:$0xff] }
  0x43   :  { %1609 = vmatpush1.bf16.msra.mxu0 %v4885_v27  ;;  %1652 = vmatpush1.bf16.msra.mxu1 %v4889_v28  ;;  %v276_v50 = vld [vmem:[#allocation5 + $0x680] sm:$0xff]  ;;  %v277_v52 = vld [vmem:[#allocation5 + $0x688] sm:$0xff]  ;;  %v4973_v39 = vcombine.low %v71_v12, %v87_v13  ;;  %v4975_v40 = vcombine.high %v102_v25, %v118_v26  ;;  %v4978_v41 = vcombine.high %v103_v32, %v119_v33  ;;  %v134_v42 = vld [vmem:[#allocation5 + $0x210] sm:$0xff] }
  0x44   :  { %1610 = vmatprep.subr.bf16.mxu0 %v4891_v29  ;;  %1653 = vmatprep.subr.bf16.mxu1 %v4894_v30  ;;  %v4929_v56 = vcombine.high %v260_v49, %v276_v50  ;;  %v4932_v57 = vcombine.high %v261_v51, %v277_v52  ;;  %v292_v58 = vld [vmem:[#allocation5 + $0x700] sm:$0xff]  ;;  %v293_v60 = vld [vmem:[#allocation5 + $0x708] sm:$0xff]  ;;  %v4937_v1 = vcombine.low %v260_v49, %v276_v50  ;;  %v150_v44 = vld [vmem:[#allocation5 + $0x290] sm:$0xff] }
  0x45   :  { %v308_v59 = vld [vmem:[#allocation5 + $0x780] sm:$0xff]  ;;  %v309_v61 = vld [vmem:[#allocation5 + $0x788] sm:$0xff]  ;;  %v4941_v2 = vcombine.low %v261_v51, %v277_v52  ;;  %6748 = vst [vmem:[#allocation14_spill] sm:$0xff] %v4978_v41  ;;  %v135_v45 = vld [vmem:[#allocation5 + $0x218] sm:$0xff]  ;;  %v4983_v50 = vcombine.low %v102_v25, %v118_v26  ;;  %v4987_v51 = vcombine.low %v103_v32, %v119_v33  ;;  %v4989_v52 = vcombine.high %v134_v42, %v150_v44 }
  0x46   :  { %v4943_v3 = vcombine.high %v292_v58, %v308_v59  ;;  %v4946_v5 = vcombine.high %v293_v60, %v309_v61  ;;  %v4953_v17 = vcombine.low %v292_v58, %v308_v59  ;;  %v4957_v18 = vcombine.low %v293_v60, %v309_v61  ;;  %v151_v49 = vld [vmem:[#allocation5 + $0x298] sm:$0xff]  ;;  %v166_v59 = vld [vmem:[#allocation5 + $0x310] sm:$0xff] }
  0x47   :  { %1611 = vmatpush1.bf16.msra.mxu0 %v4897_v35  ;;  %1654 = vmatpush1.bf16.msra.mxu1 %v4901_v36  ;;  %6749 = vst [vmem:[#allocation15_spill] sm:$0xff] %v4983_v50  ;;  %6750 = vst [vmem:[#allocation16_spill] sm:$0xff] %v4987_v51  ;;  %v4992_v58 = vcombine.high %v135_v45, %v151_v49  ;;  %v182_v60 = vld [vmem:[#allocation5 + $0x390] sm:$0xff]  ;;  %v167_v61 = vld [vmem:[#allocation5 + $0x318] sm:$0xff]  ;;  %v4997_v63 = vcombine.low %v134_v42, %v150_v44 }
  0x48   :  { %1612 = vmatprep.subr.bf16.mxu0 %v4903_v37  ;;  %1655 = vmatprep.subr.bf16.mxu1 %v4906_v38  ;;  %6751 = vst [vmem:[#allocation17_spill] sm:$0xff] %v4989_v52  ;;  %v183_v62 = vld [vmem:[#allocation5 + $0x398] sm:$0xff]  ;;  %v5001_v7 = vcombine.low %v135_v45, %v151_v49  ;;  %v5003_v8 = vcombine.high %v166_v59, %v182_v60  ;;  %v198_v13 = vld [vmem:[#allocation5 + $0x410] sm:$0xff] }
  0x49   :  { %6752 = vst [vmem:[#allocation18_spill] sm:$0xff] %v4992_v58  ;;  %6753 = vst [vmem:[#allocation19_spill] sm:$0xff] %v4997_v63  ;;  %v5006_v12 = vcombine.high %v167_v61, %v183_v62  ;;  %v214_v25 = vld [vmem:[#allocation5 + $0x490] sm:$0xff]  ;;  %v199_v26 = vld [vmem:[#allocation5 + $0x418] sm:$0xff]  ;;  %v5009_v33 = vcombine.low %v166_v59, %v182_v60  ;;  %v5013_v42 = vcombine.low %v167_v61, %v183_v62 }
  0x4a   :  { %6754 = vst [vmem:[#allocation20_spill] sm:$0xff] %v5001_v7  ;;  %6755 = vst [vmem:[#allocation21_spill] sm:$0xff] %v5003_v8  ;;  %v215_v32 = vld [vmem:[#allocation5 + $0x498] sm:$0xff]  ;;  %v5015_v44 = vcombine.high %v198_v13, %v214_v25  ;;  %v230_v49 = vld [vmem:[#allocation5 + $0x510] sm:$0xff]  ;;  %v5021_v59 = vcombine.low %v198_v13, %v214_v25 }
  0x4b   :  { %1613 = vmatpush1.bf16.msra.mxu0 %v4909_v43  ;;  %1656 = vmatpush1.bf16.msra.mxu1 %v4913_v46  ;;  %6756 = vst [vmem:[#allocation22_spill] sm:$0xff] %v5006_v12  ;;  %6757 = vst [vmem:[#allocation23_spill] sm:$0xff] %v5009_v33  ;;  %v5018_v45 = vcombine.high %v199_v26, %v215_v32  ;;  %v231_v16 = vld [vmem:[#allocation5 + $0x518] sm:$0xff]  ;;  %v5025_v60 = vcombine.low %v199_v26, %v215_v32 }
  0x4c   :  { %1614 = vmatprep.subr.bf16.mxu0 %v4915_v47  ;;  %1657 = vmatprep.subr.bf16.mxu1 %v4918_v48  ;;  %6758 = vst [vmem:[#allocation24_spill] sm:$0xff] %v5013_v42  ;;  %6759 = vst [vmem:[#allocation25_spill] sm:$0xff] %v5015_v44  ;;  %v247_v14 = vld [vmem:[#allocation5 + $0x598] sm:$0xff] }
  0x4d   :  { %6760 = vst [vmem:[#allocation26_spill] sm:$0xff] %v5018_v45  ;;  %6761 = vst [vmem:[#allocation27_spill] sm:$0xff] %v5021_v59  ;;  %v5030_v62 = vcombine.high %v231_v16, %v247_v14  ;;  %v5037_v25 = vcombine.low %v231_v16, %v247_v14 }
  0x4e   :  { %6762 = vst [vmem:[#allocation28_spill] sm:$0xff] %v5025_v60 }
  0x4f   :  { %1615 = vmatpush1.bf16.msra.mxu0 %v4923_v54  ;;  %1658 = vmatpush1.bf16.msra.mxu1 %v4927_v55  ;;  %6764 = vst [vmem:[#allocation30_spill] sm:$0xff] %v5030_v62  ;;  %6766 = vst [vmem:[#allocation32_spill] sm:$0xff] %v5037_v25 }
  0x50   :  { %1616 = vmatprep.subr.bf16.mxu0 %v4929_v56  ;;  %1659 = vmatprep.subr.bf16.mxu1 %v4932_v57 }
  0x53   :  { %1617 = vmatpush1.bf16.msra.mxu0 %v4937_v1  ;;  %1660 = vmatpush1.bf16.msra.mxu1 %v4941_v2 }
  0x54   :  { %1618 = vmatprep.subr.bf16.mxu0 %v4943_v3  ;;  %1661 = vmatprep.subr.bf16.mxu1 %v4946_v5 }
  0x57   :  { %1619 = vmatpush1.bf16.msra.mxu0 %v4953_v17  ;;  %1662 = vmatpush1.bf16.msra.mxu1 %v4957_v18 }
  0x58   :  { %1690 = vmatprep.subr.bf16.mxu0 %v4959_v23  ;;  %1733 = vmatprep.subr.bf16.mxu1 %v4962_v24 }
  0x5a   :  { %1637 = vmatmul.mubr.bf16.vlgmr.msra.gmra.mrb[0].mxu0 %v4966_v31  ;;  %1680 = vmatmul.mubr.bf16.vlgmr.msra.gmra.mrb[0].mxu1 %v4966_v31 }
  0x5b   :  { %1691 = vmatpush1.bf16.msra.mxu0 %v4969_v34  ;;  %1734 = vmatpush1.bf16.msra.mxu1 %v4973_v39 }
  0x5c   :  { %1692 = vmatprep.subr.bf16.mxu0 %v4975_v40  ;;  %1735 = vmatprep.subr.bf16.mxu1 %v4978_v41 }
  0x5d   :  { %1722 = vmatprep.mubr.bf16.mxu0 %v6334_v0  ;;  %1765 = vmatprep.mubr.bf16.mxu1 %v6334_v0  ;;  %v246_v0 = vld [vmem:[#allocation5 + $0x590] sm:$0xff] }
  0x5e   :  { %v5027_v61 = vcombine.high %v230_v49, %v246_v0  ;;  %v5033_v13 = vcombine.low %v230_v49, %v246_v0 }
  0x5f   :  { %1693 = vmatpush1.bf16.msra.mxu0 %v4983_v50  ;;  %1736 = vmatpush1.bf16.msra.mxu1 %v4987_v51 }
  0x60   :  { %1694 = vmatprep.subr.bf16.mxu0 %v4989_v52  ;;  %1737 = vmatprep.subr.bf16.mxu1 %v4992_v58  ;;  %6763 = vst [vmem:[#allocation29_spill] sm:$0xff] %v5027_v61  ;;  %6765 = vst [vmem:[#allocation31_spill] sm:$0xff] %v5033_v13  ;;  %v217_v58 = vld [vmem:[#allocation5 + $0x4a8] sm:$0xff] }
  0x63   :  { %1695 = vmatpush1.bf16.msra.mxu0 %v4997_v63  ;;  %1738 = vmatpush1.bf16.msra.mxu1 %v5001_v7  ;;  %v263_v7 = vld [vmem:[#allocation5 + $0x618] sm:$0xff] }
  0x64   :  { %1696 = vmatprep.subr.bf16.mxu0 %v5003_v8  ;;  %1739 = vmatprep.subr.bf16.mxu1 %v5006_v12  ;;  %v262_v12 = vld [vmem:[#allocation5 + $0x610] sm:$0xff]  ;;  %v279_v63 = vld [vmem:[#allocation5 + $0x698] sm:$0xff] }
  0x65   :  { %v278_v8 = vld [vmem:[#allocation5 + $0x690] sm:$0xff]  ;;  %v5042_v32 = vcombine.high %v263_v7, %v279_v63  ;;  %v5049_v14 = vcombine.low %v263_v7, %v279_v63 }
  0x66   :  { %v5039_v26 = vcombine.high %v262_v12, %v278_v8  ;;  %v5045_v0 = vcombine.low %v262_v12, %v278_v8 }
  0x67   :  { %1697 = vmatpush1.bf16.msra.mxu0 %v5009_v33  ;;  %1740 = vmatpush1.bf16.msra.mxu1 %v5013_v42  ;;  %6768 = vst [vmem:[#allocation34_spill] sm:$0xff] %v5042_v32  ;;  %v295_v42 = vld [vmem:[#allocation5 + $0x718] sm:$0xff]  ;;  %6770 = vst [vmem:[#allocation36_spill] sm:$0xff] %v5049_v14 }
  0x68   :  { %1698 = vmatprep.subr.bf16.mxu0 %v5015_v44  ;;  %1741 = vmatprep.subr.bf16.mxu1 %v5018_v45  ;;  %6767 = vst [vmem:[#allocation33_spill] sm:$0xff] %v5039_v26  ;;  %v294_v45 = vld [vmem:[#allocation5 + $0x710] sm:$0xff]  ;;  %v311_v33 = vld [vmem:[#allocation5 + $0x798] sm:$0xff]  ;;  %6769 = vst [vmem:[#allocation35_spill] sm:$0xff] %v5045_v0 }
  0x69   :  { %v310_v44 = vld [vmem:[#allocation5 + $0x790] sm:$0xff]  ;;  %v5054_v49 = vcombine.high %v295_v42, %v311_v33  ;;  %v5061_v63 = vcombine.low %v295_v42, %v311_v33 }
  0x6a   :  { %v5051_v16 = vcombine.high %v294_v45, %v310_v44  ;;  %v5057_v8 = vcombine.low %v294_v45, %v310_v44 }
  0x6b   :  { %1699 = vmatpush1.bf16.msra.mxu0 %v5021_v59  ;;  %1742 = vmatpush1.bf16.msra.mxu1 %v5025_v60  ;;  %6772 = vst [vmem:[#allocation38_spill] sm:$0xff] %v5054_v49  ;;  %v73_v60 = vld [vmem:[#allocation5 + $0x28] sm:$0xff]  ;;  %6774 = vst [vmem:[#allocation40_spill] sm:$0xff] %v5061_v63 }
  0x6c   :  { %1700 = vmatprep.subr.bf16.mxu0 %v5027_v61  ;;  %1743 = vmatprep.subr.bf16.mxu1 %v5030_v62  ;;  %6771 = vst [vmem:[#allocation37_spill] sm:$0xff] %v5051_v16  ;;  %v72_v62 = vld [vmem:[#allocation5 + $0x20] sm:$0xff]  ;;  %v89_v59 = vld [vmem:[#allocation5 + $0xa8] sm:$0xff]  ;;  %6773 = vst [vmem:[#allocation39_spill] sm:$0xff] %v5057_v8 }
  0x6d   :  { %v88_v61 = vld [vmem:[#allocation5 + $0xa0] sm:$0xff]  ;;  %v5066_v12 = vcombine.high %v73_v60, %v89_v59  ;;  %v5073_v33 = vcombine.low %v73_v60, %v89_v59 }
  0x6e   :  { %v5063_v7 = vcombine.high %v72_v62, %v88_v61  ;;  %v5069_v44 = vcombine.low %v72_v62, %v88_v61 }
  0x6f   :  { %1701 = vmatpush1.bf16.msra.mxu0 %v5033_v13  ;;  %1744 = vmatpush1.bf16.msra.mxu1 %v5037_v25  ;;  %6776 = vst [vmem:[#allocation42_spill] sm:$0xff] %v5066_v12  ;;  %v105_v25 = vld [vmem:[#allocation5 + $0x128] sm:$0xff]  ;;  %6778 = vst [vmem:[#allocation44_spill] sm:$0xff] %v5073_v33 }
  0x70   :  { %1702 = vmatprep.subr.bf16.mxu0 %v5039_v26  ;;  %1745 = vmatprep.subr.bf16.mxu1 %v5042_v32  ;;  %6775 = vst [vmem:[#allocation41_spill] sm:$0xff] %v5063_v7  ;;  %v104_v32 = vld [vmem:[#allocation5 + $0x120] sm:$0xff]  ;;  %v121_v13 = vld [vmem:[#allocation5 + $0x1a8] sm:$0xff]  ;;  %6777 = vst [vmem:[#allocation43_spill] sm:$0xff] %v5069_v44 }
  0x71   :  { %v120_v26 = vld [vmem:[#allocation5 + $0x1a0] sm:$0xff]  ;;  %v5078_v45 = vcombine.high %v105_v25, %v121_v13  ;;  %v5087_v59 = vcombine.low %v105_v25, %v121_v13 }
  0x72   :  { %v5075_v42 = vcombine.high %v104_v32, %v120_v26  ;;  %v5083_v61 = vcombine.low %v104_v32, %v120_v26 }
  0x73   :  { %1703 = vmatpush1.bf16.msra.mxu0 %v5045_v0  ;;  %1746 = vmatpush1.bf16.msra.mxu1 %v5049_v14  ;;  %6780 = vst [vmem:[#allocation46_spill] sm:$0xff] %v5078_v45  ;;  %v137_v14 = vld [vmem:[#allocation5 + $0x228] sm:$0xff]  ;;  %6782 = vst [vmem:[#allocation48_spill] sm:$0xff] %v5087_v59 }
  0x74   :  { %1704 = vmatprep.subr.bf16.mxu0 %v5051_v16  ;;  %1747 = vmatprep.subr.bf16.mxu1 %v5054_v49  ;;  %6779 = vst [vmem:[#allocation45_spill] sm:$0xff] %v5075_v42  ;;  %v136_v49 = vld [vmem:[#allocation5 + $0x220] sm:$0xff]  ;;  %6781 = vst [vmem:[#allocation47_spill] sm:$0xff] %v5083_v61  ;;  %v169_v0 = vld [vmem:[#allocation5 + $0x328] sm:$0xff] }
  0x75   :  { %v152_v16 = vld [vmem:[#allocation5 + $0x2a0] sm:$0xff] }
  0x76   :  { %v5089_v60 = vcombine.high %v136_v49, %v152_v16  ;;  %v5097_v26 = vcombine.low %v136_v49, %v152_v16 }
  0x77   :  { %1705 = vmatpush1.bf16.msra.mxu0 %v5057_v8  ;;  %1748 = vmatpush1.bf16.msra.mxu1 %v5061_v63  ;;  %v153_v8 = vld [vmem:[#allocation5 + $0x2a8] sm:$0xff]  ;;  %v6785_v63 = vmov 0  }
  0x78   :  { %1776 = vmatprep.subr.bf16.mxu0 %v5063_v7  ;;  %1819 = vmatprep.subr.bf16.mxu1 %v5066_v12  ;;  %6783 = vst [vmem:[#allocation49_spill] sm:$0xff] %v5089_v60  ;;  %v5092_v62 = vcombine.high %v137_v14, %v153_v8  ;;  %v168_v12 = vld [vmem:[#allocation5 + $0x320] sm:$0xff]  ;;  %6786 = vst [vmem:[#allocation51_spill] sm:$0xff] %v5097_v26  ;;  %v5101_v13 = vcombine.low %v137_v14, %v153_v8 }
  0x79   :  { %v184_v7 = vld [vmem:[#allocation5 + $0x3a0] sm:$0xff] }
  0x7a   :  { %1723 = vmatmul.mubr.bf16.vlgmr.msra.gmra.mrb[4].mxu0 %v4966_v31  ;;  %1766 = vmatmul.mubr.bf16.vlgmr.msra.gmra.mrb[4].mxu1 %v4966_v31  ;;  %6784 = vst [vmem:[#allocation50_spill] sm:$0xff] %v5092_v62  ;;  %6787 = vst [vmem:[#allocation52_spill] sm:$0xff] %v5101_v13  ;;  %v5103_v25 = vcombine.high %v168_v12, %v184_v7  ;;  %v5109_v16 = vcombine.low %v168_v12, %v184_v7 }
  0x7b   :  { %1777 = vmatpush1.bf16.msra.mxu0 %v5069_v44  ;;  %1820 = vmatpush1.bf16.msra.mxu1 %v5073_v33  ;;  %v185_v44 = vld [vmem:[#allocation5 + $0x3a8] sm:$0xff] }
  0x7c   :  { %1778 = vmatprep.subr.bf16.mxu0 %v5075_v42  ;;  %1821 = vmatprep.subr.bf16.mxu1 %v5078_v45  ;;  %6788 = vst [vmem:[#allocation53_spill] sm:$0xff] %v5103_v25  ;;  %v5106_v32 = vcombine.high %v169_v0, %v185_v44  ;;  %v200_v45 = vld [vmem:[#allocation5 + $0x420] sm:$0xff]  ;;  %v201_v33 = vld [vmem:[#allocation5 + $0x428] sm:$0xff]  ;;  %6790 = vst [vmem:[#allocation55_spill] sm:$0xff] %v5109_v16  ;;  %v5113_v14 = vcombine.low %v169_v0, %v185_v44 }
  0x7d   :  { %1808 = vmatprep.mubr.bf16.mxu0 %v6785_v63  ;;  %1851 = vmatprep.mubr.bf16.mxu1 %v6785_v63  ;;  %v216_v42 = vld [vmem:[#allocation5 + $0x4a0] sm:$0xff]  ;;  %v5118_v8 = vcombine.high %v201_v33, %v217_v58  ;;  %v5125_v0 = vcombine.low %v201_v33, %v217_v58 }
  0x7e   :  { %6789 = vst [vmem:[#allocation54_spill] sm:$0xff] %v5106_v32  ;;  %6791 = vst [vmem:[#allocation56_spill] sm:$0xff] %v5113_v14  ;;  %v5115_v49 = vcombine.high %v200_v45, %v216_v42  ;;  %v5121_v7 = vcombine.low %v200_v45, %v216_v42 }
  0x7f   :  { %1779 = vmatpush1.bf16.msra.mxu0 %v5083_v61  ;;  %1822 = vmatpush1.bf16.msra.mxu1 %v5087_v59  ;;  %6793 = vst [vmem:[#allocation58_spill] sm:$0xff] %v5118_v8  ;;  %v233_v59 = vld [vmem:[#allocation5 + $0x528] sm:$0xff]  ;;  %6795 = vst [vmem:[#allocation60_spill] sm:$0xff] %v5125_v0 }
  0x80   :  { %1780 = vmatprep.subr.bf16.mxu0 %v5089_v60  ;;  %1823 = vmatprep.subr.bf16.mxu1 %v5092_v62  ;;  %6792 = vst [vmem:[#allocation57_spill] sm:$0xff] %v5115_v49  ;;  %v232_v62 = vld [vmem:[#allocation5 + $0x520] sm:$0xff]  ;;  %v249_v61 = vld [vmem:[#allocation5 + $0x5a8] sm:$0xff]  ;;  %6794 = vst [vmem:[#allocation59_spill] sm:$0xff] %v5121_v7 }
  0x81   :  { %v248_v60 = vld [vmem:[#allocation5 + $0x5a0] sm:$0xff]  ;;  %v5130_v44 = vcombine.high %v233_v59, %v249_v61  ;;  %v5137_v58 = vcombine.low %v233_v59, %v249_v61 }
  0x82   :  { %v5127_v12 = vcombine.high %v232_v62, %v248_v60  ;;  %v5133_v42 = vcombine.low %v232_v62, %v248_v60 }
  0x83   :  { %1781 = vmatpush1.bf16.msra.mxu0 %v5097_v26  ;;  %1824 = vmatpush1.bf16.msra.mxu1 %v5101_v13  ;;  %6797 = vst [vmem:[#allocation62_spill] sm:$0xff] %v5130_v44  ;;  %v265_v13 = vld [vmem:[#allocation5 + $0x628] sm:$0xff]  ;;  %6799 = vst [vmem:[#allocation64_spill] sm:$0xff] %v5137_v58 }
  0x84   :  { %1782 = vmatprep.subr.bf16.mxu0 %v5103_v25  ;;  %1825 = vmatprep.subr.bf16.mxu1 %v5106_v32  ;;  %6796 = vst [vmem:[#allocation61_spill] sm:$0xff] %v5127_v12  ;;  %v264_v32 = vld [vmem:[#allocation5 + $0x620] sm:$0xff]  ;;  %v281_v26 = vld [vmem:[#allocation5 + $0x6a8] sm:$0xff]  ;;  %6798 = vst [vmem:[#allocation63_spill] sm:$0xff] %v5133_v42 }
  0x85   :  { %v280_v25 = vld [vmem:[#allocation5 + $0x6a0] sm:$0xff]  ;;  %v5142_v45 = vcombine.high %v265_v13, %v281_v26  ;;  %v5149_v61 = vcombine.low %v265_v13, %v281_v26 }
  0x86   :  { %v5139_v33 = vcombine.high %v264_v32, %v280_v25  ;;  %v5145_v60 = vcombine.low %v264_v32, %v280_v25 }
  0x87   :  { %1783 = vmatpush1.bf16.msra.mxu0 %v5109_v16  ;;  %1826 = vmatpush1.bf16.msra.mxu1 %v5113_v14  ;;  %6801 = vst [vmem:[#allocation66_spill] sm:$0xff] %v5142_v45  ;;  %v297_v14 = vld [vmem:[#allocation5 + $0x728] sm:$0xff]  ;;  %6803 = vst [vmem:[#allocation68_spill] sm:$0xff] %v5149_v61 }
  0x88   :  { %1784 = vmatprep.subr.bf16.mxu0 %v5115_v49  ;;  %1827 = vmatprep.subr.bf16.mxu1 %v5118_v8  ;;  %6800 = vst [vmem:[#allocation65_spill] sm:$0xff] %v5139_v33  ;;  %v296_v8 = vld [vmem:[#allocation5 + $0x720] sm:$0xff]  ;;  %v313_v16 = vld [vmem:[#allocation5 + $0x7a8] sm:$0xff]  ;;  %6802 = vst [vmem:[#allocation67_spill] sm:$0xff] %v5145_v60 }
  0x89   :  { %v312_v49 = vld [vmem:[#allocation5 + $0x7a0] sm:$0xff]  ;;  %v5154_v62 = vcombine.high %v297_v14, %v313_v16  ;;  %v5161_v26 = vcombine.low %v297_v14, %v313_v16 }
  0x8a   :  { %v5151_v59 = vcombine.high %v296_v8, %v312_v49  ;;  %v5157_v25 = vcombine.low %v296_v8, %v312_v49 }
  0x8b   :  { %1785 = vmatpush1.bf16.msra.mxu0 %v5121_v7  ;;  %1828 = vmatpush1.bf16.msra.mxu1 %v5125_v0  ;;  %6805 = vst [vmem:[#allocation70_spill] sm:$0xff] %v5154_v62  ;;  %v75_v0 = vld [vmem:[#allocation5 + $0x38] sm:$0xff]  ;;  %6807 = vst [vmem:[#allocation72_spill] sm:$0xff] %v5161_v26 }
  0x8c   :  { %1786 = vmatprep.subr.bf16.mxu0 %v5127_v12  ;;  %1829 = vmatprep.subr.bf16.mxu1 %v5130_v44  ;;  %6804 = vst [vmem:[#allocation69_spill] sm:$0xff] %v5151_v59  ;;  %v74_v44 = vld [vmem:[#allocation5 + $0x30] sm:$0xff]  ;;  %v91_v7 = vld [vmem:[#allocation5 + $0xb8] sm:$0xff]  ;;  %6806 = vst [vmem:[#allocation71_spill] sm:$0xff] %v5157_v25 }
  0x8d   :  { %v90_v12 = vld [vmem:[#allocation5 + $0xb0] sm:$0xff]  ;;  %v5166_v32 = vcombine.high %v75_v0, %v91_v7  ;;  %v5173_v16 = vcombine.low %v75_v0, %v91_v7 }
  0x8e   :  { %v5163_v13 = vcombine.high %v74_v44, %v90_v12  ;;  %v5169_v49 = vcombine.low %v74_v44, %v90_v12 }
  0x8f   :  { %1787 = vmatpush1.bf16.msra.mxu0 %v5133_v42  ;;  %1830 = vmatpush1.bf16.msra.mxu1 %v5137_v58  ;;  %6809 = vst [vmem:[#allocation74_spill] sm:$0xff] %v5166_v32  ;;  %v107_v58 = vld [vmem:[#allocation5 + $0x138] sm:$0xff]  ;;  %6811 = vst [vmem:[#allocation76_spill] sm:$0xff] %v5173_v16 }
  0x90   :  { %1788 = vmatprep.subr.bf16.mxu0 %v5139_v33  ;;  %1831 = vmatprep.subr.bf16.mxu1 %v5142_v45  ;;  %6808 = vst [vmem:[#allocation73_spill] sm:$0xff] %v5163_v13  ;;  %v106_v45 = vld [vmem:[#allocation5 + $0x130] sm:$0xff]  ;;  %v123_v42 = vld [vmem:[#allocation5 + $0x1b8] sm:$0xff]  ;;  %6810 = vst [vmem:[#allocation75_spill] sm:$0xff] %v5169_v49 }
  0x91   :  { %v122_v33 = vld [vmem:[#allocation5 + $0x1b0] sm:$0xff]  ;;  %v5178_v8 = vcombine.high %v107_v58, %v123_v42  ;;  %v5187_v7 = vcombine.low %v107_v58, %v123_v42 }
  0x92   :  { %v5175_v14 = vcombine.high %v106_v45, %v122_v33  ;;  %v5183_v12 = vcombine.low %v106_v45, %v122_v33 }
  0x93   :  { %1789 = vmatpush1.bf16.msra.mxu0 %v5145_v60  ;;  %1832 = vmatpush1.bf16.msra.mxu1 %v5149_v61  ;;  %6813 = vst [vmem:[#allocation78_spill] sm:$0xff] %v5178_v8  ;;  %v139_v61 = vld [vmem:[#allocation5 + $0x238] sm:$0xff]  ;;  %6815 = vst [vmem:[#allocation80_spill] sm:$0xff] %v5187_v7 }
  0x94   :  { %1790 = vmatprep.subr.bf16.mxu0 %v5151_v59  ;;  %1833 = vmatprep.subr.bf16.mxu1 %v5154_v62  ;;  %6812 = vst [vmem:[#allocation77_spill] sm:$0xff] %v5175_v14  ;;  %v138_v62 = vld [vmem:[#allocation5 + $0x230] sm:$0xff]  ;;  %6814 = vst [vmem:[#allocation79_spill] sm:$0xff] %v5183_v12  ;;  %v219_v60 = vld [vmem:[#allocation5 + $0x4b8] sm:$0xff] }
  0x95   :  { %v154_v59 = vld [vmem:[#allocation5 + $0x2b0] sm:$0xff] }
  0x96   :  { %v5189_v0 = vcombine.high %v138_v62, %v154_v59  ;;  %v5197_v33 = vcombine.low %v138_v62, %v154_v59 }
  0x97   :  { %1791 = vmatpush1.bf16.msra.mxu0 %v5157_v25  ;;  %1834 = vmatpush1.bf16.msra.mxu1 %v5161_v26  ;;  %v155_v25 = vld [vmem:[#allocation5 + $0x2b8] sm:$0xff] }
  0x98   :  { %1862 = vmatprep.subr.bf16.mxu0 %v5163_v13  ;;  %1905 = vmatprep.subr.bf16.mxu1 %v5166_v32  ;;  %6816 = vst [vmem:[#allocation81_spill] sm:$0xff] %v5189_v0  ;;  %v5192_v44 = vcombine.high %v139_v61, %v155_v25  ;;  %v170_v32 = vld [vmem:[#allocation5 + $0x330] sm:$0xff]  ;;  %v171_v26 = vld [vmem:[#allocation5 + $0x338] sm:$0xff]  ;;  %6818 = vst [vmem:[#allocation83_spill] sm:$0xff] %v5197_v33  ;;  %v5201_v42 = vcombine.low %v139_v61, %v155_v25 }
  0x99   :  { %v186_v13 = vld [vmem:[#allocation5 + $0x3b0] sm:$0xff] }
  0x9a   :  { %1809 = vmatmul.mubr.bf16.vlgmr.msra.gmra.mrb[8].mxu0 %v4966_v31  ;;  %1852 = vmatmul.mubr.bf16.vlgmr.msra.gmra.mrb[8].mxu1 %v4966_v31  ;;  %6817 = vst [vmem:[#allocation82_spill] sm:$0xff] %v5192_v44  ;;  %6819 = vst [vmem:[#allocation84_spill] sm:$0xff] %v5201_v42  ;;  %v5203_v58 = vcombine.high %v170_v32, %v186_v13  ;;  %v5209_v59 = vcombine.low %v170_v32, %v186_v13 }
  0x9b   :  { %1863 = vmatpush1.bf16.msra.mxu0 %v5169_v49  ;;  %1906 = vmatpush1.bf16.msra.mxu1 %v5173_v16  ;;  %v187_v49 = vld [vmem:[#allocation5 + $0x3b8] sm:$0xff] }
  0x9c   :  { %1864 = vmatprep.subr.bf16.mxu0 %v5175_v14  ;;  %1907 = vmatprep.subr.bf16.mxu1 %v5178_v8  ;;  %6820 = vst [vmem:[#allocation85_spill] sm:$0xff] %v5203_v58  ;;  %v5206_v45 = vcombine.high %v171_v26, %v187_v49  ;;  %v202_v8 = vld [vmem:[#allocation5 + $0x430] sm:$0xff]  ;;  %v203_v16 = vld [vmem:[#allocation5 + $0x438] sm:$0xff]  ;;  %6822 = vst [vmem:[#allocation87_spill] sm:$0xff] %v5209_v59  ;;  %v5213_v61 = vcombine.low %v171_v26, %v187_v49 }
  0x9d   :  { %1894 = vmatprep.mubr.bf16.mxu0 %v6785_v63  ;;  %1937 = vmatprep.mubr.bf16.mxu1 %v6785_v63  ;;  %v218_v14 = vld [vmem:[#allocation5 + $0x4b0] sm:$0xff]  ;;  %v5218_v25 = vcombine.high %v203_v16, %v219_v60  ;;  %v5225_v26 = vcombine.low %v203_v16, %v219_v60 }
  0x9e   :  { %6821 = vst [vmem:[#allocation86_spill] sm:$0xff] %v5206_v45  ;;  %6823 = vst [vmem:[#allocation88_spill] sm:$0xff] %v5213_v61  ;;  %v5215_v62 = vcombine.high %v202_v8, %v218_v14  ;;  %v5221_v13 = vcombine.low %v202_v8, %v218_v14 }
  0x9f   :  { %1865 = vmatpush1.bf16.msra.mxu0 %v5183_v12  ;;  %1908 = vmatpush1.bf16.msra.mxu1 %v5187_v7  ;;  %6825 = vst [vmem:[#allocation90_spill] sm:$0xff] %v5218_v25  ;;  %v235_v7 = vld [vmem:[#allocation5 + $0x538] sm:$0xff]  ;;  %6827 = vst [vmem:[#allocation92_spill] sm:$0xff] %v5225_v26 }
  0xa0   :  { %1866 = vmatprep.subr.bf16.mxu0 %v5189_v0  ;;  %1909 = vmatprep.subr.bf16.mxu1 %v5192_v44  ;;  %6824 = vst [vmem:[#allocation89_spill] sm:$0xff] %v5215_v62  ;;  %v234_v44 = vld [vmem:[#allocation5 + $0x530] sm:$0xff]  ;;  %v251_v12 = vld [vmem:[#allocation5 + $0x5b8] sm:$0xff]  ;;  %6826 = vst [vmem:[#allocation91_spill] sm:$0xff] %v5221_v13 }
  0xa1   :  { %v250_v0 = vld [vmem:[#allocation5 + $0x5b0] sm:$0xff]  ;;  %v5230_v49 = vcombine.high %v235_v7, %v251_v12  ;;  %v5237_v60 = vcombine.low %v235_v7, %v251_v12 }
  0xa2   :  { %v5227_v32 = vcombine.high %v234_v44, %v250_v0  ;;  %v5233_v14 = vcombine.low %v234_v44, %v250_v0 }
  0xa3   :  { %1867 = vmatpush1.bf16.msra.mxu0 %v5197_v33  ;;  %1910 = vmatpush1.bf16.msra.mxu1 %v5201_v42  ;;  %6829 = vst [vmem:[#allocation94_spill] sm:$0xff] %v5230_v49  ;;  %v267_v42 = vld [vmem:[#allocation5 + $0x638] sm:$0xff]  ;;  %6831 = vst [vmem:[#allocation96_spill] sm:$0xff] %v5237_v60 }
  0xa4   :  { %1868 = vmatprep.subr.bf16.mxu0 %v5203_v58  ;;  %1911 = vmatprep.subr.bf16.mxu1 %v5206_v45  ;;  %6828 = vst [vmem:[#allocation93_spill] sm:$0xff] %v5227_v32  ;;  %v266_v45 = vld [vmem:[#allocation5 + $0x630] sm:$0xff]  ;;  %v283_v33 = vld [vmem:[#allocation5 + $0x6b8] sm:$0xff]  ;;  %6830 = vst [vmem:[#allocation95_spill] sm:$0xff] %v5233_v14 }
  0xa5   :  { %v282_v58 = vld [vmem:[#allocation5 + $0x6b0] sm:$0xff]  ;;  %v5242_v8 = vcombine.high %v267_v42, %v283_v33  ;;  %v5249_v12 = vcombine.low %v267_v42, %v283_v33 }
  0xa6   :  { %v5239_v16 = vcombine.high %v266_v45, %v282_v58  ;;  %v5245_v0 = vcombine.low %v266_v45, %v282_v58 }
  0xa7   :  { %1869 = vmatpush1.bf16.msra.mxu0 %v5209_v59  ;;  %1912 = vmatpush1.bf16.msra.mxu1 %v5213_v61  ;;  %6833 = vst [vmem:[#allocation98_spill] sm:$0xff] %v5242_v8  ;;  %v299_v61 = vld [vmem:[#allocation5 + $0x738] sm:$0xff]  ;;  %6835 = vst [vmem:[#allocation100_spill] sm:$0xff] %v5249_v12 }
  0xa8   :  { %1870 = vmatprep.subr.bf16.mxu0 %v5215_v62  ;;  %1913 = vmatprep.subr.bf16.mxu1 %v5218_v25  ;;  %6832 = vst [vmem:[#allocation97_spill] sm:$0xff] %v5239_v16  ;;  %v298_v25 = vld [vmem:[#allocation5 + $0x730] sm:$0xff]  ;;  %v315_v59 = vld [vmem:[#allocation5 + $0x7b8] sm:$0xff]  ;;  %6834 = vst [vmem:[#allocation99_spill] sm:$0xff] %v5245_v0 }
  0xa9   :  { %v314_v62 = vld [vmem:[#allocation5 + $0x7b0] sm:$0xff]  ;;  %v5254_v44 = vcombine.high %v299_v61, %v315_v59  ;;  %v5261_v33 = vcombine.low %v299_v61, %v315_v59 }
  0xaa   :  { %v5251_v7 = vcombine.high %v298_v25, %v314_v62  ;;  %v5257_v58 = vcombine.low %v298_v25, %v314_v62 }
  0xab   :  { %1871 = vmatpush1.bf16.msra.mxu0 %v5221_v13  ;;  %1914 = vmatpush1.bf16.msra.mxu1 %v5225_v26  ;;  %6837 = vst [vmem:[#allocation102_spill] sm:$0xff] %v5254_v44  ;;  %v77_v26 = vld [vmem:[#allocation5 + $0x48] sm:$0xff]  ;;  %6839 = vst [vmem:[#allocation104_spill] sm:$0xff] %v5261_v33 }
  0xac   :  { %1872 = vmatprep.subr.bf16.mxu0 %v5227_v32  ;;  %1915 = vmatprep.subr.bf16.mxu1 %v5230_v49  ;;  %6836 = vst [vmem:[#allocation101_spill] sm:$0xff] %v5251_v7  ;;  %v76_v49 = vld [vmem:[#allocation5 + $0x40] sm:$0xff]  ;;  %v93_v13 = vld [vmem:[#allocation5 + $0xc8] sm:$0xff]  ;;  %6838 = vst [vmem:[#allocation103_spill] sm:$0xff] %v5257_v58 }
  0xad   :  { %v92_v32 = vld [vmem:[#allocation5 + $0xc0] sm:$0xff]  ;;  %v5266_v45 = vcombine.high %v77_v26, %v93_v13  ;;  %v5273_v59 = vcombine.low %v77_v26, %v93_v13 }
  0xae   :  { %v5263_v42 = vcombine.high %v76_v49, %v92_v32  ;;  %v5269_v62 = vcombine.low %v76_v49, %v92_v32 }
  0xaf   :  { %1873 = vmatpush1.bf16.msra.mxu0 %v5233_v14  ;;  %1916 = vmatpush1.bf16.msra.mxu1 %v5237_v60  ;;  %6841 = vst [vmem:[#allocation106_spill] sm:$0xff] %v5266_v45  ;;  %v109_v60 = vld [vmem:[#allocation5 + $0x148] sm:$0xff]  ;;  %6843 = vst [vmem:[#allocation108_spill] sm:$0xff] %v5273_v59 }
  0xb0   :  { %1874 = vmatprep.subr.bf16.mxu0 %v5239_v16  ;;  %1917 = vmatprep.subr.bf16.mxu1 %v5242_v8  ;;  %6840 = vst [vmem:[#allocation105_spill] sm:$0xff] %v5263_v42  ;;  %v108_v8 = vld [vmem:[#allocation5 + $0x140] sm:$0xff]  ;;  %v125_v14 = vld [vmem:[#allocation5 + $0x1c8] sm:$0xff]  ;;  %6842 = vst [vmem:[#allocation107_spill] sm:$0xff] %v5269_v62 }
  0xb1   :  { %v124_v16 = vld [vmem:[#allocation5 + $0x1c0] sm:$0xff]  ;;  %v5278_v25 = vcombine.high %v109_v60, %v125_v14  ;;  %v5287_v13 = vcombine.low %v109_v60, %v125_v14 }
  0xb2   :  { %v5275_v61 = vcombine.high %v108_v8, %v124_v16  ;;  %v5283_v32 = vcombine.low %v108_v8, %v124_v16 }
  0xb3   :  { %1875 = vmatpush1.bf16.msra.mxu0 %v5245_v0  ;;  %1918 = vmatpush1.bf16.msra.mxu1 %v5249_v12  ;;  %6845 = vst [vmem:[#allocation110_spill] sm:$0xff] %v5278_v25  ;;  %v141_v12 = vld [vmem:[#allocation5 + $0x248] sm:$0xff]  ;;  %6847 = vst [vmem:[#allocation112_spill] sm:$0xff] %v5287_v13 }
  0xb4   :  { %1876 = vmatprep.subr.bf16.mxu0 %v5251_v7  ;;  %1919 = vmatprep.subr.bf16.mxu1 %v5254_v44  ;;  %6844 = vst [vmem:[#allocation109_spill] sm:$0xff] %v5275_v61  ;;  %v140_v44 = vld [vmem:[#allocation5 + $0x240] sm:$0xff]  ;;  %6846 = vst [vmem:[#allocation111_spill] sm:$0xff] %v5283_v32  ;;  %v221_v0 = vld [vmem:[#allocation5 + $0x4c8] sm:$0xff] }
  0xb5   :  { %v156_v7 = vld [vmem:[#allocation5 + $0x2c0] sm:$0xff] }
  0xb6   :  { %v5289_v26 = vcombine.high %v140_v44, %v156_v7  ;;  %v5297_v16 = vcombine.low %v140_v44, %v156_v7 }
  0xb7   :  { %1877 = vmatpush1.bf16.msra.mxu0 %v5257_v58  ;;  %1920 = vmatpush1.bf16.msra.mxu1 %v5261_v33  ;;  %v157_v58 = vld [vmem:[#allocation5 + $0x2c8] sm:$0xff] }
  0xb8   :  { %1948 = vmatprep.subr.bf16.mxu0 %v5263_v42  ;;  %1991 = vmatprep.subr.bf16.mxu1 %v5266_v45  ;;  %6848 = vst [vmem:[#allocation113_spill] sm:$0xff] %v5289_v26  ;;  %v5292_v49 = vcombine.high %v141_v12, %v157_v58  ;;  %v172_v45 = vld [vmem:[#allocation5 + $0x340] sm:$0xff]  ;;  %v173_v33 = vld [vmem:[#allocation5 + $0x348] sm:$0xff]  ;;  %6850 = vst [vmem:[#allocation115_spill] sm:$0xff] %v5297_v16  ;;  %v5301_v14 = vcombine.low %v141_v12, %v157_v58 }
  0xb9   :  { %v188_v42 = vld [vmem:[#allocation5 + $0x3c0] sm:$0xff] }
  0xba   :  { %1895 = vmatmul.mubr.bf16.vlgmr.msra.gmra.mrb[12].mxu0 %v4966_v31  ;;  %1938 = vmatmul.mubr.bf16.vlgmr.msra.gmra.mrb[12].mxu1 %v4966_v31  ;;  %6849 = vst [vmem:[#allocation114_spill] sm:$0xff] %v5292_v49  ;;  %6851 = vst [vmem:[#allocation116_spill] sm:$0xff] %v5301_v14  ;;  %v5303_v60 = vcombine.high %v172_v45, %v188_v42  ;;  %v5309_v7 = vcombine.low %v172_v45, %v188_v42 }
  0xbb   :  { %1949 = vmatpush1.bf16.msra.mxu0 %v5269_v62  ;;  %1992 = vmatpush1.bf16.msra.mxu1 %v5273_v59  ;;  %v189_v62 = vld [vmem:[#allocation5 + $0x3c8] sm:$0xff] }
  0xbc   :  { %1950 = vmatprep.subr.bf16.mxu0 %v5275_v61  ;;  %1993 = vmatprep.subr.bf16.mxu1 %v5278_v25  ;;  %6852 = vst [vmem:[#allocation117_spill] sm:$0xff] %v5303_v60  ;;  %v5306_v8 = vcombine.high %v173_v33, %v189_v62  ;;  %v204_v25 = vld [vmem:[#allocation5 + $0x440] sm:$0xff]  ;;  %v205_v59 = vld [vmem:[#allocation5 + $0x448] sm:$0xff]  ;;  %6854 = vst [vmem:[#allocation119_spill] sm:$0xff] %v5309_v7  ;;  %v5313_v12 = vcombine.low %v173_v33, %v189_v62 }
  0xbd   :  { %1980 = vmatprep.mubr.bf16.mxu0 %v6785_v63  ;;  %2023 = vmatprep.mubr.bf16.mxu1 %v6785_v63  ;;  %v220_v61 = vld [vmem:[#allocation5 + $0x4c0] sm:$0xff]  ;;  %v5318_v58 = vcombine.high %v205_v59, %v221_v0  ;;  %v5325_v33 = vcombine.low %v205_v59, %v221_v0 }
  0xbe   :  { %6853 = vst [vmem:[#allocation118_spill] sm:$0xff] %v5306_v8  ;;  %6855 = vst [vmem:[#allocation120_spill] sm:$0xff] %v5313_v12  ;;  %v5315_v44 = vcombine.high %v204_v25, %v220_v61  ;;  %v5321_v42 = vcombine.low %v204_v25, %v220_v61 }
  0xbf   :  { %1951 = vmatpush1.bf16.msra.mxu0 %v5283_v32  ;;  %1994 = vmatpush1.bf16.msra.mxu1 %v5287_v13  ;;  %6857 = vst [vmem:[#allocation122_spill] sm:$0xff] %v5318_v58  ;;  %v237_v13 = vld [vmem:[#allocation5 + $0x548] sm:$0xff]  ;;  %6859 = vst [vmem:[#allocation124_spill] sm:$0xff] %v5325_v33 }
  0xc0   :  { %1952 = vmatprep.subr.bf16.mxu0 %v5289_v26  ;;  %1995 = vmatprep.subr.bf16.mxu1 %v5292_v49  ;;  %6856 = vst [vmem:[#allocation121_spill] sm:$0xff] %v5315_v44  ;;  %v236_v49 = vld [vmem:[#allocation5 + $0x540] sm:$0xff]  ;;  %v253_v32 = vld [vmem:[#allocation5 + $0x5c8] sm:$0xff]  ;;  %6858 = vst [vmem:[#allocation123_spill] sm:$0xff] %v5321_v42 }
  0xc1   :  { %v252_v26 = vld [vmem:[#allocation5 + $0x5c0] sm:$0xff]  ;;  %v5330_v62 = vcombine.high %v237_v13, %v253_v32  ;;  %v5337_v0 = vcombine.low %v237_v13, %v253_v32 }
  0xc2   :  { %v5327_v45 = vcombine.high %v236_v49, %v252_v26  ;;  %v5333_v61 = vcombine.low %v236_v49, %v252_v26 }
  0xc3   :  { %1953 = vmatpush1.bf16.msra.mxu0 %v5297_v16  ;;  %1996 = vmatpush1.bf16.msra.mxu1 %v5301_v14  ;;  %6861 = vst [vmem:[#allocation126_spill] sm:$0xff] %v5330_v62  ;;  %v269_v14 = vld [vmem:[#allocation5 + $0x648] sm:$0xff]  ;;  %6863 = vst [vmem:[#allocation128_spill] sm:$0xff] %v5337_v0 }
  0xc4   :  { %1954 = vmatprep.subr.bf16.mxu0 %v5303_v60  ;;  %1997 = vmatprep.subr.bf16.mxu1 %v5306_v8  ;;  %6860 = vst [vmem:[#allocation125_spill] sm:$0xff] %v5327_v45  ;;  %v268_v8 = vld [vmem:[#allocation5 + $0x640] sm:$0xff]  ;;  %v285_v16 = vld [vmem:[#allocation5 + $0x6c8] sm:$0xff]  ;;  %6862 = vst [vmem:[#allocation127_spill] sm:$0xff] %v5333_v61 }
  0xc5   :  { %v284_v60 = vld [vmem:[#allocation5 + $0x6c0] sm:$0xff]  ;;  %v5342_v25 = vcombine.high %v269_v14, %v285_v16  ;;  %v5349_v32 = vcombine.low %v269_v14, %v285_v16 }
  0xc6   :  { %v5339_v59 = vcombine.high %v268_v8, %v284_v60  ;;  %v5345_v26 = vcombine.low %v268_v8, %v284_v60 }
  0xc7   :  { %1955 = vmatpush1.bf16.msra.mxu0 %v5309_v7  ;;  %1998 = vmatpush1.bf16.msra.mxu1 %v5313_v12  ;;  %6865 = vst [vmem:[#allocation130_spill] sm:$0xff] %v5342_v25  ;;  %v301_v12 = vld [vmem:[#allocation5 + $0x748] sm:$0xff]  ;;  %6867 = vst [vmem:[#allocation132_spill] sm:$0xff] %v5349_v32 }
  0xc8   :  { %1956 = vmatprep.subr.bf16.mxu0 %v5315_v44  ;;  %1999 = vmatprep.subr.bf16.mxu1 %v5318_v58  ;;  %6864 = vst [vmem:[#allocation129_spill] sm:$0xff] %v5339_v59  ;;  %v300_v58 = vld [vmem:[#allocation5 + $0x740] sm:$0xff]  ;;  %v317_v7 = vld [vmem:[#allocation5 + $0x7c8] sm:$0xff]  ;;  %6866 = vst [vmem:[#allocation131_spill] sm:$0xff] %v5345_v26 }
  0xc9   :  { %v316_v44 = vld [vmem:[#allocation5 + $0x7c0] sm:$0xff]  ;;  %v5354_v49 = vcombine.high %v301_v12, %v317_v7  ;;  %v5361_v16 = vcombine.low %v301_v12, %v317_v7 }
  0xca   :  { %v5351_v13 = vcombine.high %v300_v58, %v316_v44  ;;  %v5357_v60 = vcombine.low %v300_v58, %v316_v44 }
  0xcb   :  { %1957 = vmatpush1.bf16.msra.mxu0 %v5321_v42  ;;  %2000 = vmatpush1.bf16.msra.mxu1 %v5325_v33  ;;  %6869 = vst [vmem:[#allocation134_spill] sm:$0xff] %v5354_v49  ;;  %v79_v33 = vld [vmem:[#allocation5 + $0x58] sm:$0xff]  ;;  %6871 = vst [vmem:[#allocation136_spill] sm:$0xff] %v5361_v16 }
  0xcc   :  { %1958 = vmatprep.subr.bf16.mxu0 %v5327_v45  ;;  %2001 = vmatprep.subr.bf16.mxu1 %v5330_v62  ;;  %6868 = vst [vmem:[#allocation133_spill] sm:$0xff] %v5351_v13  ;;  %v78_v62 = vld [vmem:[#allocation5 + $0x50] sm:$0xff]  ;;  %v95_v42 = vld [vmem:[#allocation5 + $0xd8] sm:$0xff]  ;;  %6870 = vst [vmem:[#allocation135_spill] sm:$0xff] %v5357_v60 }
  0xcd   :  { %v94_v45 = vld [vmem:[#allocation5 + $0xd0] sm:$0xff]  ;;  %v5366_v8 = vcombine.high %v79_v33, %v95_v42  ;;  %v5373_v7 = vcombine.low %v79_v33, %v95_v42 }
  0xce   :  { %v5363_v14 = vcombine.high %v78_v62, %v94_v45  ;;  %v5369_v44 = vcombine.low %v78_v62, %v94_v45 }
  0xcf   :  { %1959 = vmatpush1.bf16.msra.mxu0 %v5333_v61  ;;  %2002 = vmatpush1.bf16.msra.mxu1 %v5337_v0  ;;  %6873 = vst [vmem:[#allocation138_spill] sm:$0xff] %v5366_v8  ;;  %v111_v0 = vld [vmem:[#allocation5 + $0x158] sm:$0xff]  ;;  %6875 = vst [vmem:[#allocation140_spill] sm:$0xff] %v5373_v7 }
  0xd0   :  { %1960 = vmatprep.subr.bf16.mxu0 %v5339_v59  ;;  %2003 = vmatprep.subr.bf16.mxu1 %v5342_v25  ;;  %6872 = vst [vmem:[#allocation137_spill] sm:$0xff] %v5363_v14  ;;  %v110_v25 = vld [vmem:[#allocation5 + $0x150] sm:$0xff]  ;;  %v127_v61 = vld [vmem:[#allocation5 + $0x1d8] sm:$0xff]  ;;  %6874 = vst [vmem:[#allocation139_spill] sm:$0xff] %v5369_v44 }
  0xd1   :  { %v126_v59 = vld [vmem:[#allocation5 + $0x1d0] sm:$0xff]  ;;  %v5378_v58 = vcombine.high %v111_v0, %v127_v61  ;;  %v5387_v42 = vcombine.low %v111_v0, %v127_v61 }
  0xd2   :  { %v5375_v12 = vcombine.high %v110_v25, %v126_v59  ;;  %v5383_v45 = vcombine.low %v110_v25, %v126_v59 }
  0xd3   :  { %1961 = vmatpush1.bf16.msra.mxu0 %v5345_v26  ;;  %2004 = vmatpush1.bf16.msra.mxu1 %v5349_v32  ;;  %6877 = vst [vmem:[#allocation142_spill] sm:$0xff] %v5378_v58  ;;  %v143_v32 = vld [vmem:[#allocation5 + $0x258] sm:$0xff]  ;;  %6879 = vst [vmem:[#allocation144_spill] sm:$0xff] %v5387_v42 }
  0xd4   :  { %1962 = vmatprep.subr.bf16.mxu0 %v5351_v13  ;;  %2005 = vmatprep.subr.bf16.mxu1 %v5354_v49  ;;  %6876 = vst [vmem:[#allocation141_spill] sm:$0xff] %v5375_v12  ;;  %v142_v49 = vld [vmem:[#allocation5 + $0x250] sm:$0xff]  ;;  %6878 = vst [vmem:[#allocation143_spill] sm:$0xff] %v5383_v45  ;;  %v223_v26 = vld [vmem:[#allocation5 + $0x4d8] sm:$0xff] }
  0xd5   :  { %v158_v13 = vld [vmem:[#allocation5 + $0x2d0] sm:$0xff] }
  0xd6   :  { %v5389_v33 = vcombine.high %v142_v49, %v158_v13  ;;  %v5397_v59 = vcombine.low %v142_v49, %v158_v13 }
  0xd7   :  { %1963 = vmatpush1.bf16.msra.mxu0 %v5357_v60  ;;  %2006 = vmatpush1.bf16.msra.mxu1 %v5361_v16  ;;  %v159_v60 = vld [vmem:[#allocation5 + $0x2d8] sm:$0xff] }
  0xd8   :  { %2034 = vmatprep.subr.bf16.mxu0 %v5363_v14  ;;  %2077 = vmatprep.subr.bf16.mxu1 %v5366_v8  ;;  %6880 = vst [vmem:[#allocation145_spill] sm:$0xff] %v5389_v33  ;;  %v5392_v62 = vcombine.high %v143_v32, %v159_v60  ;;  %v174_v8 = vld [vmem:[#allocation5 + $0x350] sm:$0xff]  ;;  %v175_v16 = vld [vmem:[#allocation5 + $0x358] sm:$0xff]  ;;  %6882 = vst [vmem:[#allocation147_spill] sm:$0xff] %v5397_v59  ;;  %v5401_v61 = vcombine.low %v143_v32, %v159_v60 }
  0xd9   :  { %v190_v14 = vld [vmem:[#allocation5 + $0x3d0] sm:$0xff] }
  0xda   :  { %1981 = vmatmul.mubr.bf16.vlgmr.msra.gmra.mrb[16].mxu0 %v4966_v31  ;;  %2024 = vmatmul.mubr.bf16.vlgmr.msra.gmra.mrb[16].mxu1 %v4966_v31  ;;  %6881 = vst [vmem:[#allocation146_spill] sm:$0xff] %v5392_v62  ;;  %6883 = vst [vmem:[#allocation148_spill] sm:$0xff] %v5401_v61  ;;  %v5403_v0 = vcombine.high %v174_v8, %v190_v14  ;;  %v5409_v13 = vcombine.low %v174_v8, %v190_v14 }
  0xdb   :  { %2035 = vmatpush1.bf16.msra.mxu0 %v5369_v44  ;;  %2078 = vmatpush1.bf16.msra.mxu1 %v5373_v7  ;;  %v191_v44 = vld [vmem:[#allocation5 + $0x3d8] sm:$0xff] }
  0xdc   :  { %2036 = vmatprep.subr.bf16.mxu0 %v5375_v12  ;;  %2079 = vmatprep.subr.bf16.mxu1 %v5378_v58  ;;  %6884 = vst [vmem:[#allocation149_spill] sm:$0xff] %v5403_v0  ;;  %v5406_v25 = vcombine.high %v175_v16, %v191_v44  ;;  %v206_v58 = vld [vmem:[#allocation5 + $0x450] sm:$0xff]  ;;  %v207_v7 = vld [vmem:[#allocation5 + $0x458] sm:$0xff]  ;;  %6886 = vst [vmem:[#allocation151_spill] sm:$0xff] %v5409_v13  ;;  %v5413_v32 = vcombine.low %v175_v16, %v191_v44 }
  0xdd   :  { %2066 = vmatprep.mubr.bf16.mxu0 %v6785_v63  ;;  %2109 = vmatprep.mubr.bf16.mxu1 %v6785_v63  ;;  %v222_v12 = vld [vmem:[#allocation5 + $0x4d0] sm:$0xff]  ;;  %v5418_v60 = vcombine.high %v207_v7, %v223_v26  ;;  %v5425_v16 = vcombine.low %v207_v7, %v223_v26 }
  0xde   :  { %6885 = vst [vmem:[#allocation150_spill] sm:$0xff] %v5406_v25  ;;  %6887 = vst [vmem:[#allocation152_spill] sm:$0xff] %v5413_v32  ;;  %v5415_v49 = vcombine.high %v206_v58, %v222_v12  ;;  %v5421_v14 = vcombine.low %v206_v58, %v222_v12 }
  0xdf   :  { %2037 = vmatpush1.bf16.msra.mxu0 %v5383_v45  ;;  %2080 = vmatpush1.bf16.msra.mxu1 %v5387_v42  ;;  %6889 = vst [vmem:[#allocation154_spill] sm:$0xff] %v5418_v60  ;;  %v239_v42 = vld [vmem:[#allocation5 + $0x558] sm:$0xff]  ;;  %6891 = vst [vmem:[#allocation156_spill] sm:$0xff] %v5425_v16 }
  0xe0   :  { %2038 = vmatprep.subr.bf16.mxu0 %v5389_v33  ;;  %2081 = vmatprep.subr.bf16.mxu1 %v5392_v62  ;;  %6888 = vst [vmem:[#allocation153_spill] sm:$0xff] %v5415_v49  ;;  %v238_v62 = vld [vmem:[#allocation5 + $0x550] sm:$0xff]  ;;  %v255_v45 = vld [vmem:[#allocation5 + $0x5d8] sm:$0xff]  ;;  %6890 = vst [vmem:[#allocation155_spill] sm:$0xff] %v5421_v14 }
  0xe1   :  { %v254_v33 = vld [vmem:[#allocation5 + $0x5d0] sm:$0xff]  ;;  %v5430_v44 = vcombine.high %v239_v42, %v255_v45  ;;  %v5437_v26 = vcombine.low %v239_v42, %v255_v45 }
  0xe2   :  { %v5427_v8 = vcombine.high %v238_v62, %v254_v33  ;;  %v5433_v12 = vcombine.low %v238_v62, %v254_v33 }
  0xe3   :  { %2039 = vmatpush1.bf16.msra.mxu0 %v5397_v59  ;;  %2082 = vmatpush1.bf16.msra.mxu1 %v5401_v61  ;;  %6893 = vst [vmem:[#allocation158_spill] sm:$0xff] %v5430_v44  ;;  %v271_v61 = vld [vmem:[#allocation5 + $0x658] sm:$0xff]  ;;  %6895 = vst [vmem:[#allocation160_spill] sm:$0xff] %v5437_v26 }
  0xe4   :  { %2040 = vmatprep.subr.bf16.mxu0 %v5403_v0  ;;  %2083 = vmatprep.subr.bf16.mxu1 %v5406_v25  ;;  %6892 = vst [vmem:[#allocation157_spill] sm:$0xff] %v5427_v8  ;;  %v270_v25 = vld [vmem:[#allocation5 + $0x650] sm:$0xff]  ;;  %v287_v59 = vld [vmem:[#allocation5 + $0x6d8] sm:$0xff]  ;;  %6894 = vst [vmem:[#allocation159_spill] sm:$0xff] %v5433_v12 }
  0xe5   :  { %v286_v0 = vld [vmem:[#allocation5 + $0x6d0] sm:$0xff]  ;;  %v5442_v58 = vcombine.high %v271_v61, %v287_v59  ;;  %v5449_v45 = vcombine.low %v271_v61, %v287_v59 }
  0xe6   :  { %v5439_v7 = vcombine.high %v270_v25, %v286_v0  ;;  %v5445_v33 = vcombine.low %v270_v25, %v286_v0 }
  0xe7   :  { %2041 = vmatpush1.bf16.msra.mxu0 %v5409_v13  ;;  %2084 = vmatpush1.bf16.msra.mxu1 %v5413_v32  ;;  %6897 = vst [vmem:[#allocation162_spill] sm:$0xff] %v5442_v58  ;;  %v303_v32 = vld [vmem:[#allocation5 + $0x758] sm:$0xff]  ;;  %6899 = vst [vmem:[#allocation164_spill] sm:$0xff] %v5449_v45 }
  0xe8   :  { %2042 = vmatprep.subr.bf16.mxu0 %v5415_v49  ;;  %2085 = vmatprep.subr.bf16.mxu1 %v5418_v60  ;;  %6896 = vst [vmem:[#allocation161_spill] sm:$0xff] %v5439_v7  ;;  %v302_v60 = vld [vmem:[#allocation5 + $0x750] sm:$0xff]  ;;  %v319_v13 = vld [vmem:[#allocation5 + $0x7d8] sm:$0xff]  ;;  %6898 = vst [vmem:[#allocation163_spill] sm:$0xff] %v5445_v33 }
  0xe9   :  { %v318_v49 = vld [vmem:[#allocation5 + $0x7d0] sm:$0xff]  ;;  %v5454_v62 = vcombine.high %v303_v32, %v319_v13  ;;  %v5461_v59 = vcombine.low %v303_v32, %v319_v13 }
  0xea   :  { %v5451_v42 = vcombine.high %v302_v60, %v318_v49  ;;  %v5457_v0 = vcombine.low %v302_v60, %v318_v49 }
  0xeb   :  { %2043 = vmatpush1.bf16.msra.mxu0 %v5421_v14  ;;  %2086 = vmatpush1.bf16.msra.mxu1 %v5425_v16  ;;  %6901 = vst [vmem:[#allocation166_spill] sm:$0xff] %v5454_v62  ;;  %v81_v16 = vld [vmem:[#allocation5 + $0x68] sm:$0xff]  ;;  %6903 = vst [vmem:[#allocation168_spill] sm:$0xff] %v5461_v59 }
  0xec   :  { %2044 = vmatprep.subr.bf16.mxu0 %v5427_v8  ;;  %2087 = vmatprep.subr.bf16.mxu1 %v5430_v44  ;;  %6900 = vst [vmem:[#allocation165_spill] sm:$0xff] %v5451_v42  ;;  %v80_v44 = vld [vmem:[#allocation5 + $0x60] sm:$0xff]  ;;  %v97_v14 = vld [vmem:[#allocation5 + $0xe8] sm:$0xff]  ;;  %6902 = vst [vmem:[#allocation167_spill] sm:$0xff] %v5457_v0 }
  0xed   :  { %v96_v8 = vld [vmem:[#allocation5 + $0xe0] sm:$0xff]  ;;  %v5466_v25 = vcombine.high %v81_v16, %v97_v14  ;;  %v5473_v13 = vcombine.low %v81_v16, %v97_v14 }
  0xee   :  { %v5463_v61 = vcombine.high %v80_v44, %v96_v8  ;;  %v5469_v49 = vcombine.low %v80_v44, %v96_v8 }
  0xef   :  { %2045 = vmatpush1.bf16.msra.mxu0 %v5433_v12  ;;  %2088 = vmatpush1.bf16.msra.mxu1 %v5437_v26  ;;  %6905 = vst [vmem:[#allocation170_spill] sm:$0xff] %v5466_v25  ;;  %v113_v26 = vld [vmem:[#allocation5 + $0x168] sm:$0xff]  ;;  %6907 = vst [vmem:[#allocation172_spill] sm:$0xff] %v5473_v13 }
  0xf0   :  { %2046 = vmatprep.subr.bf16.mxu0 %v5439_v7  ;;  %2089 = vmatprep.subr.bf16.mxu1 %v5442_v58  ;;  %6904 = vst [vmem:[#allocation169_spill] sm:$0xff] %v5463_v61  ;;  %v112_v58 = vld [vmem:[#allocation5 + $0x160] sm:$0xff]  ;;  %v129_v12 = vld [vmem:[#allocation5 + $0x1e8] sm:$0xff]  ;;  %6906 = vst [vmem:[#allocation171_spill] sm:$0xff] %v5469_v49 }
  0xf1   :  { %v128_v7 = vld [vmem:[#allocation5 + $0x1e0] sm:$0xff]  ;;  %v5478_v60 = vcombine.high %v113_v26, %v129_v12  ;;  %v5487_v14 = vcombine.low %v113_v26, %v129_v12 }
  0xf2   :  { %v5475_v32 = vcombine.high %v112_v58, %v128_v7  ;;  %v5483_v8 = vcombine.low %v112_v58, %v128_v7 }
  0xf3   :  { %2047 = vmatpush1.bf16.msra.mxu0 %v5445_v33  ;;  %2090 = vmatpush1.bf16.msra.mxu1 %v5449_v45  ;;  %6909 = vst [vmem:[#allocation174_spill] sm:$0xff] %v5478_v60  ;;  %v145_v45 = vld [vmem:[#allocation5 + $0x268] sm:$0xff]  ;;  %6911 = vst [vmem:[#allocation176_spill] sm:$0xff] %v5487_v14 }
  0xf4   :  { %2048 = vmatprep.subr.bf16.mxu0 %v5451_v42  ;;  %2091 = vmatprep.subr.bf16.mxu1 %v5454_v62  ;;  %6908 = vst [vmem:[#allocation173_spill] sm:$0xff] %v5475_v32  ;;  %v144_v62 = vld [vmem:[#allocation5 + $0x260] sm:$0xff]  ;;  %6910 = vst [vmem:[#allocation175_spill] sm:$0xff] %v5483_v8  ;;  %v225_v33 = vld [vmem:[#allocation5 + $0x4e8] sm:$0xff] }
  0xf5   :  { %v160_v42 = vld [vmem:[#allocation5 + $0x2e0] sm:$0xff] }
  0xf6   :  { %v5489_v16 = vcombine.high %v144_v62, %v160_v42  ;;  %v5497_v7 = vcombine.low %v144_v62, %v160_v42 }
  0xf7   :  { %2049 = vmatpush1.bf16.msra.mxu0 %v5457_v0  ;;  %2092 = vmatpush1.bf16.msra.mxu1 %v5461_v59  ;;  %v161_v0 = vld [vmem:[#allocation5 + $0x2e8] sm:$0xff] }
  0xf8   :  { %2120 = vmatprep.subr.bf16.mxu0 %v5463_v61  ;;  %2163 = vmatprep.subr.bf16.mxu1 %v5466_v25  ;;  %6912 = vst [vmem:[#allocation177_spill] sm:$0xff] %v5489_v16  ;;  %v5492_v44 = vcombine.high %v145_v45, %v161_v0  ;;  %v176_v25 = vld [vmem:[#allocation5 + $0x360] sm:$0xff]  ;;  %v177_v59 = vld [vmem:[#allocation5 + $0x368] sm:$0xff]  ;;  %6914 = vst [vmem:[#allocation179_spill] sm:$0xff] %v5497_v7  ;;  %v5501_v12 = vcombine.low %v145_v45, %v161_v0 }
  0xf9   :  { %v192_v61 = vld [vmem:[#allocation5 + $0x3e0] sm:$0xff] }
  0xfa   :  { %2067 = vmatmul.mubr.bf16.vlgmr.msra.gmra.mrb[20].mxu0 %v4966_v31  ;;  %2110 = vmatmul.mubr.bf16.vlgmr.msra.gmra.mrb[20].mxu1 %v4966_v31  ;;  %6913 = vst [vmem:[#allocation178_spill] sm:$0xff] %v5492_v44  ;;  %6915 = vst [vmem:[#allocation180_spill] sm:$0xff] %v5501_v12  ;;  %v5503_v26 = vcombine.high %v176_v25, %v192_v61  ;;  %v5509_v42 = vcombine.low %v176_v25, %v192_v61 }
  0xfb   :  { %2121 = vmatpush1.bf16.msra.mxu0 %v5469_v49  ;;  %2164 = vmatpush1.bf16.msra.mxu1 %v5473_v13  ;;  %v193_v49 = vld [vmem:[#allocation5 + $0x3e8] sm:$0xff] }
  0xfc   :  { %2122 = vmatprep.subr.bf16.mxu0 %v5475_v32  ;;  %2165 = vmatprep.subr.bf16.mxu1 %v5478_v60  ;;  %6916 = vst [vmem:[#allocation181_spill] sm:$0xff] %v5503_v26  ;;  %v5506_v58 = vcombine.high %v177_v59, %v193_v49  ;;  %v208_v60 = vld [vmem:[#allocation5 + $0x460] sm:$0xff]  ;;  %v209_v13 = vld [vmem:[#allocation5 + $0x468] sm:$0xff]  ;;  %6918 = vst [vmem:[#allocation183_spill] sm:$0xff] %v5509_v42  ;;  %v5513_v45 = vcombine.low %v177_v59, %v193_v49 }
  0xfd   :  { %2152 = vmatprep.mubr.bf16.mxu0 %v6785_v63  ;;  %2195 = vmatprep.mubr.bf16.mxu1 %v6785_v63  ;;  %v224_v32 = vld [vmem:[#allocation5 + $0x4e0] sm:$0xff]  ;;  %v5518_v0 = vcombine.high %v209_v13, %v225_v33  ;;  %v5525_v59 = vcombine.low %v209_v13, %v225_v33 }
  0xfe   :  { %6917 = vst [vmem:[#allocation182_spill] sm:$0xff] %v5506_v58  ;;  %6919 = vst [vmem:[#allocation184_spill] sm:$0xff] %v5513_v45  ;;  %v5515_v62 = vcombine.high %v208_v60, %v224_v32  ;;  %v5521_v61 = vcombine.low %v208_v60, %v224_v32 }
  0xff   :  { %2123 = vmatpush1.bf16.msra.mxu0 %v5483_v8  ;;  %2166 = vmatpush1.bf16.msra.mxu1 %v5487_v14  ;;  %6921 = vst [vmem:[#allocation186_spill] sm:$0xff] %v5518_v0  ;;  %v241_v14 = vld [vmem:[#allocation5 + $0x568] sm:$0xff]  ;;  %6923 = vst [vmem:[#allocation188_spill] sm:$0xff] %v5525_v59 }
 0x100   :  { %2124 = vmatprep.subr.bf16.mxu0 %v5489_v16  ;;  %2167 = vmatprep.subr.bf16.mxu1 %v5492_v44  ;;  %6920 = vst [vmem:[#allocation185_spill] sm:$0xff] %v5515_v62  ;;  %v240_v44 = vld [vmem:[#allocation5 + $0x560] sm:$0xff]  ;;  %v257_v8 = vld [vmem:[#allocation5 + $0x5e8] sm:$0xff]  ;;  %6922 = vst [vmem:[#allocation187_spill] sm:$0xff] %v5521_v61 }
 0x101   :  { %v256_v16 = vld [vmem:[#allocation5 + $0x5e0] sm:$0xff]  ;;  %v5530_v49 = vcombine.high %v241_v14, %v257_v8  ;;  %v5537_v33 = vcombine.low %v241_v14, %v257_v8 }
 0x102   :  { %v5527_v25 = vcombine.high %v240_v44, %v256_v16  ;;  %v5533_v32 = vcombine.low %v240_v44, %v256_v16 }
 0x103   :  { %2125 = vmatpush1.bf16.msra.mxu0 %v5497_v7  ;;  %2168 = vmatpush1.bf16.msra.mxu1 %v5501_v12  ;;  %6925 = vst [vmem:[#allocation190_spill] sm:$0xff] %v5530_v49  ;;  %v273_v12 = vld [vmem:[#allocation5 + $0x668] sm:$0xff]  ;;  %6927 = vst [vmem:[#allocation192_spill] sm:$0xff] %v5537_v33 }
 0x104   :  { %2126 = vmatprep.subr.bf16.mxu0 %v5503_v26  ;;  %2169 = vmatprep.subr.bf16.mxu1 %v5506_v58  ;;  %6924 = vst [vmem:[#allocation189_spill] sm:$0xff] %v5527_v25  ;;  %v272_v58 = vld [vmem:[#allocation5 + $0x660] sm:$0xff]  ;;  %v289_v7 = vld [vmem:[#allocation5 + $0x6e8] sm:$0xff]  ;;  %6926 = vst [vmem:[#allocation191_spill] sm:$0xff] %v5533_v32 }
 0x105   :  { %v288_v26 = vld [vmem:[#allocation5 + $0x6e0] sm:$0xff]  ;;  %v5542_v60 = vcombine.high %v273_v12, %v289_v7  ;;  %v5549_v8 = vcombine.low %v273_v12, %v289_v7 }
 0x106   :  { %v5539_v13 = vcombine.high %v272_v58, %v288_v26  ;;  %v5545_v16 = vcombine.low %v272_v58, %v288_v26 }
 0x107   :  { %2127 = vmatpush1.bf16.msra.mxu0 %v5509_v42  ;;  %2170 = vmatpush1.bf16.msra.mxu1 %v5513_v45  ;;  %6929 = vst [vmem:[#allocation194_spill] sm:$0xff] %v5542_v60  ;;  %v305_v45 = vld [vmem:[#allocation5 + $0x768] sm:$0xff]  ;;  %6931 = vst [vmem:[#allocation196_spill] sm:$0xff] %v5549_v8 }
 0x108   :  { %2128 = vmatprep.subr.bf16.mxu0 %v5515_v62  ;;  %2171 = vmatprep.subr.bf16.mxu1 %v5518_v0  ;;  %6928 = vst [vmem:[#allocation193_spill] sm:$0xff] %v5539_v13  ;;  %v304_v0 = vld [vmem:[#allocation5 + $0x760] sm:$0xff]  ;;  %v321_v42 = vld [vmem:[#allocation5 + $0x7e8] sm:$0xff]  ;;  %6930 = vst [vmem:[#allocation195_spill] sm:$0xff] %v5545_v16 }
 0x109   :  { %v320_v62 = vld [vmem:[#allocation5 + $0x7e0] sm:$0xff]  ;;  %v5554_v44 = vcombine.high %v305_v45, %v321_v42  ;;  %v5561_v7 = vcombine.low %v305_v45, %v321_v42 }
 0x10a   :  { %v5551_v14 = vcombine.high %v304_v0, %v320_v62  ;;  %v5557_v26 = vcombine.low %v304_v0, %v320_v62 }
 0x10b   :  { %2129 = vmatpush1.bf16.msra.mxu0 %v5521_v61  ;;  %2172 = vmatpush1.bf16.msra.mxu1 %v5525_v59  ;;  %6933 = vst [vmem:[#allocation198_spill] sm:$0xff] %v5554_v44  ;;  %v83_v59 = vld [vmem:[#allocation5 + $0x78] sm:$0xff]  ;;  %6935 = vst [vmem:[#allocation200_spill] sm:$0xff] %v5561_v7 }
 0x10c   :  { %2130 = vmatprep.subr.bf16.mxu0 %v5527_v25  ;;  %2173 = vmatprep.subr.bf16.mxu1 %v5530_v49  ;;  %6932 = vst [vmem:[#allocation197_spill] sm:$0xff] %v5551_v14  ;;  %v82_v49 = vld [vmem:[#allocation5 + $0x70] sm:$0xff]  ;;  %v99_v61 = vld [vmem:[#allocation5 + $0xf8] sm:$0xff]  ;;  %6934 = vst [vmem:[#allocation199_spill] sm:$0xff] %v5557_v26 }
 0x10d   :  { %v98_v25 = vld [vmem:[#allocation5 + $0xf0] sm:$0xff]  ;;  %v5566_v58 = vcombine.high %v83_v59, %v99_v61  ;;  %v5573_v42 = vcombine.low %v83_v59, %v99_v61 }
 0x10e   :  { %v5563_v12 = vcombine.high %v82_v49, %v98_v25  ;;  %v5569_v62 = vcombine.low %v82_v49, %v98_v25 }
 0x10f   :  { %2131 = vmatpush1.bf16.msra.mxu0 %v5533_v32  ;;  %2174 = vmatpush1.bf16.msra.mxu1 %v5537_v33  ;;  %6937 = vst [vmem:[#allocation202_spill] sm:$0xff] %v5566_v58  ;;  %v115_v33 = vld [vmem:[#allocation5 + $0x178] sm:$0xff]  ;;  %6939 = vst [vmem:[#allocation204_spill] sm:$0xff] %v5573_v42 }
 0x110   :  { %2132 = vmatprep.subr.bf16.mxu0 %v5539_v13  ;;  %2175 = vmatprep.subr.bf16.mxu1 %v5542_v60  ;;  %6936 = vst [vmem:[#allocation201_spill] sm:$0xff] %v5563_v12  ;;  %v114_v60 = vld [vmem:[#allocation5 + $0x170] sm:$0xff]  ;;  %v131_v32 = vld [vmem:[#allocation5 + $0x1f8] sm:$0xff]  ;;  %6938 = vst [vmem:[#allocation203_spill] sm:$0xff] %v5569_v62 }
 0x111   :  { %v130_v13 = vld [vmem:[#allocation5 + $0x1f0] sm:$0xff]  ;;  %v5578_v0 = vcombine.high %v115_v33, %v131_v32  ;;  %v5587_v61 = vcombine.low %v115_v33, %v131_v32 }
 0x112   :  { %v5575_v45 = vcombine.high %v114_v60, %v130_v13  ;;  %v5583_v25 = vcombine.low %v114_v60, %v130_v13 }
 0x113   :  { %2133 = vmatpush1.bf16.msra.mxu0 %v5545_v16  ;;  %2176 = vmatpush1.bf16.msra.mxu1 %v5549_v8  ;;  %6941 = vst [vmem:[#allocation206_spill] sm:$0xff] %v5578_v0  ;;  %v147_v8 = vld [vmem:[#allocation5 + $0x278] sm:$0xff]  ;;  %6943 = vst [vmem:[#allocation208_spill] sm:$0xff] %v5587_v61 }
 0x114   :  { %2134 = vmatprep.subr.bf16.mxu0 %v5551_v14  ;;  %2177 = vmatprep.subr.bf16.mxu1 %v5554_v44  ;;  %6940 = vst [vmem:[#allocation205_spill] sm:$0xff] %v5575_v45  ;;  %v146_v44 = vld [vmem:[#allocation5 + $0x270] sm:$0xff]  ;;  %6942 = vst [vmem:[#allocation207_spill] sm:$0xff] %v5583_v25  ;;  %v227_v16 = vld [vmem:[#allocation5 + $0x4f8] sm:$0xff] }
 0x115   :  { %v162_v14 = vld [vmem:[#allocation5 + $0x2f0] sm:$0xff] }
 0x116   :  { %v5589_v59 = vcombine.high %v146_v44, %v162_v14  ;;  %v5597_v13 = vcombine.low %v146_v44, %v162_v14 }
 0x117   :  { %2135 = vmatpush1.bf16.msra.mxu0 %v5557_v26  ;;  %2178 = vmatpush1.bf16.msra.mxu1 %v5561_v7  ;;  %v163_v26 = vld [vmem:[#allocation5 + $0x2f8] sm:$0xff] }
 0x118   :  { %2206 = vmatprep.subr.bf16.mxu0 %v5563_v12  ;;  %2249 = vmatprep.subr.bf16.mxu1 %v5566_v58  ;;  %6944 = vst [vmem:[#allocation209_spill] sm:$0xff] %v5589_v59  ;;  %v5592_v49 = vcombine.high %v147_v8, %v163_v26  ;;  %v178_v58 = vld [vmem:[#allocation5 + $0x370] sm:$0xff]  ;;  %v179_v7 = vld [vmem:[#allocation5 + $0x378] sm:$0xff]  ;;  %6946 = vst [vmem:[#allocation211_spill] sm:$0xff] %v5597_v13  ;;  %v5601_v32 = vcombine.low %v147_v8, %v163_v26 }
 0x119   :  { %v194_v12 = vld [vmem:[#allocation5 + $0x3f0] sm:$0xff] }
 0x11a   :  { %2153 = vmatmul.mubr.bf16.vlgmr.msra.gmra.mrb[24].mxu0 %v4966_v31  ;;  %2196 = vmatmul.mubr.bf16.vlgmr.msra.gmra.mrb[24].mxu1 %v4966_v31  ;;  %6945 = vst [vmem:[#allocation210_spill] sm:$0xff] %v5592_v49  ;;  %6947 = vst [vmem:[#allocation212_spill] sm:$0xff] %v5601_v32  ;;  %v5603_v33 = vcombine.high %v178_v58, %v194_v12  ;;  %v5609_v14 = vcombine.low %v178_v58, %v194_v12 }
 0x11b   :  { %2207 = vmatpush1.bf16.msra.mxu0 %v5569_v62  ;;  %2250 = vmatpush1.bf16.msra.mxu1 %v5573_v42  ;;  %v195_v62 = vld [vmem:[#allocation5 + $0x3f8] sm:$0xff] }
 0x11c   :  { %2208 = vmatprep.subr.bf16.mxu0 %v5575_v45  ;;  %2251 = vmatprep.subr.bf16.mxu1 %v5578_v0  ;;  %6948 = vst [vmem:[#allocation213_spill] sm:$0xff] %v5603_v33  ;;  %v5606_v60 = vcombine.high %v179_v7, %v195_v62  ;;  %v210_v0 = vld [vmem:[#allocation5 + $0x470] sm:$0xff]  ;;  %v211_v42 = vld [vmem:[#allocation5 + $0x478] sm:$0xff]  ;;  %6950 = vst [vmem:[#allocation215_spill] sm:$0xff] %v5609_v14  ;;  %v5613_v8 = vcombine.low %v179_v7, %v195_v62 }
 0x11d   :  { %2238 = vmatprep.mubr.bf16.mxu0 %v6785_v63  ;;  %2281 = vmatprep.mubr.bf16.mxu1 %v6785_v63  ;;  %v226_v45 = vld [vmem:[#allocation5 + $0x4f0] sm:$0xff]  ;;  %v5618_v26 = vcombine.high %v211_v42, %v227_v16  ;;  %v5625_v7 = vcombine.low %v211_v42, %v227_v16 }
 0x11e   :  { %6949 = vst [vmem:[#allocation214_spill] sm:$0xff] %v5606_v60  ;;  %6951 = vst [vmem:[#allocation216_spill] sm:$0xff] %v5613_v8  ;;  %v5615_v44 = vcombine.high %v210_v0, %v226_v45  ;;  %v5621_v12 = vcombine.low %v210_v0, %v226_v45 }
 0x11f   :  { %2209 = vmatpush1.bf16.msra.mxu0 %v5583_v25  ;;  %2252 = vmatpush1.bf16.msra.mxu1 %v5587_v61  ;;  %6953 = vst [vmem:[#allocation218_spill] sm:$0xff] %v5618_v26  ;;  %v243_v61 = vld [vmem:[#allocation5 + $0x578] sm:$0xff] }
 0x120   :  { %2210 = vmatprep.subr.bf16.mxu0 %v5589_v59  ;;  %2253 = vmatprep.subr.bf16.mxu1 %v5592_v49  ;;  %6952 = vst [vmem:[#allocation217_spill] sm:$0xff] %v5615_v44  ;;  %v242_v49 = vld [vmem:[#allocation5 + $0x570] sm:$0xff]  ;;  %v259_v25 = vld [vmem:[#allocation5 + $0x5f8] sm:$0xff] }
 0x121   :  { %v258_v59 = vld [vmem:[#allocation5 + $0x5f0] sm:$0xff]  ;;  %v5630_v62 = vcombine.high %v243_v61, %v259_v25  ;;  %v5637_v16 = vcombine.low %v243_v61, %v259_v25 }
 0x122   :  { %v5627_v58 = vcombine.high %v242_v49, %v258_v59  ;;  %v5633_v45 = vcombine.low %v242_v49, %v258_v59 }
 0x123   :  { %2211 = vmatpush1.bf16.msra.mxu0 %v5597_v13  ;;  %2254 = vmatpush1.bf16.msra.mxu1 %v5601_v32  ;;  %6954 = vst [vmem:[#allocation219_spill] sm:$0xff] %v5630_v62  ;;  %v275_v32 = vld [vmem:[#allocation5 + $0x678] sm:$0xff] }
 0x124   :  { %2212 = vmatprep.subr.bf16.mxu0 %v5603_v33  ;;  %2255 = vmatprep.subr.bf16.mxu1 %v5606_v60  ;;  %v274_v60 = vld [vmem:[#allocation5 + $0x670] sm:$0xff]  ;;  %v291_v13 = vld [vmem:[#allocation5 + $0x6f8] sm:$0xff] }
 0x125   :  { %v290_v33 = vld [vmem:[#allocation5 + $0x6f0] sm:$0xff]  ;;  %v5642_v0 = vcombine.high %v275_v32, %v291_v13  ;;  %v5649_v25 = vcombine.low %v275_v32, %v291_v13  ;;  %v6956_v32 = vld [vmem:[#allocation19_spill] sm:$0xff] }
 0x126   :  { %v5639_v42 = vcombine.high %v274_v60, %v290_v33  ;;  %v5645_v59 = vcombine.low %v274_v60, %v290_v33  ;;  %v6955_v13 = vld [vmem:[#allocation18_spill] sm:$0xff]  ;;  %v6957_v60 = vld [vmem:[#allocation20_spill] sm:$0xff] }
 0x127   :  { %2213 = vmatpush1.bf16.msra.mxu0 %v5609_v14  ;;  %2256 = vmatpush1.bf16.msra.mxu1 %v5613_v8  ;;  %v307_v8 = vld [vmem:[#allocation5 + $0x778] sm:$0xff] }
 0x128   :  { %2214 = vmatprep.subr.bf16.mxu0 %v5615_v44  ;;  %2257 = vmatprep.subr.bf16.mxu1 %v5618_v26  ;;  %v306_v26 = vld [vmem:[#allocation5 + $0x770] sm:$0xff]  ;;  %v323_v14 = vld [vmem:[#allocation5 + $0x7f8] sm:$0xff] }
 0x129   :  { %v322_v44 = vld [vmem:[#allocation5 + $0x7f0] sm:$0xff]  ;;  %v5654_v49 = vcombine.high %v307_v8, %v323_v14  ;;  %v5661_v33 = vcombine.low %v307_v8, %v323_v14  ;;  %v6958_v14 = vld [vmem:[#allocation21_spill] sm:$0xff] }
 0x12a   :  { %v5651_v61 = vcombine.high %v306_v26, %v322_v44  ;;  %v6959_v8 = vld [vmem:[#allocation22_spill] sm:$0xff] }
 0x12b   :  { %2215 = vmatpush1.bf16.msra.mxu0 %v5621_v12  ;;  %2258 = vmatpush1.bf16.msra.mxu1 %v5625_v7 }
 0x12c   :  { %2216 = vmatprep.subr.bf16.mxu0 %v5627_v58  ;;  %2259 = vmatprep.subr.bf16.mxu1 %v5630_v62  ;;  %v5657_v62 = vcombine.low %v306_v26, %v322_v44  ;;  %v6960_v44 = vld [vmem:[#allocation23_spill] sm:$0xff]  ;;  %v6961_v26 = vld [vmem:[#allocation24_spill] sm:$0xff] }
 0x12f   :  { %2217 = vmatpush1.bf16.msra.mxu0 %v5633_v45  ;;  %2260 = vmatpush1.bf16.msra.mxu1 %v5637_v16 }
 0x130   :  { %2218 = vmatprep.subr.bf16.mxu0 %v5639_v42  ;;  %2261 = vmatprep.subr.bf16.mxu1 %v5642_v0 }
 0x133   :  { %2219 = vmatpush1.bf16.msra.mxu0 %v5645_v59  ;;  %2262 = vmatpush1.bf16.msra.mxu1 %v5649_v25 }
 0x134   :  { %2220 = vmatprep.subr.bf16.mxu0 %v5651_v61  ;;  %2263 = vmatprep.subr.bf16.mxu1 %v5654_v49 }
 0x137   :  { %2221 = vmatpush1.bf16.msra.mxu0 %v5657_v62  ;;  %2264 = vmatpush1.bf16.msra.mxu1 %v5661_v33 }
 0x138   :  { %2292 = vmatprep.subr.bf16.mxu0 %v4858_v4  ;;  %2335 = vmatprep.subr.bf16.mxu1 %v4862_v9 }
 0x13a   :  { %2239 = vmatmul.mubr.bf16.vlgmr.msra.gmra.mrb[28].mxu0 %v4966_v31  ;;  %2282 = vmatmul.mubr.bf16.vlgmr.msra.gmra.mrb[28].mxu1 %v4966_v31 }
 0x13b   :  { %2293 = vmatpush1.bf16.msra.mxu0 %v4860_v6  ;;  %2336 = vmatpush1.bf16.msra.mxu1 %v4864_v10 }
 0x13c   :  { %2294 = vmatprep.subr.bf16.mxu0 %v4866_v11  ;;  %2337 = vmatprep.subr.bf16.mxu1 %v4869_v15 }
 0x13d   :  { %2324 = vmatprep.mubr.bf16.mxu0 %v6785_v63  ;;  %2367 = vmatprep.mubr.bf16.mxu1 %v6785_v63 }
 0x13f   :  { %2295 = vmatpush1.bf16.msra.mxu0 %v4873_v19  ;;  %2338 = vmatpush1.bf16.msra.mxu1 %v4877_v20 }
 0x140   :  { %2296 = vmatprep.subr.bf16.mxu0 %v4879_v21  ;;  %2339 = vmatprep.subr.bf16.mxu1 %v4882_v22 }
 0x143   :  { %2297 = vmatpush1.bf16.msra.mxu0 %v4885_v27  ;;  %2340 = vmatpush1.bf16.msra.mxu1 %v4889_v28 }
 0x144   :  { %2298 = vmatprep.subr.bf16.mxu0 %v4891_v29  ;;  %2341 = vmatprep.subr.bf16.mxu1 %v4894_v30 }
 0x147   :  { %2299 = vmatpush1.bf16.msra.mxu0 %v4897_v35  ;;  %2342 = vmatpush1.bf16.msra.mxu1 %v4901_v36 }
 0x148   :  { %2300 = vmatprep.subr.bf16.mxu0 %v4903_v37  ;;  %2343 = vmatprep.subr.bf16.mxu1 %v4906_v38 }
 0x14b   :  { %2301 = vmatpush1.bf16.msra.mxu0 %v4909_v43  ;;  %2344 = vmatpush1.bf16.msra.mxu1 %v4913_v46 }
 0x14c   :  { %2302 = vmatprep.subr.bf16.mxu0 %v4915_v47  ;;  %2345 = vmatprep.subr.bf16.mxu1 %v4918_v48 }
 0x14f   :  { %2303 = vmatpush1.bf16.msra.mxu0 %v4923_v54  ;;  %2346 = vmatpush1.bf16.msra.mxu1 %v4927_v55 }
 0x150   :  { %2304 = vmatprep.subr.bf16.mxu0 %v4929_v56  ;;  %2347 = vmatprep.subr.bf16.mxu1 %v4932_v57 }
 0x153   :  { %2305 = vmatpush1.bf16.msra.mxu0 %v4937_v1  ;;  %2348 = vmatpush1.bf16.msra.mxu1 %v4941_v2 }
 0x154   :  { %2306 = vmatprep.subr.bf16.mxu0 %v4943_v3  ;;  %2349 = vmatprep.subr.bf16.mxu1 %v4946_v5 }
 0x157   :  { %2307 = vmatpush1.bf16.msra.mxu0 %v4953_v17  ;;  %2350 = vmatpush1.bf16.msra.mxu1 %v4957_v18 }
 0x158   :  { %2378 = vmatprep.subr.bf16.mxu0 %v4959_v23  ;;  %2421 = vmatprep.subr.bf16.mxu1 %v4962_v24 }
 0x15a   :  { %2325 = vmatmul.mubr.bf16.vlgmr.msra.gmra.mrb[0].mxu0 %v4920_v53  ;;  %2368 = vmatmul.mubr.bf16.vlgmr.msra.gmra.mrb[0].mxu1 %v4920_v53 }
 0x15b   :  { %2379 = vmatpush1.bf16.msra.mxu0 %v4969_v34  ;;  %2422 = vmatpush1.bf16.msra.mxu1 %v4973_v39 }
 0x15c   :  { %2380 = vmatprep.subr.bf16.mxu0 %v4975_v40  ;;  %2423 = vmatprep.subr.bf16.mxu1 %v4978_v41  ;;  %v6962_v41 = vld [vmem:[#allocation25_spill] sm:$0xff] }
 0x15d   :  { %2410 = vmatprep.mubr.bf16.mxu0 %v6785_v63  ;;  %2453 = vmatprep.mubr.bf16.mxu1 %v6785_v63 }
 0x15f   :  { %2381 = vmatpush1.bf16.msra.mxu0 %v4983_v50  ;;  %2424 = vmatpush1.bf16.msra.mxu1 %v4987_v51  ;;  %v6963_v50 = vld [vmem:[#allocation26_spill] sm:$0xff]  ;;  %v6964_v51 = vld [vmem:[#allocation27_spill] sm:$0xff] }
 0x160   :  { %2382 = vmatprep.subr.bf16.mxu0 %v4989_v52  ;;  %2425 = vmatprep.subr.bf16.mxu1 %v6955_v13  ;;  %v6965_v52 = vld [vmem:[#allocation28_spill] sm:$0xff]  ;;  %v6966_v13 = vld [vmem:[#allocation29_spill] sm:$0xff] }
 0x163   :  { %2383 = vmatpush1.bf16.msra.mxu0 %v6956_v32  ;;  %2426 = vmatpush1.bf16.msra.mxu1 %v6957_v60  ;;  %v6967_v32 = vld [vmem:[#allocation30_spill] sm:$0xff]  ;;  %v6968_v60 = vld [vmem:[#allocation31_spill] sm:$0xff] }
 0x164   :  { %2384 = vmatprep.subr.bf16.mxu0 %v6958_v14  ;;  %2427 = vmatprep.subr.bf16.mxu1 %v6959_v8  ;;  %v6969_v14 = vld [vmem:[#allocation32_spill] sm:$0xff]  ;;  %v6970_v8 = vld [vmem:[#allocation33_spill] sm:$0xff] }
 0x167   :  { %2385 = vmatpush1.bf16.msra.mxu0 %v6960_v44  ;;  %2428 = vmatpush1.bf16.msra.mxu1 %v6961_v26  ;;  %v6971_v44 = vld [vmem:[#allocation34_spill] sm:$0xff]  ;;  %v6972_v26 = vld [vmem:[#allocation35_spill] sm:$0xff] }
 0x168   :  { %2386 = vmatprep.subr.bf16.mxu0 %v6962_v41  ;;  %2429 = vmatprep.subr.bf16.mxu1 %v6963_v50  ;;  %v6973_v41 = vld [vmem:[#allocation36_spill] sm:$0xff]  ;;  %v6974_v50 = vld [vmem:[#allocation37_spill] sm:$0xff] }
 0x16b   :  { %2387 = vmatpush1.bf16.msra.mxu0 %v6964_v51  ;;  %2430 = vmatpush1.bf16.msra.mxu1 %v6965_v52  ;;  %v6975_v51 = vld [vmem:[#allocation38_spill] sm:$0xff]  ;;  %v6976_v52 = vld [vmem:[#allocation39_spill] sm:$0xff] }
 0x16c   :  { %2388 = vmatprep.subr.bf16.mxu0 %v6966_v13  ;;  %2431 = vmatprep.subr.bf16.mxu1 %v6967_v32  ;;  %v6977_v13 = vld [vmem:[#allocation40_spill] sm:$0xff]  ;;  %v6978_v32 = vld [vmem:[#allocation41_spill] sm:$0xff] }
 0x16f   :  { %2389 = vmatpush1.bf16.msra.mxu0 %v6968_v60  ;;  %2432 = vmatpush1.bf16.msra.mxu1 %v6969_v14  ;;  %v6979_v60 = vld [vmem:[#allocation42_spill] sm:$0xff]  ;;  %v6994_v14 = vld [vmem:[#allocation57_spill] sm:$0xff] }
 0x170   :  { %2390 = vmatprep.subr.bf16.mxu0 %v6970_v8  ;;  %2433 = vmatprep.subr.bf16.mxu1 %v6971_v44  ;;  %v6980_v44 = vld [vmem:[#allocation43_spill] sm:$0xff]  ;;  %v6993_v8 = vld [vmem:[#allocation56_spill] sm:$0xff] }
 0x173   :  { %2391 = vmatpush1.bf16.msra.mxu0 %v6972_v26  ;;  %2434 = vmatpush1.bf16.msra.mxu1 %v6973_v41  ;;  %v6981_v26 = vld [vmem:[#allocation44_spill] sm:$0xff]  ;;  %v6982_v41 = vld [vmem:[#allocation45_spill] sm:$0xff] }
 0x174   :  { %2392 = vmatprep.subr.bf16.mxu0 %v6974_v50  ;;  %2435 = vmatprep.subr.bf16.mxu1 %v6975_v51  ;;  %v6983_v50 = vld [vmem:[#allocation46_spill] sm:$0xff]  ;;  %v6988_v51 = vld [vmem:[#allocation51_spill] sm:$0xff] }
 0x177   :  { %2393 = vmatpush1.bf16.msra.mxu0 %v6976_v52  ;;  %2436 = vmatpush1.bf16.msra.mxu1 %v6977_v13  ;;  %v6984_v13 = vld [vmem:[#allocation47_spill] sm:$0xff]  ;;  %v6987_v52 = vld [vmem:[#allocation50_spill] sm:$0xff] }
 0x178   :  { %2464 = vmatprep.subr.bf16.mxu0 %v6978_v32  ;;  %2507 = vmatprep.subr.bf16.mxu1 %v6979_v60  ;;  %v6985_v32 = vld [vmem:[#allocation48_spill] sm:$0xff]  ;;  %v6986_v60 = vld [vmem:[#allocation49_spill] sm:$0xff] }
 0x17a   :  { %2411 = vmatmul.mubr.bf16.vlgmr.msra.gmra.mrb[4].mxu0 %v4920_v53  ;;  %2454 = vmatmul.mubr.bf16.vlgmr.msra.gmra.mrb[4].mxu1 %v4920_v53 }
 0x17b   :  { %2465 = vmatpush1.bf16.msra.mxu0 %v6980_v44  ;;  %2508 = vmatpush1.bf16.msra.mxu1 %v6981_v26  ;;  %v6989_v44 = vld [vmem:[#allocation52_spill] sm:$0xff]  ;;  %v6990_v26 = vld [vmem:[#allocation53_spill] sm:$0xff] }
 0x17c   :  { %2466 = vmatprep.subr.bf16.mxu0 %v6982_v41  ;;  %2509 = vmatprep.subr.bf16.mxu1 %v6983_v50  ;;  %v6991_v41 = vld [vmem:[#allocation54_spill] sm:$0xff]  ;;  %v6992_v50 = vld [vmem:[#allocation55_spill] sm:$0xff] }
 0x17d   :  { %2496 = vmatprep.mubr.bf16.mxu0 %v6785_v63  ;;  %2539 = vmatprep.mubr.bf16.mxu1 %v6785_v63 }
 0x17f   :  { %2467 = vmatpush1.bf16.msra.mxu0 %v6984_v13  ;;  %2510 = vmatpush1.bf16.msra.mxu1 %v6985_v32  ;;  %v6995_v13 = vld [vmem:[#allocation58_spill] sm:$0xff]  ;;  %v6996_v32 = vld [vmem:[#allocation59_spill] sm:$0xff] }
 0x180   :  { %2468 = vmatprep.subr.bf16.mxu0 %v6986_v60  ;;  %2511 = vmatprep.subr.bf16.mxu1 %v6987_v52  ;;  %v6997_v60 = vld [vmem:[#allocation60_spill] sm:$0xff]  ;;  %v6998_v52 = vld [vmem:[#allocation61_spill] sm:$0xff] }
 0x183   :  { %2469 = vmatpush1.bf16.msra.mxu0 %v6988_v51  ;;  %2512 = vmatpush1.bf16.msra.mxu1 %v6989_v44  ;;  %v6999_v51 = vld [vmem:[#allocation62_spill] sm:$0xff]  ;;  %v7000_v44 = vld [vmem:[#allocation63_spill] sm:$0xff] }
 0x184   :  { %2470 = vmatprep.subr.bf16.mxu0 %v6990_v26  ;;  %2513 = vmatprep.subr.bf16.mxu1 %v6991_v41  ;;  %v7001_v26 = vld [vmem:[#allocation64_spill] sm:$0xff]  ;;  %v7002_v41 = vld [vmem:[#allocation65_spill] sm:$0xff] }
 0x187   :  { %2471 = vmatpush1.bf16.msra.mxu0 %v6992_v50  ;;  %2514 = vmatpush1.bf16.msra.mxu1 %v6993_v8  ;;  %v7003_v50 = vld [vmem:[#allocation66_spill] sm:$0xff]  ;;  %v7004_v8 = vld [vmem:[#allocation67_spill] sm:$0xff] }
 0x188   :  { %2472 = vmatprep.subr.bf16.mxu0 %v6994_v14  ;;  %2515 = vmatprep.subr.bf16.mxu1 %v6995_v13  ;;  %v7005_v14 = vld [vmem:[#allocation68_spill] sm:$0xff]  ;;  %v7006_v13 = vld [vmem:[#allocation69_spill] sm:$0xff] }
 0x18b   :  { %2473 = vmatpush1.bf16.msra.mxu0 %v6996_v32  ;;  %2516 = vmatpush1.bf16.msra.mxu1 %v6997_v60  ;;  %v7007_v32 = vld [vmem:[#allocation70_spill] sm:$0xff]  ;;  %v7008_v60 = vld [vmem:[#allocation71_spill] sm:$0xff] }
 0x18c   :  { %2474 = vmatprep.subr.bf16.mxu0 %v6998_v52  ;;  %2517 = vmatprep.subr.bf16.mxu1 %v6999_v51  ;;  %v7009_v52 = vld [vmem:[#allocation72_spill] sm:$0xff]  ;;  %v7010_v51 = vld [vmem:[#allocation73_spill] sm:$0xff] }
 0x18f   :  { %2475 = vmatpush1.bf16.msra.mxu0 %v7000_v44  ;;  %2518 = vmatpush1.bf16.msra.mxu1 %v7001_v26  ;;  %v7011_v44 = vld [vmem:[#allocation74_spill] sm:$0xff]  ;;  %v7026_v26 = vld [vmem:[#allocation89_spill] sm:$0xff] }
 0x190   :  { %2476 = vmatprep.subr.bf16.mxu0 %v7002_v41  ;;  %2519 = vmatprep.subr.bf16.mxu1 %v7003_v50  ;;  %v7012_v50 = vld [vmem:[#allocation75_spill] sm:$0xff]  ;;  %v7025_v41 = vld [vmem:[#allocation88_spill] sm:$0xff] }
 0x193   :  { %2477 = vmatpush1.bf16.msra.mxu0 %v7004_v8  ;;  %2520 = vmatpush1.bf16.msra.mxu1 %v7005_v14  ;;  %v7013_v8 = vld [vmem:[#allocation76_spill] sm:$0xff]  ;;  %v7014_v14 = vld [vmem:[#allocation77_spill] sm:$0xff] }
 0x194   :  { %2478 = vmatprep.subr.bf16.mxu0 %v7006_v13  ;;  %2521 = vmatprep.subr.bf16.mxu1 %v7007_v32  ;;  %v7015_v13 = vld [vmem:[#allocation78_spill] sm:$0xff]  ;;  %v7020_v32 = vld [vmem:[#allocation83_spill] sm:$0xff] }
 0x197   :  { %2479 = vmatpush1.bf16.msra.mxu0 %v7008_v60  ;;  %2522 = vmatpush1.bf16.msra.mxu1 %v7009_v52  ;;  %v7016_v52 = vld [vmem:[#allocation79_spill] sm:$0xff]  ;;  %v7019_v60 = vld [vmem:[#allocation82_spill] sm:$0xff] }
 0x198   :  { %2550 = vmatprep.subr.bf16.mxu0 %v7010_v51  ;;  %2593 = vmatprep.subr.bf16.mxu1 %v7011_v44  ;;  %v7017_v51 = vld [vmem:[#allocation80_spill] sm:$0xff]  ;;  %v7018_v44 = vld [vmem:[#allocation81_spill] sm:$0xff] }
 0x19a   :  { %2497 = vmatmul.mubr.bf16.vlgmr.msra.gmra.mrb[8].mxu0 %v4920_v53  ;;  %2540 = vmatmul.mubr.bf16.vlgmr.msra.gmra.mrb[8].mxu1 %v4920_v53 }
 0x19b   :  { %2551 = vmatpush1.bf16.msra.mxu0 %v7012_v50  ;;  %2594 = vmatpush1.bf16.msra.mxu1 %v7013_v8  ;;  %v7021_v50 = vld [vmem:[#allocation84_spill] sm:$0xff]  ;;  %v7022_v8 = vld [vmem:[#allocation85_spill] sm:$0xff] }
 0x19c   :  { %2552 = vmatprep.subr.bf16.mxu0 %v7014_v14  ;;  %2595 = vmatprep.subr.bf16.mxu1 %v7015_v13  ;;  %v7023_v14 = vld [vmem:[#allocation86_spill] sm:$0xff]  ;;  %v7024_v13 = vld [vmem:[#allocation87_spill] sm:$0xff] }
 0x19d   :  { %2582 = vmatprep.mubr.bf16.mxu0 %v6785_v63  ;;  %2625 = vmatprep.mubr.bf16.mxu1 %v6785_v63 }
 0x19f   :  { %2553 = vmatpush1.bf16.msra.mxu0 %v7016_v52  ;;  %2596 = vmatpush1.bf16.msra.mxu1 %v7017_v51  ;;  %v7027_v52 = vld [vmem:[#allocation90_spill] sm:$0xff]  ;;  %v7028_v51 = vld [vmem:[#allocation91_spill] sm:$0xff] }
 0x1a0   :  { %2554 = vmatprep.subr.bf16.mxu0 %v7018_v44  ;;  %2597 = vmatprep.subr.bf16.mxu1 %v7019_v60  ;;  %v7029_v44 = vld [vmem:[#allocation92_spill] sm:$0xff]  ;;  %v7030_v60 = vld [vmem:[#allocation93_spill] sm:$0xff] }
 0x1a3   :  { %2555 = vmatpush1.bf16.msra.mxu0 %v7020_v32  ;;  %2598 = vmatpush1.bf16.msra.mxu1 %v7021_v50  ;;  %v7031_v32 = vld [vmem:[#allocation94_spill] sm:$0xff]  ;;  %v7032_v50 = vld [vmem:[#allocation95_spill] sm:$0xff] }
 0x1a4   :  { %2556 = vmatprep.subr.bf16.mxu0 %v7022_v8  ;;  %2599 = vmatprep.subr.bf16.mxu1 %v7023_v14  ;;  %v7033_v8 = vld [vmem:[#allocation96_spill] sm:$0xff]  ;;  %v7034_v14 = vld [vmem:[#allocation97_spill] sm:$0xff] }
 0x1a7   :  { %2557 = vmatpush1.bf16.msra.mxu0 %v7024_v13  ;;  %2600 = vmatpush1.bf16.msra.mxu1 %v7025_v41  ;;  %v7035_v13 = vld [vmem:[#allocation98_spill] sm:$0xff]  ;;  %v7036_v41 = vld [vmem:[#allocation99_spill] sm:$0xff] }
 0x1a8   :  { %2558 = vmatprep.subr.bf16.mxu0 %v7026_v26  ;;  %2601 = vmatprep.subr.bf16.mxu1 %v7027_v52  ;;  %v7037_v26 = vld [vmem:[#allocation100_spill] sm:$0xff]  ;;  %v7038_v52 = vld [vmem:[#allocation101_spill] sm:$0xff] }
 0x1ab   :  { %2559 = vmatpush1.bf16.msra.mxu0 %v7028_v51  ;;  %2602 = vmatpush1.bf16.msra.mxu1 %v7029_v44  ;;  %v7039_v51 = vld [vmem:[#allocation102_spill] sm:$0xff]  ;;  %v7040_v44 = vld [vmem:[#allocation103_spill] sm:$0xff] }
 0x1ac   :  { %2560 = vmatprep.subr.bf16.mxu0 %v7030_v60  ;;  %2603 = vmatprep.subr.bf16.mxu1 %v7031_v32  ;;  %v7041_v60 = vld [vmem:[#allocation104_spill] sm:$0xff]  ;;  %v7042_v32 = vld [vmem:[#allocation105_spill] sm:$0xff] }
 0x1af   :  { %2561 = vmatpush1.bf16.msra.mxu0 %v7032_v50  ;;  %2604 = vmatpush1.bf16.msra.mxu1 %v7033_v8  ;;  %v7043_v50 = vld [vmem:[#allocation106_spill] sm:$0xff]  ;;  %v7058_v8 = vld [vmem:[#allocation121_spill] sm:$0xff] }
 0x1b0   :  { %2562 = vmatprep.subr.bf16.mxu0 %v7034_v14  ;;  %2605 = vmatprep.subr.bf16.mxu1 %v7035_v13  ;;  %v7044_v13 = vld [vmem:[#allocation107_spill] sm:$0xff]  ;;  %v7057_v14 = vld [vmem:[#allocation120_spill] sm:$0xff] }
 0x1b3   :  { %2563 = vmatpush1.bf16.msra.mxu0 %v7036_v41  ;;  %2606 = vmatpush1.bf16.msra.mxu1 %v7037_v26  ;;  %v7045_v41 = vld [vmem:[#allocation108_spill] sm:$0xff]  ;;  %v7046_v26 = vld [vmem:[#allocation109_spill] sm:$0xff] }
 0x1b4   :  { %2564 = vmatprep.subr.bf16.mxu0 %v7038_v52  ;;  %2607 = vmatprep.subr.bf16.mxu1 %v7039_v51  ;;  %v7047_v52 = vld [vmem:[#allocation110_spill] sm:$0xff]  ;;  %v7052_v51 = vld [vmem:[#allocation115_spill] sm:$0xff] }
 0x1b7   :  { %2565 = vmatpush1.bf16.msra.mxu0 %v7040_v44  ;;  %2608 = vmatpush1.bf16.msra.mxu1 %v7041_v60  ;;  %v7048_v60 = vld [vmem:[#allocation111_spill] sm:$0xff]  ;;  %v7051_v44 = vld [vmem:[#allocation114_spill] sm:$0xff] }
 0x1b8   :  { %2636 = vmatprep.subr.bf16.mxu0 %v7042_v32  ;;  %2679 = vmatprep.subr.bf16.mxu1 %v7043_v50  ;;  %v7049_v32 = vld [vmem:[#allocation112_spill] sm:$0xff]  ;;  %v7050_v50 = vld [vmem:[#allocation113_spill] sm:$0xff] }
 0x1ba   :  { %2583 = vmatmul.mubr.bf16.vlgmr.msra.gmra.mrb[12].mxu0 %v4920_v53  ;;  %2626 = vmatmul.mubr.bf16.vlgmr.msra.gmra.mrb[12].mxu1 %v4920_v53 }
 0x1bb   :  { %2637 = vmatpush1.bf16.msra.mxu0 %v7044_v13  ;;  %2680 = vmatpush1.bf16.msra.mxu1 %v7045_v41  ;;  %v7053_v13 = vld [vmem:[#allocation116_spill] sm:$0xff]  ;;  %v7054_v41 = vld [vmem:[#allocation117_spill] sm:$0xff] }
 0x1bc   :  { %2638 = vmatprep.subr.bf16.mxu0 %v7046_v26  ;;  %2681 = vmatprep.subr.bf16.mxu1 %v7047_v52  ;;  %v7055_v26 = vld [vmem:[#allocation118_spill] sm:$0xff]  ;;  %v7056_v52 = vld [vmem:[#allocation119_spill] sm:$0xff] }
 0x1bd   :  { %2668 = vmatprep.mubr.bf16.mxu0 %v6785_v63  ;;  %2711 = vmatprep.mubr.bf16.mxu1 %v6785_v63 }
 0x1bf   :  { %2639 = vmatpush1.bf16.msra.mxu0 %v7048_v60  ;;  %2682 = vmatpush1.bf16.msra.mxu1 %v7049_v32  ;;  %v7059_v60 = vld [vmem:[#allocation122_spill] sm:$0xff]  ;;  %v7060_v32 = vld [vmem:[#allocation123_spill] sm:$0xff] }
 0x1c0   :  { %2640 = vmatprep.subr.bf16.mxu0 %v7050_v50  ;;  %2683 = vmatprep.subr.bf16.mxu1 %v7051_v44  ;;  %v7061_v50 = vld [vmem:[#allocation124_spill] sm:$0xff]  ;;  %v7062_v44 = vld [vmem:[#allocation125_spill] sm:$0xff] }
 0x1c3   :  { %2641 = vmatpush1.bf16.msra.mxu0 %v7052_v51  ;;  %2684 = vmatpush1.bf16.msra.mxu1 %v7053_v13  ;;  %v7063_v51 = vld [vmem:[#allocation126_spill] sm:$0xff]  ;;  %v7064_v13 = vld [vmem:[#allocation127_spill] sm:$0xff] }
 0x1c4   :  { %2642 = vmatprep.subr.bf16.mxu0 %v7054_v41  ;;  %2685 = vmatprep.subr.bf16.mxu1 %v7055_v26  ;;  %v7065_v41 = vld [vmem:[#allocation128_spill] sm:$0xff]  ;;  %v7066_v26 = vld [vmem:[#allocation129_spill] sm:$0xff] }
 0x1c7   :  { %2643 = vmatpush1.bf16.msra.mxu0 %v7056_v52  ;;  %2686 = vmatpush1.bf16.msra.mxu1 %v7057_v14  ;;  %v7067_v52 = vld [vmem:[#allocation130_spill] sm:$0xff]  ;;  %v7068_v14 = vld [vmem:[#allocation131_spill] sm:$0xff] }
 0x1c8   :  { %2644 = vmatprep.subr.bf16.mxu0 %v7058_v8  ;;  %2687 = vmatprep.subr.bf16.mxu1 %v7059_v60  ;;  %v7069_v8 = vld [vmem:[#allocation132_spill] sm:$0xff]  ;;  %v7070_v60 = vld [vmem:[#allocation133_spill] sm:$0xff] }
 0x1cb   :  { %2645 = vmatpush1.bf16.msra.mxu0 %v7060_v32  ;;  %2688 = vmatpush1.bf16.msra.mxu1 %v7061_v50  ;;  %v7071_v32 = vld [vmem:[#allocation134_spill] sm:$0xff]  ;;  %v7072_v50 = vld [vmem:[#allocation135_spill] sm:$0xff] }
 0x1cc   :  { %2646 = vmatprep.subr.bf16.mxu0 %v7062_v44  ;;  %2689 = vmatprep.subr.bf16.mxu1 %v7063_v51  ;;  %v7073_v44 = vld [vmem:[#allocation136_spill] sm:$0xff]  ;;  %v7074_v51 = vld [vmem:[#allocation137_spill] sm:$0xff] }
 0x1cf   :  { %2647 = vmatpush1.bf16.msra.mxu0 %v7064_v13  ;;  %2690 = vmatpush1.bf16.msra.mxu1 %v7065_v41  ;;  %v7075_v13 = vld [vmem:[#allocation138_spill] sm:$0xff]  ;;  %v7090_v41 = vld [vmem:[#allocation153_spill] sm:$0xff] }
 0x1d0   :  { %2648 = vmatprep.subr.bf16.mxu0 %v7066_v26  ;;  %2691 = vmatprep.subr.bf16.mxu1 %v7067_v52  ;;  %v7076_v52 = vld [vmem:[#allocation139_spill] sm:$0xff]  ;;  %v7089_v26 = vld [vmem:[#allocation152_spill] sm:$0xff] }
 0x1d3   :  { %2649 = vmatpush1.bf16.msra.mxu0 %v7068_v14  ;;  %2692 = vmatpush1.bf16.msra.mxu1 %v7069_v8  ;;  %v7077_v14 = vld [vmem:[#allocation140_spill] sm:$0xff]  ;;  %v7078_v8 = vld [vmem:[#allocation141_spill] sm:$0xff] }
 0x1d4   :  { %2650 = vmatprep.subr.bf16.mxu0 %v7070_v60  ;;  %2693 = vmatprep.subr.bf16.mxu1 %v7071_v32  ;;  %v7079_v60 = vld [vmem:[#allocation142_spill] sm:$0xff]  ;;  %v7084_v32 = vld [vmem:[#allocation147_spill] sm:$0xff] }
 0x1d7   :  { %2651 = vmatpush1.bf16.msra.mxu0 %v7072_v50  ;;  %2694 = vmatpush1.bf16.msra.mxu1 %v7073_v44  ;;  %v7080_v44 = vld [vmem:[#allocation143_spill] sm:$0xff]  ;;  %v7083_v50 = vld [vmem:[#allocation146_spill] sm:$0xff] }
 0x1d8   :  { %2722 = vmatprep.subr.bf16.mxu0 %v7074_v51  ;;  %2765 = vmatprep.subr.bf16.mxu1 %v7075_v13  ;;  %v7081_v51 = vld [vmem:[#allocation144_spill] sm:$0xff]  ;;  %v7082_v13 = vld [vmem:[#allocation145_spill] sm:$0xff] }
 0x1da   :  { %2669 = vmatmul.mubr.bf16.vlgmr.msra.gmra.mrb[16].mxu0 %v4920_v53  ;;  %2712 = vmatmul.mubr.bf16.vlgmr.msra.gmra.mrb[16].mxu1 %v4920_v53 }
 0x1db   :  { %2723 = vmatpush1.bf16.msra.mxu0 %v7076_v52  ;;  %2766 = vmatpush1.bf16.msra.mxu1 %v7077_v14  ;;  %v7085_v52 = vld [vmem:[#allocation148_spill] sm:$0xff]  ;;  %v7086_v14 = vld [vmem:[#allocation149_spill] sm:$0xff] }
 0x1dc   :  { %2724 = vmatprep.subr.bf16.mxu0 %v7078_v8  ;;  %2767 = vmatprep.subr.bf16.mxu1 %v7079_v60  ;;  %v7087_v8 = vld [vmem:[#allocation150_spill] sm:$0xff]  ;;  %v7088_v60 = vld [vmem:[#allocation151_spill] sm:$0xff] }
 0x1dd   :  { %2754 = vmatprep.mubr.bf16.mxu0 %v6785_v63  ;;  %2797 = vmatprep.mubr.bf16.mxu1 %v6785_v63 }
 0x1df   :  { %2725 = vmatpush1.bf16.msra.mxu0 %v7080_v44  ;;  %2768 = vmatpush1.bf16.msra.mxu1 %v7081_v51  ;;  %v7091_v44 = vld [vmem:[#allocation154_spill] sm:$0xff]  ;;  %v7092_v51 = vld [vmem:[#allocation155_spill] sm:$0xff] }
 0x1e0   :  { %2726 = vmatprep.subr.bf16.mxu0 %v7082_v13  ;;  %2769 = vmatprep.subr.bf16.mxu1 %v7083_v50  ;;  %v7093_v13 = vld [vmem:[#allocation156_spill] sm:$0xff]  ;;  %v7094_v50 = vld [vmem:[#allocation157_spill] sm:$0xff] }
 0x1e3   :  { %2727 = vmatpush1.bf16.msra.mxu0 %v7084_v32  ;;  %2770 = vmatpush1.bf16.msra.mxu1 %v7085_v52  ;;  %v7095_v32 = vld [vmem:[#allocation158_spill] sm:$0xff]  ;;  %v7096_v52 = vld [vmem:[#allocation159_spill] sm:$0xff] }
 0x1e4   :  { %2728 = vmatprep.subr.bf16.mxu0 %v7086_v14  ;;  %2771 = vmatprep.subr.bf16.mxu1 %v7087_v8  ;;  %v7097_v14 = vld [vmem:[#allocation160_spill] sm:$0xff]  ;;  %v7098_v8 = vld [vmem:[#allocation161_spill] sm:$0xff] }
 0x1e7   :  { %2729 = vmatpush1.bf16.msra.mxu0 %v7088_v60  ;;  %2772 = vmatpush1.bf16.msra.mxu1 %v7089_v26  ;;  %v7099_v60 = vld [vmem:[#allocation162_spill] sm:$0xff]  ;;  %v7100_v26 = vld [vmem:[#allocation163_spill] sm:$0xff] }
 0x1e8   :  { %2730 = vmatprep.subr.bf16.mxu0 %v7090_v41  ;;  %2773 = vmatprep.subr.bf16.mxu1 %v7091_v44  ;;  %v7101_v41 = vld [vmem:[#allocation164_spill] sm:$0xff]  ;;  %v7102_v44 = vld [vmem:[#allocation165_spill] sm:$0xff] }
 0x1eb   :  { %2731 = vmatpush1.bf16.msra.mxu0 %v7092_v51  ;;  %2774 = vmatpush1.bf16.msra.mxu1 %v7093_v13  ;;  %v7103_v51 = vld [vmem:[#allocation166_spill] sm:$0xff]  ;;  %v7104_v13 = vld [vmem:[#allocation167_spill] sm:$0xff] }
 0x1ec   :  { %2732 = vmatprep.subr.bf16.mxu0 %v7094_v50  ;;  %2775 = vmatprep.subr.bf16.mxu1 %v7095_v32  ;;  %v7105_v50 = vld [vmem:[#allocation168_spill] sm:$0xff]  ;;  %v7106_v32 = vld [vmem:[#allocation169_spill] sm:$0xff] }
 0x1ef   :  { %2733 = vmatpush1.bf16.msra.mxu0 %v7096_v52  ;;  %2776 = vmatpush1.bf16.msra.mxu1 %v7097_v14  ;;  %v7107_v52 = vld [vmem:[#allocation170_spill] sm:$0xff]  ;;  %v7122_v14 = vld [vmem:[#allocation185_spill] sm:$0xff] }
 0x1f0   :  { %2734 = vmatprep.subr.bf16.mxu0 %v7098_v8  ;;  %2777 = vmatprep.subr.bf16.mxu1 %v7099_v60  ;;  %v7108_v60 = vld [vmem:[#allocation171_spill] sm:$0xff]  ;;  %v7121_v8 = vld [vmem:[#allocation184_spill] sm:$0xff] }
 0x1f3   :  { %2735 = vmatpush1.bf16.msra.mxu0 %v7100_v26  ;;  %2778 = vmatpush1.bf16.msra.mxu1 %v7101_v41  ;;  %v7109_v26 = vld [vmem:[#allocation172_spill] sm:$0xff]  ;;  %v7110_v41 = vld [vmem:[#allocation173_spill] sm:$0xff] }
 0x1f4   :  { %2736 = vmatprep.subr.bf16.mxu0 %v7102_v44  ;;  %2779 = vmatprep.subr.bf16.mxu1 %v7103_v51  ;;  %v7111_v44 = vld [vmem:[#allocation174_spill] sm:$0xff]  ;;  %v7116_v51 = vld [vmem:[#allocation179_spill] sm:$0xff] }
 0x1f7   :  { %2737 = vmatpush1.bf16.msra.mxu0 %v7104_v13  ;;  %2780 = vmatpush1.bf16.msra.mxu1 %v7105_v50  ;;  %v7112_v50 = vld [vmem:[#allocation175_spill] sm:$0xff]  ;;  %v7115_v13 = vld [vmem:[#allocation178_spill] sm:$0xff] }
 0x1f8   :  { %2808 = vmatprep.subr.bf16.mxu0 %v7106_v32  ;;  %2851 = vmatprep.subr.bf16.mxu1 %v7107_v52  ;;  %v7113_v32 = vld [vmem:[#allocation176_spill] sm:$0xff]  ;;  %v7114_v52 = vld [vmem:[#allocation177_spill] sm:$0xff] }
 0x1fa   :  { %2755 = vmatmul.mubr.bf16.vlgmr.msra.gmra.mrb[20].mxu0 %v4920_v53  ;;  %2798 = vmatmul.mubr.bf16.vlgmr.msra.gmra.mrb[20].mxu1 %v4920_v53 }
 0x1fb   :  { %2809 = vmatpush1.bf16.msra.mxu0 %v7108_v60  ;;  %2852 = vmatpush1.bf16.msra.mxu1 %v7109_v26  ;;  %v7117_v60 = vld [vmem:[#allocation180_spill] sm:$0xff]  ;;  %v7118_v26 = vld [vmem:[#allocation181_spill] sm:$0xff] }
 0x1fc   :  { %2810 = vmatprep.subr.bf16.mxu0 %v7110_v41  ;;  %2853 = vmatprep.subr.bf16.mxu1 %v7111_v44  ;;  %v7119_v41 = vld [vmem:[#allocation182_spill] sm:$0xff]  ;;  %v7120_v44 = vld [vmem:[#allocation183_spill] sm:$0xff] }
 0x1fd   :  { %2840 = vmatprep.mubr.bf16.mxu0 %v6785_v63  ;;  %2883 = vmatprep.mubr.bf16.mxu1 %v6785_v63 }
 0x1ff   :  { %2811 = vmatpush1.bf16.msra.mxu0 %v7112_v50  ;;  %2854 = vmatpush1.bf16.msra.mxu1 %v7113_v32  ;;  %v7123_v50 = vld [vmem:[#allocation186_spill] sm:$0xff]  ;;  %v7124_v32 = vld [vmem:[#allocation187_spill] sm:$0xff] }
 0x200   :  { %2812 = vmatprep.subr.bf16.mxu0 %v7114_v52  ;;  %2855 = vmatprep.subr.bf16.mxu1 %v7115_v13  ;;  %v7125_v52 = vld [vmem:[#allocation188_spill] sm:$0xff]  ;;  %v7126_v13 = vld [vmem:[#allocation189_spill] sm:$0xff] }
 0x203   :  { %2813 = vmatpush1.bf16.msra.mxu0 %v7116_v51  ;;  %2856 = vmatpush1.bf16.msra.mxu1 %v7117_v60  ;;  %v7127_v51 = vld [vmem:[#allocation190_spill] sm:$0xff]  ;;  %v7128_v60 = vld [vmem:[#allocation191_spill] sm:$0xff] }
 0x204   :  { %2814 = vmatprep.subr.bf16.mxu0 %v7118_v26  ;;  %2857 = vmatprep.subr.bf16.mxu1 %v7119_v41  ;;  %v7129_v26 = vld [vmem:[#allocation192_spill] sm:$0xff]  ;;  %v7130_v41 = vld [vmem:[#allocation193_spill] sm:$0xff] }
 0x207   :  { %2815 = vmatpush1.bf16.msra.mxu0 %v7120_v44  ;;  %2858 = vmatpush1.bf16.msra.mxu1 %v7121_v8  ;;  %v7131_v44 = vld [vmem:[#allocation194_spill] sm:$0xff]  ;;  %v7132_v8 = vld [vmem:[#allocation195_spill] sm:$0xff] }
 0x208   :  { %2816 = vmatprep.subr.bf16.mxu0 %v7122_v14  ;;  %2859 = vmatprep.subr.bf16.mxu1 %v7123_v50  ;;  %v7133_v14 = vld [vmem:[#allocation196_spill] sm:$0xff]  ;;  %v7134_v50 = vld [vmem:[#allocation197_spill] sm:$0xff] }
 0x20b   :  { %2817 = vmatpush1.bf16.msra.mxu0 %v7124_v32  ;;  %2860 = vmatpush1.bf16.msra.mxu1 %v7125_v52  ;;  %v7135_v32 = vld [vmem:[#allocation198_spill] sm:$0xff]  ;;  %v7136_v52 = vld [vmem:[#allocation199_spill] sm:$0xff] }
 0x20c   :  { %2818 = vmatprep.subr.bf16.mxu0 %v7126_v13  ;;  %2861 = vmatprep.subr.bf16.mxu1 %v7127_v51  ;;  %v7137_v13 = vld [vmem:[#allocation200_spill] sm:$0xff]  ;;  %v7138_v51 = vld [vmem:[#allocation201_spill] sm:$0xff] }
 0x20f   :  { %2819 = vmatpush1.bf16.msra.mxu0 %v7128_v60  ;;  %2862 = vmatpush1.bf16.msra.mxu1 %v7129_v26  ;;  %v7139_v60 = vld [vmem:[#allocation202_spill] sm:$0xff]  ;;  %v7154_v26 = vld [vmem:[#allocation217_spill] sm:$0xff] }
 0x210   :  { %2820 = vmatprep.subr.bf16.mxu0 %v7130_v41  ;;  %2863 = vmatprep.subr.bf16.mxu1 %v7131_v44  ;;  %v7140_v44 = vld [vmem:[#allocation203_spill] sm:$0xff]  ;;  %v7153_v41 = vld [vmem:[#allocation216_spill] sm:$0xff] }
 0x213   :  { %2821 = vmatpush1.bf16.msra.mxu0 %v7132_v8  ;;  %2864 = vmatpush1.bf16.msra.mxu1 %v7133_v14  ;;  %v7141_v8 = vld [vmem:[#allocation204_spill] sm:$0xff]  ;;  %v7142_v14 = vld [vmem:[#allocation205_spill] sm:$0xff] }
 0x214   :  { %2822 = vmatprep.subr.bf16.mxu0 %v7134_v50  ;;  %2865 = vmatprep.subr.bf16.mxu1 %v7135_v32  ;;  %v7143_v50 = vld [vmem:[#allocation206_spill] sm:$0xff]  ;;  %v7148_v32 = vld [vmem:[#allocation211_spill] sm:$0xff] }
 0x217   :  { %2823 = vmatpush1.bf16.msra.mxu0 %v7136_v52  ;;  %2866 = vmatpush1.bf16.msra.mxu1 %v7137_v13  ;;  %v7144_v13 = vld [vmem:[#allocation207_spill] sm:$0xff]  ;;  %v7147_v52 = vld [vmem:[#allocation210_spill] sm:$0xff] }
 0x218   :  { %2894 = vmatprep.subr.bf16.mxu0 %v7138_v51  ;;  %2937 = vmatprep.subr.bf16.mxu1 %v7139_v60  ;;  %v7145_v51 = vld [vmem:[#allocation208_spill] sm:$0xff]  ;;  %v7146_v60 = vld [vmem:[#allocation209_spill] sm:$0xff] }
 0x21a   :  { %2841 = vmatmul.mubr.bf16.vlgmr.msra.gmra.mrb[24].mxu0 %v4920_v53  ;;  %2884 = vmatmul.mubr.bf16.vlgmr.msra.gmra.mrb[24].mxu1 %v4920_v53 }
 0x21b   :  { %2895 = vmatpush1.bf16.msra.mxu0 %v7140_v44  ;;  %2938 = vmatpush1.bf16.msra.mxu1 %v7141_v8  ;;  %v7149_v44 = vld [vmem:[#allocation212_spill] sm:$0xff]  ;;  %v7150_v8 = vld [vmem:[#allocation213_spill] sm:$0xff] }
 0x21c   :  { %2896 = vmatprep.subr.bf16.mxu0 %v7142_v14  ;;  %2939 = vmatprep.subr.bf16.mxu1 %v7143_v50  ;;  %v7151_v14 = vld [vmem:[#allocation214_spill] sm:$0xff]  ;;  %v7152_v50 = vld [vmem:[#allocation215_spill] sm:$0xff] }
 0x21d   :  { %2926 = vmatprep.mubr.bf16.mxu0 %v6785_v63  ;;  %2969 = vmatprep.mubr.bf16.mxu1 %v6785_v63 }
 0x21f   :  { %2897 = vmatpush1.bf16.msra.mxu0 %v7144_v13  ;;  %2940 = vmatpush1.bf16.msra.mxu1 %v7145_v51  ;;  %v7155_v13 = vld [vmem:[#allocation218_spill] sm:$0xff] }
 0x220   :  { %2898 = vmatprep.subr.bf16.mxu0 %v7146_v60  ;;  %2941 = vmatprep.subr.bf16.mxu1 %v7147_v52 }
 0x223   :  { %2899 = vmatpush1.bf16.msra.mxu0 %v7148_v32  ;;  %2942 = vmatpush1.bf16.msra.mxu1 %v7149_v44  ;;  %v7156_v32 = vld [vmem:[#allocation219_spill] sm:$0xff] }
 0x224   :  { %2900 = vmatprep.subr.bf16.mxu0 %v7150_v8  ;;  %2943 = vmatprep.subr.bf16.mxu1 %v7151_v14 }
 0x227   :  { %2901 = vmatpush1.bf16.msra.mxu0 %v7152_v50  ;;  %2944 = vmatpush1.bf16.msra.mxu1 %v7153_v41 }
 0x228   :  { %2902 = vmatprep.subr.bf16.mxu0 %v7154_v26  ;;  %2945 = vmatprep.subr.bf16.mxu1 %v7155_v13 }
 0x22b   :  { %2903 = vmatpush1.bf16.msra.mxu0 %v5621_v12  ;;  %2946 = vmatpush1.bf16.msra.mxu1 %v5625_v7 }
 0x22c   :  { %2904 = vmatprep.subr.bf16.mxu0 %v5627_v58  ;;  %2947 = vmatprep.subr.bf16.mxu1 %v7156_v32 }
 0x22f   :  { %2905 = vmatpush1.bf16.msra.mxu0 %v5633_v45  ;;  %2948 = vmatpush1.bf16.msra.mxu1 %v5637_v16 }
 0x230   :  { %2906 = vmatprep.subr.bf16.mxu0 %v5639_v42  ;;  %2949 = vmatprep.subr.bf16.mxu1 %v5642_v0 }
 0x233   :  { %2907 = vmatpush1.bf16.msra.mxu0 %v5645_v59  ;;  %2950 = vmatpush1.bf16.msra.mxu1 %v5649_v25 }
 0x234   :  { %2908 = vmatprep.subr.bf16.mxu0 %v5651_v61  ;;  %2951 = vmatprep.subr.bf16.mxu1 %v5654_v49 }
 0x237   :  { %2909 = vmatpush1.bf16.msra.mxu0 %v5657_v62  ;;  %2952 = vmatpush1.bf16.msra.mxu1 %v5661_v33 }
 0x238   :  { %2980 = vmatprep.subr.bf16.mxu0 %v4858_v4  ;;  %3023 = vmatprep.subr.bf16.mxu1 %v4862_v9  ;;  %v63_v4 = vunpack.c.l.bf16 %v4966_v31  ;;  %v7157_v9 = vld [vmem:[#allocation12_spill] sm:$0xff] }
 0x23a   :  { %2927 = vmatmul.mubr.bf16.vlgmr.msra.gmra.mrb[28].mxu0 %v4920_v53  ;;  %2970 = vmatmul.mubr.bf16.vlgmr.msra.gmra.mrb[28].mxu1 %v4920_v53  ;;  %v7174_v53 = vld [vmem:[#allocation29_spill] sm:$0xff] }
 0x23b   :  { %2981 = vmatpush1.bf16.msra.mxu0 %v4860_v6  ;;  %3024 = vmatpush1.bf16.msra.mxu1 %v4864_v10  ;;  %v64_v6 = vunpack.c.h.bf16 %v4966_v31  ;;  %v65_v10 = vsub.f32 %v7157_v9, %v63_v4  ;;  %v7187_v31 = vld [vmem:[#allocation42_spill] sm:$0xff]  ;;  %v7193_v9 = vld [vmem:[#allocation48_spill] sm:$0xff] }
 0x23c   :  { %2982 = vmatprep.subr.bf16.mxu0 %v4866_v11  ;;  %3025 = vmatprep.subr.bf16.mxu1 %v4869_v15  ;;  %v7158_v11 = vld [vmem:[#allocation13_spill] sm:$0xff]  ;;  %v7191_v4 = vld [vmem:[#allocation46_spill] sm:$0xff] }
 0x23d   :  { %3012 = vmatprep.mubr.bf16.mxu0 %v6785_v63  ;;  %3055 = vmatprep.mubr.bf16.mxu1 %v6785_v63  ;;  %v66_v15 = vsub.f32 %v7158_v11, %v64_v6  ;;  %v7192_v6 = vld [vmem:[#allocation47_spill] sm:$0xff]  ;;  %v7195_v11 = vld [vmem:[#allocation50_spill] sm:$0xff] }
 0x23f   :  { %2983 = vmatpush1.bf16.msra.mxu0 %v4873_v19  ;;  %3026 = vmatpush1.bf16.msra.mxu1 %v4877_v20  ;;  %v5992_v19 = vpack.c.bf16 %v66_v15, %v65_v10  ;;  %v7159_v20 = vld [vmem:[#allocation14_spill] sm:$0xff]  ;;  %v7194_v10 = vld [vmem:[#allocation49_spill] sm:$0xff]  ;;  %v7196_v15 = vld [vmem:[#allocation51_spill] sm:$0xff] }
 0x240   :  { %2984 = vmatprep.subr.bf16.mxu0 %v4879_v21  ;;  %3027 = vmatprep.subr.bf16.mxu1 %v4882_v22  ;;  %v7160_v21 = vld [vmem:[#allocation15_spill] sm:$0xff]  ;;  %v7161_v22 = vld [vmem:[#allocation16_spill] sm:$0xff] }
 0x243   :  { %2985 = vmatpush1.bf16.msra.mxu0 %v4885_v27  ;;  %3028 = vmatpush1.bf16.msra.mxu1 %v4889_v28  ;;  %v7162_v27 = vld [vmem:[#allocation17_spill] sm:$0xff]  ;;  %v7163_v28 = vld [vmem:[#allocation18_spill] sm:$0xff] }
 0x244   :  { %2986 = vmatprep.subr.bf16.mxu0 %v4891_v29  ;;  %3029 = vmatprep.subr.bf16.mxu1 %v4894_v30  ;;  %v7164_v29 = vld [vmem:[#allocation19_spill] sm:$0xff]  ;;  %v7165_v30 = vld [vmem:[#allocation20_spill] sm:$0xff] }
 0x247   :  { %2987 = vmatpush1.bf16.msra.mxu0 %v4897_v35  ;;  %3030 = vmatpush1.bf16.msra.mxu1 %v4901_v36  ;;  %v7166_v35 = vld [vmem:[#allocation21_spill] sm:$0xff]  ;;  %v7167_v36 = vld [vmem:[#allocation22_spill] sm:$0xff] }
 0x248   :  { %2988 = vmatprep.subr.bf16.mxu0 %v4903_v37  ;;  %3031 = vmatprep.subr.bf16.mxu1 %v4906_v38  ;;  %v7168_v37 = vld [vmem:[#allocation23_spill] sm:$0xff]  ;;  %v7169_v38 = vld [vmem:[#allocation24_spill] sm:$0xff] }
 0x24b   :  { %2989 = vmatpush1.bf16.msra.mxu0 %v4909_v43  ;;  %3032 = vmatpush1.bf16.msra.mxu1 %v4913_v46  ;;  %v7170_v43 = vld [vmem:[#allocation25_spill] sm:$0xff]  ;;  %v7171_v46 = vld [vmem:[#allocation26_spill] sm:$0xff] }
 0x24c   :  { %2990 = vmatprep.subr.bf16.mxu0 %v4915_v47  ;;  %3033 = vmatprep.subr.bf16.mxu1 %v4918_v48  ;;  %v7172_v47 = vld [vmem:[#allocation27_spill] sm:$0xff]  ;;  %v7173_v48 = vld [vmem:[#allocation28_spill] sm:$0xff] }
 0x24f   :  { %2991 = vmatpush1.bf16.msra.mxu0 %v4923_v54  ;;  %3034 = vmatpush1.bf16.msra.mxu1 %v4927_v55  ;;  %v7175_v54 = vld [vmem:[#allocation30_spill] sm:$0xff]  ;;  %v7176_v55 = vld [vmem:[#allocation31_spill] sm:$0xff] }
 0x250   :  { %2992 = vmatprep.subr.bf16.mxu0 %v4929_v56  ;;  %3035 = vmatprep.subr.bf16.mxu1 %v4932_v57  ;;  %v7177_v56 = vld [vmem:[#allocation32_spill] sm:$0xff]  ;;  %v7178_v57 = vld [vmem:[#allocation33_spill] sm:$0xff] }
 0x253   :  { %2993 = vmatpush1.bf16.msra.mxu0 %v4937_v1  ;;  %3036 = vmatpush1.bf16.msra.mxu1 %v4941_v2  ;;  %v7179_v1 = vld [vmem:[#allocation34_spill] sm:$0xff]  ;;  %v7180_v2 = vld [vmem:[#allocation35_spill] sm:$0xff] }
 0x254   :  { %2994 = vmatprep.subr.bf16.mxu0 %v4943_v3  ;;  %3037 = vmatprep.subr.bf16.mxu1 %v4946_v5  ;;  %v7181_v3 = vld [vmem:[#allocation36_spill] sm:$0xff]  ;;  %v7182_v5 = vld [vmem:[#allocation37_spill] sm:$0xff] }
 0x257   :  { %2995 = vmatpush1.bf16.msra.mxu0 %v4953_v17  ;;  %3038 = vmatpush1.bf16.msra.mxu1 %v4957_v18  ;;  %v7183_v17 = vld [vmem:[#allocation38_spill] sm:$0xff]  ;;  %v7184_v18 = vld [vmem:[#allocation39_spill] sm:$0xff] }
 0x258   :  { %3066 = vmatprep.subr.bf16.mxu0 %v4959_v23  ;;  %3109 = vmatprep.subr.bf16.mxu1 %v4962_v24  ;;  %v7185_v23 = vld [vmem:[#allocation40_spill] sm:$0xff]  ;;  %v7186_v24 = vld [vmem:[#allocation41_spill] sm:$0xff] }
 0x25a   :  { %3013 = vmatmul.mubr.bf16.vlgmr.msra.gmra.mrb[0].mxu0 %v5992_v19  ;;  %3056 = vmatmul.mubr.bf16.vlgmr.msra.gmra.mrb[0].mxu1 %v5992_v19 }
 0x25b   :  { %3067 = vmatpush1.bf16.msra.mxu0 %v4969_v34  ;;  %3110 = vmatpush1.bf16.msra.mxu1 %v4973_v39  ;;  %v7188_v34 = vld [vmem:[#allocation43_spill] sm:$0xff]  ;;  %v7189_v39 = vld [vmem:[#allocation44_spill] sm:$0xff] }
 0x25c   :  { %3068 = vmatprep.subr.bf16.mxu0 %v4975_v40  ;;  %3111 = vmatprep.subr.bf16.mxu1 %v7159_v20  ;;  %v7190_v40 = vld [vmem:[#allocation45_spill] sm:$0xff]  ;;  %v7197_v20 = vld [vmem:[#allocation52_spill] sm:$0xff] }
 0x25d   :  { %3098 = vmatprep.mubr.bf16.mxu0 %v6785_v63  ;;  %3141 = vmatprep.mubr.bf16.mxu1 %v6785_v63 }
 0x25f   :  { %3069 = vmatpush1.bf16.msra.mxu0 %v7160_v21  ;;  %3112 = vmatpush1.bf16.msra.mxu1 %v7161_v22  ;;  %v7198_v21 = vld [vmem:[#allocation53_spill] sm:$0xff]  ;;  %v7199_v22 = vld [vmem:[#allocation54_spill] sm:$0xff] }
 0x260   :  { %3070 = vmatprep.subr.bf16.mxu0 %v7162_v27  ;;  %3113 = vmatprep.subr.bf16.mxu1 %v7163_v28  ;;  %v7200_v27 = vld [vmem:[#allocation55_spill] sm:$0xff]  ;;  %v7201_v28 = vld [vmem:[#allocation56_spill] sm:$0xff] }
 0x263   :  { %3071 = vmatpush1.bf16.msra.mxu0 %v7164_v29  ;;  %3114 = vmatpush1.bf16.msra.mxu1 %v7165_v30  ;;  %v7202_v29 = vld [vmem:[#allocation57_spill] sm:$0xff]  ;;  %v7203_v30 = vld [vmem:[#allocation58_spill] sm:$0xff] }
 0x264   :  { %3072 = vmatprep.subr.bf16.mxu0 %v7166_v35  ;;  %3115 = vmatprep.subr.bf16.mxu1 %v7167_v36  ;;  %v7204_v35 = vld [vmem:[#allocation59_spill] sm:$0xff]  ;;  %v7205_v36 = vld [vmem:[#allocation60_spill] sm:$0xff] }
 0x267   :  { %3073 = vmatpush1.bf16.msra.mxu0 %v7168_v37  ;;  %3116 = vmatpush1.bf16.msra.mxu1 %v7169_v38  ;;  %v7206_v37 = vld [vmem:[#allocation61_spill] sm:$0xff]  ;;  %v7207_v38 = vld [vmem:[#allocation62_spill] sm:$0xff] }
 0x268   :  { %3074 = vmatprep.subr.bf16.mxu0 %v7170_v43  ;;  %3117 = vmatprep.subr.bf16.mxu1 %v7171_v46  ;;  %v7208_v43 = vld [vmem:[#allocation63_spill] sm:$0xff]  ;;  %v7209_v46 = vld [vmem:[#allocation64_spill] sm:$0xff] }
 0x26b   :  { %3075 = vmatpush1.bf16.msra.mxu0 %v7172_v47  ;;  %3118 = vmatpush1.bf16.msra.mxu1 %v7173_v48  ;;  %v7210_v47 = vld [vmem:[#allocation65_spill] sm:$0xff]  ;;  %v7211_v48 = vld [vmem:[#allocation66_spill] sm:$0xff] }
 0x26c   :  { %3076 = vmatprep.subr.bf16.mxu0 %v7174_v53  ;;  %3119 = vmatprep.subr.bf16.mxu1 %v7175_v54  ;;  %v7212_v53 = vld [vmem:[#allocation67_spill] sm:$0xff]  ;;  %v7213_v54 = vld [vmem:[#allocation68_spill] sm:$0xff] }
 0x26f   :  { %3077 = vmatpush1.bf16.msra.mxu0 %v7176_v55  ;;  %3120 = vmatpush1.bf16.msra.mxu1 %v7177_v56  ;;  %v7214_v55 = vld [vmem:[#allocation69_spill] sm:$0xff]  ;;  %v7215_v56 = vld [vmem:[#allocation70_spill] sm:$0xff] }
 0x270   :  { %3078 = vmatprep.subr.bf16.mxu0 %v7178_v57  ;;  %3121 = vmatprep.subr.bf16.mxu1 %v7179_v1  ;;  %v7216_v57 = vld [vmem:[#allocation71_spill] sm:$0xff]  ;;  %v7217_v1 = vld [vmem:[#allocation72_spill] sm:$0xff] }
 0x273   :  { %3079 = vmatpush1.bf16.msra.mxu0 %v7180_v2  ;;  %3122 = vmatpush1.bf16.msra.mxu1 %v7181_v3  ;;  %v7218_v2 = vld [vmem:[#allocation73_spill] sm:$0xff]  ;;  %v7219_v3 = vld [vmem:[#allocation74_spill] sm:$0xff] }
 0x274   :  { %3080 = vmatprep.subr.bf16.mxu0 %v7182_v5  ;;  %3123 = vmatprep.subr.bf16.mxu1 %v7183_v17  ;;  %v7220_v5 = vld [vmem:[#allocation75_spill] sm:$0xff]  ;;  %v7221_v17 = vld [vmem:[#allocation76_spill] sm:$0xff] }
 0x277   :  { %3081 = vmatpush1.bf16.msra.mxu0 %v7184_v18  ;;  %3124 = vmatpush1.bf16.msra.mxu1 %v7185_v23  ;;  %v7222_v18 = vld [vmem:[#allocation77_spill] sm:$0xff]  ;;  %v7223_v23 = vld [vmem:[#allocation78_spill] sm:$0xff] }
 0x278   :  { %3152 = vmatprep.subr.bf16.mxu0 %v7186_v24  ;;  %3195 = vmatprep.subr.bf16.mxu1 %v7187_v31  ;;  %v7224_v24 = vld [vmem:[#allocation79_spill] sm:$0xff]  ;;  %v7225_v31 = vld [vmem:[#allocation80_spill] sm:$0xff] }
 0x27a   :  { %3099 = vmatmul.mubr.bf16.vlgmr.msra.gmra.mrb[4].mxu0 %v5992_v19  ;;  %3142 = vmatmul.mubr.bf16.vlgmr.msra.gmra.mrb[4].mxu1 %v5992_v19 }
 0x27b   :  { %3153 = vmatpush1.bf16.msra.mxu0 %v7188_v34  ;;  %3196 = vmatpush1.bf16.msra.mxu1 %v7189_v39  ;;  %v7226_v34 = vld [vmem:[#allocation81_spill] sm:$0xff]  ;;  %v7227_v39 = vld [vmem:[#allocation82_spill] sm:$0xff] }
 0x27c   :  { %3154 = vmatprep.subr.bf16.mxu0 %v7190_v40  ;;  %3197 = vmatprep.subr.bf16.mxu1 %v7191_v4  ;;  %v7228_v40 = vld [vmem:[#allocation83_spill] sm:$0xff]  ;;  %v7229_v4 = vld [vmem:[#allocation84_spill] sm:$0xff] }
 0x27d   :  { %3184 = vmatprep.mubr.bf16.mxu0 %v6785_v63  ;;  %3227 = vmatprep.mubr.bf16.mxu1 %v6785_v63 }
 0x27f   :  { %3155 = vmatpush1.bf16.msra.mxu0 %v7192_v6  ;;  %3198 = vmatpush1.bf16.msra.mxu1 %v7193_v9  ;;  %v7230_v6 = vld [vmem:[#allocation85_spill] sm:$0xff]  ;;  %v7231_v9 = vld [vmem:[#allocation86_spill] sm:$0xff] }
 0x280   :  { %3156 = vmatprep.subr.bf16.mxu0 %v7194_v10  ;;  %3199 = vmatprep.subr.bf16.mxu1 %v7195_v11  ;;  %v7232_v10 = vld [vmem:[#allocation87_spill] sm:$0xff]  ;;  %v7233_v11 = vld [vmem:[#allocation88_spill] sm:$0xff] }
 0x283   :  { %3157 = vmatpush1.bf16.msra.mxu0 %v7196_v15  ;;  %3200 = vmatpush1.bf16.msra.mxu1 %v7197_v20  ;;  %v7234_v15 = vld [vmem:[#allocation89_spill] sm:$0xff]  ;;  %v7235_v20 = vld [vmem:[#allocation90_spill] sm:$0xff] }
 0x284   :  { %3158 = vmatprep.subr.bf16.mxu0 %v7198_v21  ;;  %3201 = vmatprep.subr.bf16.mxu1 %v7199_v22  ;;  %v7236_v21 = vld [vmem:[#allocation91_spill] sm:$0xff]  ;;  %v7237_v22 = vld [vmem:[#allocation92_spill] sm:$0xff] }
 0x287   :  { %3159 = vmatpush1.bf16.msra.mxu0 %v7200_v27  ;;  %3202 = vmatpush1.bf16.msra.mxu1 %v7201_v28  ;;  %v7238_v27 = vld [vmem:[#allocation93_spill] sm:$0xff]  ;;  %v7239_v28 = vld [vmem:[#allocation94_spill] sm:$0xff] }
 0x288   :  { %3160 = vmatprep.subr.bf16.mxu0 %v7202_v29  ;;  %3203 = vmatprep.subr.bf16.mxu1 %v7203_v30  ;;  %v7240_v29 = vld [vmem:[#allocation95_spill] sm:$0xff]  ;;  %v7241_v30 = vld [vmem:[#allocation96_spill] sm:$0xff] }
 0x28b   :  { %3161 = vmatpush1.bf16.msra.mxu0 %v7204_v35  ;;  %3204 = vmatpush1.bf16.msra.mxu1 %v7205_v36  ;;  %v7242_v35 = vld [vmem:[#allocation97_spill] sm:$0xff]  ;;  %v7243_v36 = vld [vmem:[#allocation98_spill] sm:$0xff] }
 0x28c   :  { %3162 = vmatprep.subr.bf16.mxu0 %v7206_v37  ;;  %3205 = vmatprep.subr.bf16.mxu1 %v7207_v38  ;;  %v7244_v37 = vld [vmem:[#allocation99_spill] sm:$0xff]  ;;  %v7245_v38 = vld [vmem:[#allocation100_spill] sm:$0xff] }
 0x28f   :  { %3163 = vmatpush1.bf16.msra.mxu0 %v7208_v43  ;;  %3206 = vmatpush1.bf16.msra.mxu1 %v7209_v46  ;;  %v7246_v43 = vld [vmem:[#allocation101_spill] sm:$0xff]  ;;  %v7247_v46 = vld [vmem:[#allocation102_spill] sm:$0xff] }
 0x290   :  { %3164 = vmatprep.subr.bf16.mxu0 %v7210_v47  ;;  %3207 = vmatprep.subr.bf16.mxu1 %v7211_v48  ;;  %v7248_v47 = vld [vmem:[#allocation103_spill] sm:$0xff]  ;;  %v7249_v48 = vld [vmem:[#allocation104_spill] sm:$0xff] }
 0x293   :  { %3165 = vmatpush1.bf16.msra.mxu0 %v7212_v53  ;;  %3208 = vmatpush1.bf16.msra.mxu1 %v7213_v54  ;;  %v7250_v53 = vld [vmem:[#allocation105_spill] sm:$0xff]  ;;  %v7251_v54 = vld [vmem:[#allocation106_spill] sm:$0xff] }
 0x294   :  { %3166 = vmatprep.subr.bf16.mxu0 %v7214_v55  ;;  %3209 = vmatprep.subr.bf16.mxu1 %v7215_v56  ;;  %v7252_v55 = vld [vmem:[#allocation107_spill] sm:$0xff]  ;;  %v7253_v56 = vld [vmem:[#allocation108_spill] sm:$0xff] }
 0x297   :  { %3167 = vmatpush1.bf16.msra.mxu0 %v7216_v57  ;;  %3210 = vmatpush1.bf16.msra.mxu1 %v7217_v1  ;;  %v7254_v57 = vld [vmem:[#allocation109_spill] sm:$0xff]  ;;  %v7255_v1 = vld [vmem:[#allocation110_spill] sm:$0xff] }
 0x298   :  { %3238 = vmatprep.subr.bf16.mxu0 %v7218_v2  ;;  %3281 = vmatprep.subr.bf16.mxu1 %v7219_v3  ;;  %v7256_v2 = vld [vmem:[#allocation111_spill] sm:$0xff]  ;;  %v7257_v3 = vld [vmem:[#allocation112_spill] sm:$0xff] }
 0x29a   :  { %3185 = vmatmul.mubr.bf16.vlgmr.msra.gmra.mrb[8].mxu0 %v5992_v19  ;;  %3228 = vmatmul.mubr.bf16.vlgmr.msra.gmra.mrb[8].mxu1 %v5992_v19 }
 0x29b   :  { %3239 = vmatpush1.bf16.msra.mxu0 %v7220_v5  ;;  %3282 = vmatpush1.bf16.msra.mxu1 %v7221_v17  ;;  %v7258_v5 = vld [vmem:[#allocation113_spill] sm:$0xff]  ;;  %v7259_v17 = vld [vmem:[#allocation114_spill] sm:$0xff] }
 0x29c   :  { %3240 = vmatprep.subr.bf16.mxu0 %v7222_v18  ;;  %3283 = vmatprep.subr.bf16.mxu1 %v7223_v23  ;;  %v7260_v18 = vld [vmem:[#allocation115_spill] sm:$0xff]  ;;  %v7261_v23 = vld [vmem:[#allocation116_spill] sm:$0xff] }
 0x29d   :  { %3270 = vmatprep.mubr.bf16.mxu0 %v6785_v63  ;;  %3313 = vmatprep.mubr.bf16.mxu1 %v6785_v63 }
 0x29f   :  { %3241 = vmatpush1.bf16.msra.mxu0 %v7224_v24  ;;  %3284 = vmatpush1.bf16.msra.mxu1 %v7225_v31  ;;  %v7262_v24 = vld [vmem:[#allocation117_spill] sm:$0xff]  ;;  %v7263_v31 = vld [vmem:[#allocation118_spill] sm:$0xff] }
 0x2a0   :  { %3242 = vmatprep.subr.bf16.mxu0 %v7226_v34  ;;  %3285 = vmatprep.subr.bf16.mxu1 %v7227_v39  ;;  %v7264_v34 = vld [vmem:[#allocation119_spill] sm:$0xff]  ;;  %v7265_v39 = vld [vmem:[#allocation120_spill] sm:$0xff] }
 0x2a3   :  { %3243 = vmatpush1.bf16.msra.mxu0 %v7228_v40  ;;  %3286 = vmatpush1.bf16.msra.mxu1 %v7229_v4  ;;  %v7266_v40 = vld [vmem:[#allocation121_spill] sm:$0xff]  ;;  %v7267_v4 = vld [vmem:[#allocation122_spill] sm:$0xff] }
 0x2a4   :  { %3244 = vmatprep.subr.bf16.mxu0 %v7230_v6  ;;  %3287 = vmatprep.subr.bf16.mxu1 %v7231_v9  ;;  %v7268_v6 = vld [vmem:[#allocation123_spill] sm:$0xff]  ;;  %v7269_v9 = vld [vmem:[#allocation124_spill] sm:$0xff] }
 0x2a7   :  { %3245 = vmatpush1.bf16.msra.mxu0 %v7232_v10  ;;  %3288 = vmatpush1.bf16.msra.mxu1 %v7233_v11  ;;  %v7270_v10 = vld [vmem:[#allocation125_spill] sm:$0xff]  ;;  %v7271_v11 = vld [vmem:[#allocation126_spill] sm:$0xff] }
 0x2a8   :  { %3246 = vmatprep.subr.bf16.mxu0 %v7234_v15  ;;  %3289 = vmatprep.subr.bf16.mxu1 %v7235_v20  ;;  %v7272_v15 = vld [vmem:[#allocation127_spill] sm:$0xff]  ;;  %v7273_v20 = vld [vmem:[#allocation128_spill] sm:$0xff] }
 0x2ab   :  { %3247 = vmatpush1.bf16.msra.mxu0 %v7236_v21  ;;  %3290 = vmatpush1.bf16.msra.mxu1 %v7237_v22  ;;  %v7274_v21 = vld [vmem:[#allocation129_spill] sm:$0xff]  ;;  %v7275_v22 = vld [vmem:[#allocation130_spill] sm:$0xff] }
 0x2ac   :  { %3248 = vmatprep.subr.bf16.mxu0 %v7238_v27  ;;  %3291 = vmatprep.subr.bf16.mxu1 %v7239_v28  ;;  %v7276_v27 = vld [vmem:[#allocation131_spill] sm:$0xff]  ;;  %v7277_v28 = vld [vmem:[#allocation132_spill] sm:$0xff] }
 0x2af   :  { %3249 = vmatpush1.bf16.msra.mxu0 %v7240_v29  ;;  %3292 = vmatpush1.bf16.msra.mxu1 %v7241_v30  ;;  %v7278_v29 = vld [vmem:[#allocation133_spill] sm:$0xff]  ;;  %v7279_v30 = vld [vmem:[#allocation134_spill] sm:$0xff] }
 0x2b0   :  { %3250 = vmatprep.subr.bf16.mxu0 %v7242_v35  ;;  %3293 = vmatprep.subr.bf16.mxu1 %v7243_v36  ;;  %v7280_v35 = vld [vmem:[#allocation135_spill] sm:$0xff]  ;;  %v7281_v36 = vld [vmem:[#allocation136_spill] sm:$0xff] }
 0x2b3   :  { %3251 = vmatpush1.bf16.msra.mxu0 %v7244_v37  ;;  %3294 = vmatpush1.bf16.msra.mxu1 %v7245_v38  ;;  %v7282_v37 = vld [vmem:[#allocation137_spill] sm:$0xff]  ;;  %v7283_v38 = vld [vmem:[#allocation138_spill] sm:$0xff] }
 0x2b4   :  { %3252 = vmatprep.subr.bf16.mxu0 %v7246_v43  ;;  %3295 = vmatprep.subr.bf16.mxu1 %v7247_v46  ;;  %v7284_v43 = vld [vmem:[#allocation139_spill] sm:$0xff]  ;;  %v7285_v46 = vld [vmem:[#allocation140_spill] sm:$0xff] }
 0x2b7   :  { %3253 = vmatpush1.bf16.msra.mxu0 %v7248_v47  ;;  %3296 = vmatpush1.bf16.msra.mxu1 %v7249_v48  ;;  %v7286_v47 = vld [vmem:[#allocation141_spill] sm:$0xff]  ;;  %v7287_v48 = vld [vmem:[#allocation142_spill] sm:$0xff] }
 0x2b8   :  { %3324 = vmatprep.subr.bf16.mxu0 %v7250_v53  ;;  %3367 = vmatprep.subr.bf16.mxu1 %v7251_v54  ;;  %v7288_v53 = vld [vmem:[#allocation143_spill] sm:$0xff]  ;;  %v7289_v54 = vld [vmem:[#allocation144_spill] sm:$0xff] }
 0x2ba   :  { %3271 = vmatmul.mubr.bf16.vlgmr.msra.gmra.mrb[12].mxu0 %v5992_v19  ;;  %3314 = vmatmul.mubr.bf16.vlgmr.msra.gmra.mrb[12].mxu1 %v5992_v19 }
 0x2bb   :  { %3325 = vmatpush1.bf16.msra.mxu0 %v7252_v55  ;;  %3368 = vmatpush1.bf16.msra.mxu1 %v7253_v56  ;;  %v7290_v55 = vld [vmem:[#allocation145_spill] sm:$0xff]  ;;  %v7291_v56 = vld [vmem:[#allocation146_spill] sm:$0xff] }
 0x2bc   :  { %3326 = vmatprep.subr.bf16.mxu0 %v7254_v57  ;;  %3369 = vmatprep.subr.bf16.mxu1 %v7255_v1  ;;  %v7292_v57 = vld [vmem:[#allocation147_spill] sm:$0xff]  ;;  %v7293_v1 = vld [vmem:[#allocation148_spill] sm:$0xff] }
 0x2bd   :  { %3356 = vmatprep.mubr.bf16.mxu0 %v6785_v63  ;;  %3399 = vmatprep.mubr.bf16.mxu1 %v6785_v63 }
 0x2bf   :  { %3327 = vmatpush1.bf16.msra.mxu0 %v7256_v2  ;;  %3370 = vmatpush1.bf16.msra.mxu1 %v7257_v3  ;;  %v7294_v2 = vld [vmem:[#allocation149_spill] sm:$0xff]  ;;  %v7295_v3 = vld [vmem:[#allocation150_spill] sm:$0xff] }
 0x2c0   :  { %3328 = vmatprep.subr.bf16.mxu0 %v7258_v5  ;;  %3371 = vmatprep.subr.bf16.mxu1 %v7259_v17  ;;  %v7296_v5 = vld [vmem:[#allocation151_spill] sm:$0xff]  ;;  %v7297_v17 = vld [vmem:[#allocation152_spill] sm:$0xff] }
 0x2c3   :  { %3329 = vmatpush1.bf16.msra.mxu0 %v7260_v18  ;;  %3372 = vmatpush1.bf16.msra.mxu1 %v7261_v23  ;;  %v7298_v18 = vld [vmem:[#allocation153_spill] sm:$0xff]  ;;  %v7299_v23 = vld [vmem:[#allocation154_spill] sm:$0xff] }
 0x2c4   :  { %3330 = vmatprep.subr.bf16.mxu0 %v7262_v24  ;;  %3373 = vmatprep.subr.bf16.mxu1 %v7263_v31  ;;  %v7300_v24 = vld [vmem:[#allocation155_spill] sm:$0xff]  ;;  %v7301_v31 = vld [vmem:[#allocation156_spill] sm:$0xff] }
 0x2c7   :  { %3331 = vmatpush1.bf16.msra.mxu0 %v7264_v34  ;;  %3374 = vmatpush1.bf16.msra.mxu1 %v7265_v39  ;;  %v7302_v34 = vld [vmem:[#allocation157_spill] sm:$0xff]  ;;  %v7303_v39 = vld [vmem:[#allocation158_spill] sm:$0xff] }
 0x2c8   :  { %3332 = vmatprep.subr.bf16.mxu0 %v7266_v40  ;;  %3375 = vmatprep.subr.bf16.mxu1 %v7267_v4  ;;  %v7304_v40 = vld [vmem:[#allocation159_spill] sm:$0xff]  ;;  %v7305_v4 = vld [vmem:[#allocation160_spill] sm:$0xff] }
 0x2cb   :  { %3333 = vmatpush1.bf16.msra.mxu0 %v7268_v6  ;;  %3376 = vmatpush1.bf16.msra.mxu1 %v7269_v9  ;;  %v7306_v6 = vld [vmem:[#allocation161_spill] sm:$0xff]  ;;  %v7307_v9 = vld [vmem:[#allocation162_spill] sm:$0xff] }
 0x2cc   :  { %3334 = vmatprep.subr.bf16.mxu0 %v7270_v10  ;;  %3377 = vmatprep.subr.bf16.mxu1 %v7271_v11  ;;  %v7308_v10 = vld [vmem:[#allocation163_spill] sm:$0xff]  ;;  %v7309_v11 = vld [vmem:[#allocation164_spill] sm:$0xff] }
 0x2cf   :  { %3335 = vmatpush1.bf16.msra.mxu0 %v7272_v15  ;;  %3378 = vmatpush1.bf16.msra.mxu1 %v7273_v20  ;;  %v7310_v15 = vld [vmem:[#allocation165_spill] sm:$0xff]  ;;  %v7311_v20 = vld [vmem:[#allocation166_spill] sm:$0xff] }
 0x2d0   :  { %3336 = vmatprep.subr.bf16.mxu0 %v7274_v21  ;;  %3379 = vmatprep.subr.bf16.mxu1 %v7275_v22  ;;  %v7312_v21 = vld [vmem:[#allocation167_spill] sm:$0xff]  ;;  %v7313_v22 = vld [vmem:[#allocation168_spill] sm:$0xff] }
 0x2d3   :  { %3337 = vmatpush1.bf16.msra.mxu0 %v7276_v27  ;;  %3380 = vmatpush1.bf16.msra.mxu1 %v7277_v28  ;;  %v7314_v27 = vld [vmem:[#allocation169_spill] sm:$0xff]  ;;  %v7315_v28 = vld [vmem:[#allocation170_spill] sm:$0xff] }
 0x2d4   :  { %3338 = vmatprep.subr.bf16.mxu0 %v7278_v29  ;;  %3381 = vmatprep.subr.bf16.mxu1 %v7279_v30  ;;  %v7316_v29 = vld [vmem:[#allocation171_spill] sm:$0xff]  ;;  %v7317_v30 = vld [vmem:[#allocation172_spill] sm:$0xff] }
 0x2d7   :  { %3339 = vmatpush1.bf16.msra.mxu0 %v7280_v35  ;;  %3382 = vmatpush1.bf16.msra.mxu1 %v7281_v36  ;;  %v7318_v35 = vld [vmem:[#allocation173_spill] sm:$0xff]  ;;  %v7319_v36 = vld [vmem:[#allocation174_spill] sm:$0xff] }
 0x2d8   :  { %3410 = vmatprep.subr.bf16.mxu0 %v7282_v37  ;;  %3453 = vmatprep.subr.bf16.mxu1 %v7283_v38  ;;  %v7320_v37 = vld [vmem:[#allocation175_spill] sm:$0xff]  ;;  %v7321_v38 = vld [vmem:[#allocation176_spill] sm:$0xff] }
 0x2da   :  { %3357 = vmatmul.mubr.bf16.vlgmr.msra.gmra.mrb[16].mxu0 %v5992_v19  ;;  %3400 = vmatmul.mubr.bf16.vlgmr.msra.gmra.mrb[16].mxu1 %v5992_v19 }
 0x2db   :  { %3411 = vmatpush1.bf16.msra.mxu0 %v7284_v43  ;;  %3454 = vmatpush1.bf16.msra.mxu1 %v7285_v46  ;;  %v7322_v43 = vld [vmem:[#allocation177_spill] sm:$0xff]  ;;  %v7323_v46 = vld [vmem:[#allocation178_spill] sm:$0xff] }
 0x2dc   :  { %3412 = vmatprep.subr.bf16.mxu0 %v7286_v47  ;;  %3455 = vmatprep.subr.bf16.mxu1 %v7287_v48  ;;  %v7324_v47 = vld [vmem:[#allocation179_spill] sm:$0xff]  ;;  %v7325_v48 = vld [vmem:[#allocation180_spill] sm:$0xff] }
 0x2dd   :  { %3442 = vmatprep.mubr.bf16.mxu0 %v6785_v63  ;;  %3485 = vmatprep.mubr.bf16.mxu1 %v6785_v63 }
 0x2df   :  { %3413 = vmatpush1.bf16.msra.mxu0 %v7288_v53  ;;  %3456 = vmatpush1.bf16.msra.mxu1 %v7289_v54  ;;  %v7326_v53 = vld [vmem:[#allocation181_spill] sm:$0xff]  ;;  %v7327_v54 = vld [vmem:[#allocation182_spill] sm:$0xff] }
 0x2e0   :  { %3414 = vmatprep.subr.bf16.mxu0 %v7290_v55  ;;  %3457 = vmatprep.subr.bf16.mxu1 %v7291_v56  ;;  %v7328_v55 = vld [vmem:[#allocation183_spill] sm:$0xff]  ;;  %v7329_v56 = vld [vmem:[#allocation184_spill] sm:$0xff] }
 0x2e3   :  { %3415 = vmatpush1.bf16.msra.mxu0 %v7292_v57  ;;  %3458 = vmatpush1.bf16.msra.mxu1 %v7293_v1  ;;  %v7330_v57 = vld [vmem:[#allocation185_spill] sm:$0xff]  ;;  %v7331_v1 = vld [vmem:[#allocation186_spill] sm:$0xff] }
 0x2e4   :  { %3416 = vmatprep.subr.bf16.mxu0 %v7294_v2  ;;  %3459 = vmatprep.subr.bf16.mxu1 %v7295_v3  ;;  %v7332_v2 = vld [vmem:[#allocation187_spill] sm:$0xff]  ;;  %v7333_v3 = vld [vmem:[#allocation188_spill] sm:$0xff] }
 0x2e7   :  { %3417 = vmatpush1.bf16.msra.mxu0 %v7296_v5  ;;  %3460 = vmatpush1.bf16.msra.mxu1 %v7297_v17  ;;  %v7334_v5 = vld [vmem:[#allocation189_spill] sm:$0xff]  ;;  %v7335_v17 = vld [vmem:[#allocation190_spill] sm:$0xff] }
 0x2e8   :  { %3418 = vmatprep.subr.bf16.mxu0 %v7298_v18  ;;  %3461 = vmatprep.subr.bf16.mxu1 %v7299_v23  ;;  %v7336_v18 = vld [vmem:[#allocation191_spill] sm:$0xff]  ;;  %v7337_v23 = vld [vmem:[#allocation192_spill] sm:$0xff] }
 0x2eb   :  { %3419 = vmatpush1.bf16.msra.mxu0 %v7300_v24  ;;  %3462 = vmatpush1.bf16.msra.mxu1 %v7301_v31  ;;  %v7338_v24 = vld [vmem:[#allocation193_spill] sm:$0xff]  ;;  %v7339_v31 = vld [vmem:[#allocation194_spill] sm:$0xff] }
 0x2ec   :  { %3420 = vmatprep.subr.bf16.mxu0 %v7302_v34  ;;  %3463 = vmatprep.subr.bf16.mxu1 %v7303_v39  ;;  %v7340_v34 = vld [vmem:[#allocation195_spill] sm:$0xff]  ;;  %v7341_v39 = vld [vmem:[#allocation196_spill] sm:$0xff] }
 0x2ef   :  { %3421 = vmatpush1.bf16.msra.mxu0 %v7304_v40  ;;  %3464 = vmatpush1.bf16.msra.mxu1 %v7305_v4  ;;  %v7342_v40 = vld [vmem:[#allocation197_spill] sm:$0xff]  ;;  %v7343_v4 = vld [vmem:[#allocation198_spill] sm:$0xff] }
 0x2f0   :  { %3422 = vmatprep.subr.bf16.mxu0 %v7306_v6  ;;  %3465 = vmatprep.subr.bf16.mxu1 %v7307_v9  ;;  %v7344_v6 = vld [vmem:[#allocation199_spill] sm:$0xff]  ;;  %v7345_v9 = vld [vmem:[#allocation200_spill] sm:$0xff] }
 0x2f3   :  { %3423 = vmatpush1.bf16.msra.mxu0 %v7308_v10  ;;  %3466 = vmatpush1.bf16.msra.mxu1 %v7309_v11  ;;  %v7346_v10 = vld [vmem:[#allocation201_spill] sm:$0xff]  ;;  %v7347_v11 = vld [vmem:[#allocation202_spill] sm:$0xff] }
 0x2f4   :  { %3424 = vmatprep.subr.bf16.mxu0 %v7310_v15  ;;  %3467 = vmatprep.subr.bf16.mxu1 %v7311_v20  ;;  %v7348_v15 = vld [vmem:[#allocation203_spill] sm:$0xff]  ;;  %v7349_v20 = vld [vmem:[#allocation204_spill] sm:$0xff] }
 0x2f7   :  { %3425 = vmatpush1.bf16.msra.mxu0 %v7312_v21  ;;  %3468 = vmatpush1.bf16.msra.mxu1 %v7313_v22  ;;  %v7350_v21 = vld [vmem:[#allocation205_spill] sm:$0xff]  ;;  %v7351_v22 = vld [vmem:[#allocation206_spill] sm:$0xff] }
 0x2f8   :  { %3496 = vmatprep.subr.bf16.mxu0 %v7314_v27  ;;  %3539 = vmatprep.subr.bf16.mxu1 %v7315_v28  ;;  %v3740_v27 = vlaneseq  ;;  %v7352_v28 = vld [vmem:[#allocation207_spill] sm:$0xff] }
 0x2fa   :  { %3443 = vmatmul.mubr.bf16.vlgmr.msra.gmra.mrb[20].mxu0 %v5992_v19  ;;  %3486 = vmatmul.mubr.bf16.vlgmr.msra.gmra.mrb[20].mxu1 %v5992_v19 }
 0x2fb   :  { %3497 = vmatpush1.bf16.msra.mxu0 %v7316_v29  ;;  %3540 = vmatpush1.bf16.msra.mxu1 %v7317_v30  ;;  %v6226_v29 = vshrl.u32 %v3740_v27, 7  ;;  %v7353_v30 = vld [vmem:[#allocation211_spill] sm:$0xff] }
 0x2fc   :  { %3498 = vmatprep.subr.bf16.mxu0 %v7318_v35  ;;  %3541 = vmatprep.subr.bf16.mxu1 %v7319_v36 }
 0x2fd   :  { %3528 = vmatprep.mubr.bf16.mxu0 %v6785_v63  ;;  %3571 = vmatprep.mubr.bf16.mxu1 %v6785_v63 }
 0x2ff   :  { %3499 = vmatpush1.bf16.msra.mxu0 %v7320_v37  ;;  %3542 = vmatpush1.bf16.msra.mxu1 %v7321_v38 }
 0x300   :  { %3500 = vmatprep.subr.bf16.mxu0 %v7322_v43  ;;  %3543 = vmatprep.subr.bf16.mxu1 %v7323_v46 }
 0x303   :  { %3501 = vmatpush1.bf16.msra.mxu0 %v7324_v47  ;;  %3544 = vmatpush1.bf16.msra.mxu1 %v7325_v48 }
 0x304   :  { %3502 = vmatprep.subr.bf16.mxu0 %v7326_v53  ;;  %3545 = vmatprep.subr.bf16.mxu1 %v7327_v54 }
 0x307   :  { %3503 = vmatpush1.bf16.msra.mxu0 %v7328_v55  ;;  %3546 = vmatpush1.bf16.msra.mxu1 %v7329_v56 }
 0x308   :  { %3504 = vmatprep.subr.bf16.mxu0 %v7330_v57  ;;  %3547 = vmatprep.subr.bf16.mxu1 %v7331_v1 }
 0x30b   :  { %3505 = vmatpush1.bf16.msra.mxu0 %v7332_v2  ;;  %3548 = vmatpush1.bf16.msra.mxu1 %v7333_v3 }
 0x30c   :  { %3506 = vmatprep.subr.bf16.mxu0 %v7334_v5  ;;  %3549 = vmatprep.subr.bf16.mxu1 %v7335_v17  ;;  %v6281_v17 = vsub.s32 5, %v6226_v29 }
 0x30f   :  { %3507 = vmatpush1.bf16.msra.mxu0 %v7336_v18  ;;  %3550 = vmatpush1.bf16.msra.mxu1 %v7337_v23  ;;  %v6284_v18 = vsub.s32 7, %v6226_v29 }
 0x310   :  { %3508 = vmatprep.subr.bf16.mxu0 %v7338_v24  ;;  %3551 = vmatprep.subr.bf16.mxu1 %v7339_v31 }
 0x313   :  { %3509 = vmatpush1.bf16.msra.mxu0 %v7340_v34  ;;  %3552 = vmatpush1.bf16.msra.mxu1 %v7341_v39 }
 0x314   :  { %3510 = vmatprep.subr.bf16.mxu0 %v7342_v40  ;;  %3553 = vmatprep.subr.bf16.mxu1 %v7343_v4 }
 0x317   :  { %3511 = vmatpush1.bf16.msra.mxu0 %v7344_v6  ;;  %3554 = vmatpush1.bf16.msra.mxu1 %v7345_v9 }
 0x318   :  { %3582 = vmatprep.subr.bf16.mxu0 %v7346_v10  ;;  %3625 = vmatprep.subr.bf16.mxu1 %v7347_v11 }
 0x31a   :  { %3529 = vmatmul.mubr.bf16.vlgmr.msra.gmra.mrb[24].mxu0 %v5992_v19  ;;  %3572 = vmatmul.mubr.bf16.vlgmr.msra.gmra.mrb[24].mxu1 %v5992_v19 }
 0x31b   :  { %3583 = vmatpush1.bf16.msra.mxu0 %v7348_v15  ;;  %3626 = vmatpush1.bf16.msra.mxu1 %v7349_v20 }
 0x31c   :  { %3584 = vmatprep.subr.bf16.mxu0 %v7350_v21  ;;  %3627 = vmatprep.subr.bf16.mxu1 %v7351_v22 }
 0x31d   :  { %3614 = vmatprep.mubr.bf16.mxu0 %v6785_v63  ;;  %3657 = vmatprep.mubr.bf16.mxu1 %v6785_v63  ;;  %v6233_v63 = vsub.s32 0, %v6226_v29 }
 0x31f   :  { %3585 = vmatpush1.bf16.msra.mxu0 %v7352_v28  ;;  %3628 = vmatpush1.bf16.msra.mxu1 %v7145_v51  ;;  %v6236_v51 = vld [vmem:[#allocation7] sm:$0xff] }
 0x320   :  { %3586 = vmatprep.subr.bf16.mxu0 %v7146_v60  ;;  %3629 = vmatprep.subr.bf16.mxu1 %v7147_v52  ;;  %v6239_v60 = vsub.s32 2, %v6226_v29  ;;  %v6242_v52 = vsub.s32 1, %v6226_v29  ;;  %v3763_v31 = vrot.slane %v6236_v51, %v6281_v17  ;;  %v3771_v34 = vrot.slane %v6236_v51, %v6284_v18 }
 0x323   :  { %3587 = vmatpush1.bf16.msra.mxu0 %v7353_v30  ;;  %3630 = vmatpush1.bf16.msra.mxu1 %v7149_v44  ;;  %v3747_v44 = vrot.slane %v6236_v51, %v6242_v52 }
 0x324   :  { %3588 = vmatprep.subr.bf16.mxu0 %v7150_v8  ;;  %3631 = vmatprep.subr.bf16.mxu1 %v7151_v14  ;;  %v6247_v8 = vsub.s32 3, %v6226_v29  ;;  %v3751_v14 = vrot.slane %v6236_v51, %v6239_v60 }
 0x327   :  { %3589 = vmatpush1.bf16.msra.mxu0 %v7152_v50  ;;  %3632 = vmatpush1.bf16.msra.mxu1 %v7153_v41  ;;  %v3743_v50 = vrot.slane %v6236_v51, %v6233_v63  ;;  %v3755_v41 = vrot.slane %v6236_v51, %v6247_v8 }
 0x328   :  { %3590 = vmatprep.subr.bf16.mxu0 %v7154_v26  ;;  %3633 = vmatprep.subr.bf16.mxu1 %v7155_v13 }
 0x32b   :  { %3591 = vmatpush1.bf16.msra.mxu0 %v5621_v12  ;;  %3634 = vmatpush1.bf16.msra.mxu1 %v5625_v7 }
 0x32c   :  { %3592 = vmatprep.subr.bf16.mxu0 %v5627_v58  ;;  %3635 = vmatprep.subr.bf16.mxu1 %v7156_v32 }
 0x32d   :  { %v3014_v26 = vpop.f32.mrb[0].mxu0  ;;  %v3057_v35 = vpop.f32.mrb[0].mxu1 }
 0x32e   :  { %v3900_v13 = vmul.f32 %v3743_v50, %v3014_v26  ;;  %v3016_v36 = vpop.f32.mrb[1].mxu0  ;;  %v3902_v12 = vmul.f32 %v3751_v14, %v3057_v35  ;;  %v3059_v38 = vpop.f32.mrb[1].mxu1 }
 0x32f   :  { %v3901_v37 = vmul.f32 %v3747_v44, %v3016_v36  ;;  %v3018_v43 = vpop.f32.mrb[2].mxu0  ;;  %3593 = vmatpush1.bf16.msra.mxu0 %v5633_v45  ;;  %v3903_v47 = vmul.f32 %v3755_v41, %v3059_v38  ;;  %v3061_v48 = vpop.f32.mrb[2].mxu1  ;;  %3636 = vmatpush1.bf16.msra.mxu1 %v5637_v16 }
 0x330   :  { %v3964_v46 = vmul.f32 1.442695, %v3900_v13  ;;  %v3932_v7 = vmul.f32 %v3743_v50, %v3018_v43  ;;  %v3020_v53 = vpop.f32.mrb[3].mxu0  ;;  %3594 = vmatprep.subr.bf16.mxu0 %v5639_v42  ;;  %v3968_v58 = vmul.f32 1.442695, %v3902_v12  ;;  %v3934_v54 = vmul.f32 %v3751_v14, %v3061_v48  ;;  %v3063_v56 = vpop.f32.mrb[3].mxu1  ;;  %3637 = vmatprep.subr.bf16.mxu1 %v5642_v0 }
 0x331   :  { %v3966_v32 = vmul.f32 1.442695, %v3901_v37  ;;  %v3933_v55 = vmul.f32 %v3747_v44, %v3020_v53  ;;  %v3970_v57 = vmul.f32 1.442695, %v3903_v47  ;;  %v3935_v45 = vmul.f32 %v3755_v41, %v3063_v56  ;;  %v3733_v53 = vld [vmem:[#allocation7 + $0x8] sm:$0xff] }
 0x332   :  { %4568 = vpow2.f32 %v3964_v46  ;;  %v4028_v1 = vmul.f32 1.442695, %v3932_v7  ;;  %v4032_v2 = vmul.f32 1.442695, %v3934_v54  ;;  %v3779_v54 = vrot.slane %v3733_v53, %v6242_v52 }
 0x333   :  { %4570 = vpow2.f32 %v3968_v58  ;;  %3595 = vmatpush1.bf16.msra.mxu0 %v5645_v59  ;;  %v4030_v16 = vmul.f32 1.442695, %v3933_v55  ;;  %3638 = vmatpush1.bf16.msra.mxu1 %v5649_v25  ;;  %v4034_v42 = vmul.f32 1.442695, %v3935_v45  ;;  %v3775_v58 = vrot.slane %v3733_v53, %v6233_v63 }
 0x334   :  { %4572 = vpow2.f32 %v3966_v32  ;;  %3596 = vmatprep.subr.bf16.mxu0 %v5651_v61  ;;  %3639 = vmatprep.subr.bf16.mxu1 %v5654_v49  ;;  %v3783_v32 = vrot.slane %v3733_v53, %v6239_v60  ;;  %v3787_v55 = vrot.slane %v3733_v53, %v6247_v8 }
 0x335   :  { %4574 = vpow2.f32 %v3970_v57 }
 0x336   :  { %4576 = vpow2.f32 %v4028_v1 }
 0x337   :  { %4578 = vpow2.f32 %v4032_v2  ;;  %3597 = vmatpush1.bf16.msra.mxu0 %v5657_v62  ;;  %3640 = vmatpush1.bf16.msra.mxu1 %v5661_v33  ;;  %v6275_v33 = vsub.s32 4, %v6226_v29 }
 0x338   :  { %4580 = vpow2.f32 %v4030_v16 }
 0x339   :  { %4582 = vpow2.f32 %v4034_v42  ;;  %v3759_v23 = vrot.slane %v6236_v51, %v6275_v33 }
 0x33a   :  { %3615 = vmatmul.mubr.bf16.vlgmr.msra.gmra.mrb[28].mxu0 %v5992_v19  ;;  %3658 = vmatmul.mubr.bf16.vlgmr.msra.gmra.mrb[28].mxu1 %v5992_v19  ;;  %v6278_v19 = vsub.s32 6, %v6226_v29 }
 0x33c   :  { %v4569_v0 = vpop.eup %4568  ;;  %v3767_v24 = vrot.slane %v6236_v51, %v6278_v19 }
 0x33d   :  { %v4571_v59 = vpop.eup %4570  ;;  %4092 = vst [vmem:[#allocation8] sm:$0xff] %v4569_v0 }
 0x33e   :  { %v4573_v25 = vpop.eup %4572  ;;  %4094 = vst [vmem:[#allocation8 + $0x10] sm:$0xff] %v4571_v59 }
 0x33f   :  { %v4575_v61 = vpop.eup %4574  ;;  %4093 = vst [vmem:[#allocation8 + $0x8] sm:$0xff] %v4573_v25 }
 0x340   :  { %v4577_v49 = vpop.eup %4576  ;;  %4095 = vst [vmem:[#allocation8 + $0x18] sm:$0xff] %v4575_v61 }
 0x341   :  { %v4579_v3 = vpop.eup %4578  ;;  %4124 = vst [vmem:[#allocation8 + $0x100] sm:$0xff] %v4577_v49 }
 0x342   :  { %v4581_v62 = vpop.eup %4580  ;;  %4126 = vst [vmem:[#allocation8 + $0x110] sm:$0xff] %v4579_v3 }
 0x343   :  { %v4583_v5 = vpop.eup %4582  ;;  %4125 = vst [vmem:[#allocation8 + $0x108] sm:$0xff] %v4581_v62 }
 0x344   :  { %4127 = vst [vmem:[#allocation8 + $0x118] sm:$0xff] %v4583_v5 }
 0x34d   :  { %v3100_v39 = vpop.f32.mrb[4].mxu0  ;;  %v3143_v4 = vpop.f32.mrb[4].mxu1 }
 0x34e   :  { %v3904_v40 = vmul.f32 %v3759_v23, %v3100_v39  ;;  %v3102_v6 = vpop.f32.mrb[5].mxu0  ;;  %v3906_v9 = vmul.f32 %v3767_v24, %v3143_v4  ;;  %v3145_v11 = vpop.f32.mrb[5].mxu1 }
 0x34f   :  { %v3905_v10 = vmul.f32 %v3763_v31, %v3102_v6  ;;  %v3104_v15 = vpop.f32.mrb[6].mxu0  ;;  %v3907_v21 = vmul.f32 %v3771_v34, %v3145_v11  ;;  %v3147_v27 = vpop.f32.mrb[6].mxu1 }
 0x350   :  { %v3972_v20 = vmul.f32 1.442695, %v3904_v40  ;;  %v3936_v22 = vmul.f32 %v3759_v23, %v3104_v15  ;;  %v3106_v28 = vpop.f32.mrb[7].mxu0  ;;  %v3976_v29 = vmul.f32 1.442695, %v3906_v9  ;;  %v3938_v50 = vmul.f32 %v3767_v24, %v3147_v27  ;;  %v3149_v44 = vpop.f32.mrb[7].mxu1 }
 0x351   :  { %v3974_v30 = vmul.f32 1.442695, %v3905_v10  ;;  %v3937_v14 = vmul.f32 %v3763_v31, %v3106_v28  ;;  %v3978_v51 = vmul.f32 1.442695, %v3907_v21  ;;  %v3939_v26 = vmul.f32 %v3771_v34, %v3149_v44 }
 0x352   :  { %4584 = vpow2.f32 %v3972_v20  ;;  %v4036_v41 = vmul.f32 1.442695, %v3936_v22  ;;  %v4040_v13 = vmul.f32 1.442695, %v3938_v50  ;;  %v3795_v50 = vrot.slane %v3733_v53, %v6281_v17 }
 0x353   :  { %4586 = vpow2.f32 %v3976_v29  ;;  %v4038_v35 = vmul.f32 1.442695, %v3937_v14  ;;  %v4042_v36 = vmul.f32 1.442695, %v3939_v26  ;;  %v3791_v29 = vrot.slane %v3733_v53, %v6275_v33 }
 0x354   :  { %4588 = vpow2.f32 %v3974_v30  ;;  %v3799_v30 = vrot.slane %v3733_v53, %v6278_v19  ;;  %v3803_v14 = vrot.slane %v3733_v53, %v6284_v18 }
 0x355   :  { %4590 = vpow2.f32 %v3978_v51 }
 0x356   :  { %4592 = vpow2.f32 %v4036_v41 }
 0x357   :  { %4594 = vpow2.f32 %v4040_v13 }
 0x358   :  { %4596 = vpow2.f32 %v4038_v35 }
 0x359   :  { %4598 = vpow2.f32 %v4042_v36 }
 0x35c   :  { %v4585_v12 = vpop.eup %4584 }
 0x35d   :  { %v4587_v37 = vpop.eup %4586  ;;  %4096 = vst [vmem:[#allocation8 + $0x20] sm:$0xff] %v4585_v12 }
 0x35e   :  { %v4589_v38 = vpop.eup %4588  ;;  %4098 = vst [vmem:[#allocation8 + $0x30] sm:$0xff] %v4587_v37 }
 0x35f   :  { %v4591_v43 = vpop.eup %4590  ;;  %4097 = vst [vmem:[#allocation8 + $0x28] sm:$0xff] %v4589_v38 }
 0x360   :  { %v4593_v46 = vpop.eup %4592  ;;  %4099 = vst [vmem:[#allocation8 + $0x38] sm:$0xff] %v4591_v43 }
 0x361   :  { %v4595_v47 = vpop.eup %4594  ;;  %4128 = vst [vmem:[#allocation8 + $0x120] sm:$0xff] %v4593_v46 }
 0x362   :  { %v4597_v7 = vpop.eup %4596  ;;  %4130 = vst [vmem:[#allocation8 + $0x130] sm:$0xff] %v4595_v47 }
 0x363   :  { %v4599_v48 = vpop.eup %4598  ;;  %4129 = vst [vmem:[#allocation8 + $0x128] sm:$0xff] %v4597_v7 }
 0x364   :  { %4131 = vst [vmem:[#allocation8 + $0x138] sm:$0xff] %v4599_v48 }
 0x36d   :  { %v3186_v56 = vpop.f32.mrb[8].mxu0  ;;  %v3229_v1 = vpop.f32.mrb[8].mxu1 }
 0x36e   :  { %v3908_v57 = vmul.f32 %v3775_v58, %v3186_v56  ;;  %v3188_v45 = vpop.f32.mrb[9].mxu0  ;;  %v3910_v2 = vmul.f32 %v3783_v32, %v3229_v1  ;;  %v3231_v42 = vpop.f32.mrb[9].mxu1 }
 0x36f   :  { %v3909_v16 = vmul.f32 %v3779_v54, %v3188_v45  ;;  %v3190_v0 = vpop.f32.mrb[10].mxu0  ;;  %v3911_v25 = vmul.f32 %v3787_v55, %v3231_v42  ;;  %v3233_v49 = vpop.f32.mrb[10].mxu1 }
 0x370   :  { %v3980_v59 = vmul.f32 1.442695, %v3908_v57  ;;  %v3940_v61 = vmul.f32 %v3775_v58, %v3190_v0  ;;  %v3192_v3 = vpop.f32.mrb[11].mxu0  ;;  %v3984_v62 = vmul.f32 1.442695, %v3910_v2  ;;  %v3942_v23 = vmul.f32 %v3783_v32, %v3233_v49  ;;  %v3235_v31 = vpop.f32.mrb[11].mxu1 }
 0x371   :  { %v3982_v5 = vmul.f32 1.442695, %v3909_v16  ;;  %v3941_v24 = vmul.f32 %v3779_v54, %v3192_v3  ;;  %v3986_v34 = vmul.f32 1.442695, %v3911_v25  ;;  %v3943_v40 = vmul.f32 %v3787_v55, %v3235_v31  ;;  %v3734_v3 = vld [vmem:[#allocation7 + $0x10] sm:$0xff] }
 0x372   :  { %4600 = vpow2.f32 %v3980_v59  ;;  %v4044_v39 = vmul.f32 1.442695, %v3940_v61  ;;  %v4048_v4 = vmul.f32 1.442695, %v3942_v23  ;;  %v3811_v23 = vrot.slane %v3734_v3, %v6242_v52 }
 0x373   :  { %4602 = vpow2.f32 %v3984_v62  ;;  %v4046_v6 = vmul.f32 1.442695, %v3941_v24  ;;  %v4050_v9 = vmul.f32 1.442695, %v3943_v40  ;;  %v3807_v62 = vrot.slane %v3734_v3, %v6233_v63 }
 0x374   :  { %4604 = vpow2.f32 %v3982_v5  ;;  %v3815_v5 = vrot.slane %v3734_v3, %v6239_v60  ;;  %v3819_v24 = vrot.slane %v3734_v3, %v6247_v8 }
 0x375   :  { %4606 = vpow2.f32 %v3986_v34 }
 0x376   :  { %4608 = vpow2.f32 %v4044_v39 }
 0x377   :  { %4610 = vpow2.f32 %v4048_v4 }
 0x378   :  { %4612 = vpow2.f32 %v4046_v6 }
 0x379   :  { %4614 = vpow2.f32 %v4050_v9 }
 0x37c   :  { %v4601_v10 = vpop.eup %4600 }
 0x37d   :  { %v4603_v11 = vpop.eup %4602  ;;  %4100 = vst [vmem:[#allocation8 + $0x40] sm:$0xff] %v4601_v10 }
 0x37e   :  { %v4605_v15 = vpop.eup %4604  ;;  %4102 = vst [vmem:[#allocation8 + $0x50] sm:$0xff] %v4603_v11 }
 0x37f   :  { %v4607_v20 = vpop.eup %4606  ;;  %4101 = vst [vmem:[#allocation8 + $0x48] sm:$0xff] %v4605_v15 }
 0x380   :  { %v4609_v21 = vpop.eup %4608  ;;  %4103 = vst [vmem:[#allocation8 + $0x58] sm:$0xff] %v4607_v20 }
 0x381   :  { %v4611_v22 = vpop.eup %4610  ;;  %4132 = vst [vmem:[#allocation8 + $0x140] sm:$0xff] %v4609_v21 }
 0x382   :  { %v4613_v27 = vpop.eup %4612  ;;  %4134 = vst [vmem:[#allocation8 + $0x150] sm:$0xff] %v4611_v22 }
 0x383   :  { %v4615_v28 = vpop.eup %4614  ;;  %4133 = vst [vmem:[#allocation8 + $0x148] sm:$0xff] %v4613_v27 }
 0x384   :  { %4135 = vst [vmem:[#allocation8 + $0x158] sm:$0xff] %v4615_v28 }
 0x38d   :  { %v3272_v44 = vpop.f32.mrb[12].mxu0  ;;  %v3315_v41 = vpop.f32.mrb[12].mxu1 }
 0x38e   :  { %v3912_v51 = vmul.f32 %v3791_v29, %v3272_v44  ;;  %v3274_v26 = vpop.f32.mrb[13].mxu0  ;;  %v3914_v13 = vmul.f32 %v3799_v30, %v3315_v41  ;;  %v3317_v36 = vpop.f32.mrb[13].mxu1 }
 0x38f   :  { %v3913_v35 = vmul.f32 %v3795_v50, %v3274_v26  ;;  %v3276_v12 = vpop.f32.mrb[14].mxu0  ;;  %v3915_v38 = vmul.f32 %v3803_v14, %v3317_v36  ;;  %v3319_v46 = vpop.f32.mrb[14].mxu1 }
 0x390   :  { %v3988_v37 = vmul.f32 1.442695, %v3912_v51  ;;  %v3944_v43 = vmul.f32 %v3791_v29, %v3276_v12  ;;  %v3278_v47 = vpop.f32.mrb[15].mxu0  ;;  %v3992_v7 = vmul.f32 1.442695, %v3914_v13  ;;  %v3946_v58 = vmul.f32 %v3799_v30, %v3319_v46  ;;  %v3321_v54 = vpop.f32.mrb[15].mxu1 }
 0x391   :  { %v3990_v48 = vmul.f32 1.442695, %v3913_v35  ;;  %v3945_v32 = vmul.f32 %v3795_v50, %v3278_v47  ;;  %v3994_v53 = vmul.f32 1.442695, %v3915_v38  ;;  %v3947_v56 = vmul.f32 %v3803_v14, %v3321_v54 }
 0x392   :  { %4616 = vpow2.f32 %v3988_v37  ;;  %v4052_v55 = vmul.f32 1.442695, %v3944_v43  ;;  %v4056_v57 = vmul.f32 1.442695, %v3946_v58  ;;  %v3827_v58 = vrot.slane %v3734_v3, %v6281_v17 }
 0x393   :  { %4618 = vpow2.f32 %v3992_v7  ;;  %v4054_v1 = vmul.f32 1.442695, %v3945_v32  ;;  %v4058_v45 = vmul.f32 1.442695, %v3947_v56  ;;  %v3823_v7 = vrot.slane %v3734_v3, %v6275_v33 }
 0x394   :  { %4620 = vpow2.f32 %v3990_v48  ;;  %v3831_v48 = vrot.slane %v3734_v3, %v6278_v19  ;;  %v3835_v32 = vrot.slane %v3734_v3, %v6284_v18 }
 0x395   :  { %4622 = vpow2.f32 %v3994_v53 }
 0x396   :  { %4624 = vpow2.f32 %v4052_v55 }
 0x397   :  { %4626 = vpow2.f32 %v4056_v57 }
 0x398   :  { %4628 = vpow2.f32 %v4054_v1 }
 0x399   :  { %4630 = vpow2.f32 %v4058_v45 }
 0x39c   :  { %v4617_v2 = vpop.eup %4616 }
 0x39d   :  { %v4619_v16 = vpop.eup %4618  ;;  %4104 = vst [vmem:[#allocation8 + $0x60] sm:$0xff] %v4617_v2 }
 0x39e   :  { %v4621_v42 = vpop.eup %4620  ;;  %4106 = vst [vmem:[#allocation8 + $0x70] sm:$0xff] %v4619_v16 }
 0x39f   :  { %v4623_v0 = vpop.eup %4622  ;;  %4105 = vst [vmem:[#allocation8 + $0x68] sm:$0xff] %v4621_v42 }
 0x3a0   :  { %v4625_v59 = vpop.eup %4624  ;;  %4107 = vst [vmem:[#allocation8 + $0x78] sm:$0xff] %v4623_v0 }
 0x3a1   :  { %v4627_v25 = vpop.eup %4626  ;;  %4136 = vst [vmem:[#allocation8 + $0x160] sm:$0xff] %v4625_v59 }
 0x3a2   :  { %v4629_v61 = vpop.eup %4628  ;;  %4138 = vst [vmem:[#allocation8 + $0x170] sm:$0xff] %v4627_v25 }
 0x3a3   :  { %v4631_v49 = vpop.eup %4630  ;;  %4137 = vst [vmem:[#allocation8 + $0x168] sm:$0xff] %v4629_v61 }
 0x3a4   :  { %4139 = vst [vmem:[#allocation8 + $0x178] sm:$0xff] %v4631_v49 }
 0x3ad   :  { %v3358_v31 = vpop.f32.mrb[16].mxu0  ;;  %v3401_v39 = vpop.f32.mrb[16].mxu1 }
 0x3ae   :  { %v3916_v34 = vmul.f32 %v3807_v62, %v3358_v31  ;;  %v3360_v40 = vpop.f32.mrb[17].mxu0  ;;  %v3918_v4 = vmul.f32 %v3815_v5, %v3401_v39  ;;  %v3403_v9 = vpop.f32.mrb[17].mxu1 }
 0x3af   :  { %v3917_v6 = vmul.f32 %v3811_v23, %v3360_v40  ;;  %v3362_v10 = vpop.f32.mrb[18].mxu0  ;;  %v3919_v15 = vmul.f32 %v3819_v24, %v3403_v9  ;;  %v3405_v21 = vpop.f32.mrb[18].mxu1 }
 0x3b0   :  { %v3996_v11 = vmul.f32 1.442695, %v3916_v34  ;;  %v3948_v20 = vmul.f32 %v3807_v62, %v3362_v10  ;;  %v3364_v22 = vpop.f32.mrb[19].mxu0  ;;  %v4000_v27 = vmul.f32 1.442695, %v3918_v4  ;;  %v3950_v29 = vmul.f32 %v3815_v5, %v3405_v21  ;;  %v3407_v50 = vpop.f32.mrb[19].mxu1 }
 0x3b1   :  { %v3998_v28 = vmul.f32 1.442695, %v3917_v6  ;;  %v3949_v30 = vmul.f32 %v3811_v23, %v3364_v22  ;;  %v4002_v14 = vmul.f32 1.442695, %v3919_v15  ;;  %v3951_v51 = vmul.f32 %v3819_v24, %v3407_v50  ;;  %v3735_v22 = vld [vmem:[#allocation7 + $0x18] sm:$0xff] }
 0x3b2   :  { %4632 = vpow2.f32 %v3996_v11  ;;  %v4060_v44 = vmul.f32 1.442695, %v3948_v20  ;;  %v4064_v41 = vmul.f32 1.442695, %v3950_v29  ;;  %v3843_v29 = vrot.slane %v3735_v22, %v6242_v52 }
 0x3b3   :  { %4634 = vpow2.f32 %v4000_v27  ;;  %v4062_v26 = vmul.f32 1.442695, %v3949_v30  ;;  %v4066_v13 = vmul.f32 1.442695, %v3951_v51  ;;  %v3839_v27 = vrot.slane %v3735_v22, %v6233_v63 }
 0x3b4   :  { %4636 = vpow2.f32 %v3998_v28  ;;  %v3847_v28 = vrot.slane %v3735_v22, %v6239_v60  ;;  %v3851_v30 = vrot.slane %v3735_v22, %v6247_v8 }
 0x3b5   :  { %4638 = vpow2.f32 %v4002_v14 }
 0x3b6   :  { %4640 = vpow2.f32 %v4060_v44 }
 0x3b7   :  { %4642 = vpow2.f32 %v4064_v41 }
 0x3b8   :  { %4644 = vpow2.f32 %v4062_v26 }
 0x3b9   :  { %4646 = vpow2.f32 %v4066_v13 }
 0x3bc   :  { %v4633_v35 = vpop.eup %4632 }
 0x3bd   :  { %v4635_v36 = vpop.eup %4634  ;;  %4108 = vst [vmem:[#allocation8 + $0x80] sm:$0xff] %v4633_v35 }
 0x3be   :  { %v4637_v12 = vpop.eup %4636  ;;  %4110 = vst [vmem:[#allocation8 + $0x90] sm:$0xff] %v4635_v36 }
 0x3bf   :  { %v4639_v37 = vpop.eup %4638  ;;  %4109 = vst [vmem:[#allocation8 + $0x88] sm:$0xff] %v4637_v12 }
 0x3c0   :  { %v4641_v38 = vpop.eup %4640  ;;  %4111 = vst [vmem:[#allocation8 + $0x98] sm:$0xff] %v4639_v37 }
 0x3c1   :  { %v4643_v43 = vpop.eup %4642  ;;  %4140 = vst [vmem:[#allocation8 + $0x180] sm:$0xff] %v4641_v38 }
 0x3c2   :  { %v4645_v46 = vpop.eup %4644  ;;  %4142 = vst [vmem:[#allocation8 + $0x190] sm:$0xff] %v4643_v43 }
 0x3c3   :  { %v4647_v47 = vpop.eup %4646  ;;  %4141 = vst [vmem:[#allocation8 + $0x188] sm:$0xff] %v4645_v46 }
 0x3c4   :  { %4143 = vst [vmem:[#allocation8 + $0x198] sm:$0xff] %v4647_v47 }
 0x3cd   :  { %v3444_v54 = vpop.f32.mrb[20].mxu0  ;;  %v3487_v55 = vpop.f32.mrb[20].mxu1 }
 0x3ce   :  { %v3920_v53 = vmul.f32 %v3823_v7, %v3444_v54  ;;  %v3446_v56 = vpop.f32.mrb[21].mxu0  ;;  %v3922_v57 = vmul.f32 %v3831_v48, %v3487_v55  ;;  %v3489_v45 = vpop.f32.mrb[21].mxu1 }
 0x3cf   :  { %v3921_v1 = vmul.f32 %v3827_v58, %v3446_v56  ;;  %v3448_v2 = vpop.f32.mrb[22].mxu0  ;;  %v3923_v42 = vmul.f32 %v3835_v32, %v3489_v45  ;;  %v3491_v59 = vpop.f32.mrb[22].mxu1 }
 0x3d0   :  { %v4004_v16 = vmul.f32 1.442695, %v3920_v53  ;;  %v3952_v0 = vmul.f32 %v3823_v7, %v3448_v2  ;;  %v3450_v25 = vpop.f32.mrb[23].mxu0  ;;  %v4008_v61 = vmul.f32 1.442695, %v3922_v57  ;;  %v3954_v62 = vmul.f32 %v3831_v48, %v3491_v59  ;;  %v3493_v23 = vpop.f32.mrb[23].mxu1 }
 0x3d1   :  { %v4006_v49 = vmul.f32 1.442695, %v3921_v1  ;;  %v3953_v5 = vmul.f32 %v3827_v58, %v3450_v25  ;;  %v4010_v3 = vmul.f32 1.442695, %v3923_v42  ;;  %v3955_v31 = vmul.f32 %v3835_v32, %v3493_v23 }
 0x3d2   :  { %4648 = vpow2.f32 %v4004_v16  ;;  %v4068_v24 = vmul.f32 1.442695, %v3952_v0  ;;  %v4072_v34 = vmul.f32 1.442695, %v3954_v62  ;;  %v3855_v42 = vrot.slane %v3735_v22, %v6275_v33 }
 0x3d3   :  { %4650 = vpow2.f32 %v4008_v61  ;;  %v4070_v39 = vmul.f32 1.442695, %v3953_v5  ;;  %v4074_v40 = vmul.f32 1.442695, %v3955_v31  ;;  %v3863_v0 = vrot.slane %v3735_v22, %v6278_v19 }
 0x3d4   :  { %4652 = vpow2.f32 %v4006_v49  ;;  %v3859_v59 = vrot.slane %v3735_v22, %v6281_v17  ;;  %v3867_v25 = vrot.slane %v3735_v22, %v6284_v18 }
 0x3d5   :  { %4654 = vpow2.f32 %v4010_v3 }
 0x3d6   :  { %4656 = vpow2.f32 %v4068_v24 }
 0x3d7   :  { %4658 = vpow2.f32 %v4072_v34 }
 0x3d8   :  { %4660 = vpow2.f32 %v4070_v39 }
 0x3d9   :  { %4662 = vpow2.f32 %v4074_v40 }
 0x3dc   :  { %v4649_v4 = vpop.eup %4648 }
 0x3dd   :  { %v4651_v6 = vpop.eup %4650  ;;  %4112 = vst [vmem:[#allocation8 + $0xa0] sm:$0xff] %v4649_v4 }
 0x3de   :  { %v4653_v9 = vpop.eup %4652  ;;  %4114 = vst [vmem:[#allocation8 + $0xb0] sm:$0xff] %v4651_v6 }
 0x3df   :  { %v4655_v10 = vpop.eup %4654  ;;  %4113 = vst [vmem:[#allocation8 + $0xa8] sm:$0xff] %v4653_v9 }
 0x3e0   :  { %v4657_v11 = vpop.eup %4656  ;;  %4115 = vst [vmem:[#allocation8 + $0xb8] sm:$0xff] %v4655_v10 }
 0x3e1   :  { %v4659_v15 = vpop.eup %4658  ;;  %4144 = vst [vmem:[#allocation8 + $0x1a0] sm:$0xff] %v4657_v11 }
 0x3e2   :  { %v4661_v20 = vpop.eup %4660  ;;  %4146 = vst [vmem:[#allocation8 + $0x1b0] sm:$0xff] %v4659_v15 }
 0x3e3   :  { %v4663_v21 = vpop.eup %4662  ;;  %4145 = vst [vmem:[#allocation8 + $0x1a8] sm:$0xff] %v4661_v20 }
 0x3e4   :  { %4147 = vst [vmem:[#allocation8 + $0x1b8] sm:$0xff] %v4663_v21 }
 0x3ed   :  { %v3530_v50 = vpop.f32.mrb[24].mxu0  ;;  %v3573_v44 = vpop.f32.mrb[24].mxu1 }
 0x3ee   :  { %v3924_v14 = vmul.f32 %v3839_v27, %v3530_v50  ;;  %v3532_v51 = vpop.f32.mrb[25].mxu0  ;;  %v3926_v41 = vmul.f32 %v3847_v28, %v3573_v44  ;;  %v3575_v13 = vpop.f32.mrb[25].mxu1 }
 0x3ef   :  { %v3925_v26 = vmul.f32 %v3843_v29, %v3532_v51  ;;  %v3534_v35 = vpop.f32.mrb[26].mxu0  ;;  %v3927_v12 = vmul.f32 %v3851_v30, %v3575_v13  ;;  %v3577_v38 = vpop.f32.mrb[26].mxu1 }
 0x3f0   :  { %v4012_v36 = vmul.f32 1.442695, %v3924_v14  ;;  %v3956_v37 = vmul.f32 %v3839_v27, %v3534_v35  ;;  %v3536_v43 = vpop.f32.mrb[27].mxu0  ;;  %v4016_v63 = vmul.f32 1.442695, %v3926_v41  ;;  %v3958_v60 = vmul.f32 %v3847_v28, %v3577_v38  ;;  %v3579_v52 = vpop.f32.mrb[27].mxu1 }
 0x3f1   :  { %v4014_v46 = vmul.f32 1.442695, %v3925_v26  ;;  %v3957_v47 = vmul.f32 %v3843_v29, %v3536_v43  ;;  %v4018_v8 = vmul.f32 1.442695, %v3927_v12  ;;  %v3959_v48 = vmul.f32 %v3851_v30, %v3579_v52 }
 0x3f2   :  { %4664 = vpow2.f32 %v4012_v36  ;;  %v4076_v7 = vmul.f32 1.442695, %v3956_v37  ;;  %v4080_v58 = vmul.f32 1.442695, %v3958_v60 }
 0x3f3   :  { %4666 = vpow2.f32 %v4016_v63  ;;  %v4078_v32 = vmul.f32 1.442695, %v3957_v47  ;;  %v4082_v54 = vmul.f32 1.442695, %v3959_v48 }
 0x3f4   :  { %4668 = vpow2.f32 %v4014_v46 }
 0x3f5   :  { %4670 = vpow2.f32 %v4018_v8 }
 0x3f6   :  { %4672 = vpow2.f32 %v4076_v7 }
 0x3f7   :  { %4674 = vpow2.f32 %v4080_v58 }
 0x3f8   :  { %4676 = vpow2.f32 %v4078_v32 }
 0x3f9   :  { %4678 = vpow2.f32 %v4082_v54 }
 0x3fc   :  { %v4665_v53 = vpop.eup %4664 }
 0x3fd   :  { %v4667_v55 = vpop.eup %4666  ;;  %4116 = vst [vmem:[#allocation8 + $0xc0] sm:$0xff] %v4665_v53 }
 0x3fe   :  { %v4669_v56 = vpop.eup %4668  ;;  %4118 = vst [vmem:[#allocation8 + $0xd0] sm:$0xff] %v4667_v55 }
 0x3ff   :  { %v4671_v57 = vpop.eup %4670  ;;  %4117 = vst [vmem:[#allocation8 + $0xc8] sm:$0xff] %v4669_v56 }
 0x400   :  { %v4673_v1 = vpop.eup %4672  ;;  %4119 = vst [vmem:[#allocation8 + $0xd8] sm:$0xff] %v4671_v57 }
 0x401   :  { %v4675_v45 = vpop.eup %4674  ;;  %4148 = vst [vmem:[#allocation8 + $0x1c0] sm:$0xff] %v4673_v1 }
 0x402   :  { %v4677_v2 = vpop.eup %4676  ;;  %4150 = vst [vmem:[#allocation8 + $0x1d0] sm:$0xff] %v4675_v45 }
 0x403   :  { %v4679_v16 = vpop.eup %4678  ;;  %4149 = vst [vmem:[#allocation8 + $0x1c8] sm:$0xff] %v4677_v2 }
 0x404   :  { %4151 = vst [vmem:[#allocation8 + $0x1d8] sm:$0xff] %v4679_v16 }
 0x40d   :  { %v3616_v61 = vpop.f32.mrb[28].mxu0  ;;  %v3659_v62 = vpop.f32.mrb[28].mxu1 }
 0x40e   :  { %v3928_v49 = vmul.f32 %v3855_v42, %v3616_v61  ;;  %v3618_v5 = vpop.f32.mrb[29].mxu0  ;;  %v3930_v23 = vmul.f32 %v3863_v0, %v3659_v62  ;;  %v3661_v24 = vpop.f32.mrb[29].mxu1 }
 0x40f   :  { %v3929_v3 = vmul.f32 %v3859_v59, %v3618_v5  ;;  %v3620_v31 = vpop.f32.mrb[30].mxu0  ;;  %v3931_v39 = vmul.f32 %v3867_v25, %v3661_v24  ;;  %v3663_v4 = vpop.f32.mrb[30].mxu1 }
 0x410   :  { %v4020_v34 = vmul.f32 1.442695, %v3928_v49  ;;  %v3960_v40 = vmul.f32 %v3855_v42, %v3620_v31  ;;  %v3622_v6 = vpop.f32.mrb[31].mxu0  ;;  %v4024_v33 = vmul.f32 1.442695, %v3930_v23  ;;  %v3962_v19 = vmul.f32 %v3863_v0, %v3663_v4  ;;  %v3665_v17 = vpop.f32.mrb[31].mxu1 }
 0x411   :  { %v4022_v9 = vmul.f32 1.442695, %v3929_v3  ;;  %v3961_v10 = vmul.f32 %v3859_v59, %v3622_v6  ;;  %v4026_v18 = vmul.f32 1.442695, %v3931_v39  ;;  %v3963_v15 = vmul.f32 %v3867_v25, %v3665_v17 }
 0x412   :  { %4680 = vpow2.f32 %v4020_v34  ;;  %v4084_v11 = vmul.f32 1.442695, %v3960_v40  ;;  %v4088_v20 = vmul.f32 1.442695, %v3962_v19 }
 0x413   :  { %4682 = vpow2.f32 %v4024_v33  ;;  %v4086_v21 = vmul.f32 1.442695, %v3961_v10  ;;  %v4090_v22 = vmul.f32 1.442695, %v3963_v15 }
 0x414   :  { %4684 = vpow2.f32 %v4022_v9 }
 0x415   :  { %4686 = vpow2.f32 %v4026_v18 }
 0x416   :  { %4688 = vpow2.f32 %v4084_v11 }
 0x417   :  { %4690 = vpow2.f32 %v4088_v20 }
 0x418   :  { %4692 = vpow2.f32 %v4086_v21 }
 0x419   :  { %4694 = vpow2.f32 %v4090_v22 }
 0x41c   :  { %v4681_v27 = vpop.eup %4680 }
 0x41d   :  { %v4683_v28 = vpop.eup %4682  ;;  %4120 = vst [vmem:[#allocation8 + $0xe0] sm:$0xff] %v4681_v27 }
 0x41e   :  { %v4685_v29 = vpop.eup %4684  ;;  %4122 = vst [vmem:[#allocation8 + $0xf0] sm:$0xff] %v4683_v28 }
 0x41f   :  { %v4687_v30 = vpop.eup %4686  ;;  %4121 = vst [vmem:[#allocation8 + $0xe8] sm:$0xff] %v4685_v29 }
 0x420   :  { %v4689_v50 = vpop.eup %4688  ;;  %4123 = vst [vmem:[#allocation8 + $0xf8] sm:$0xff] %v4687_v30 }
 0x421   :  { %v4691_v14 = vpop.eup %4690  ;;  %4152 = vst [vmem:[#allocation8 + $0x1e0] sm:$0xff] %v4689_v50 }
 0x422   :  { %v4693_v44 = vpop.eup %4692  ;;  %4154 = vst [vmem:[#allocation8 + $0x1f0] sm:$0xff] %v4691_v14 }
 0x423   :  { %v4695_v51 = vpop.eup %4694  ;;  %4153 = vst [vmem:[#allocation8 + $0x1e8] sm:$0xff] %v4693_v44 }
 0x424   :  { %4155 = vst [vmem:[#allocation8 + $0x1f8] sm:$0xff] %v4695_v51 }
 0x425   :  { %4773 = shalt.err (!%p4770_p0)
}
 0x426   :  { %s4774_s26 = scalar_lea.hbm %s6333_s3, 8192 }
 0x427   :  { %p4775_p1 = scmp.ne.s32.totalorder %s6333_s3, %s4774_s26  ;;  %p4778_p2 = scmp.lt.u32.totalorder %s4774_s26, %s6333_s3 }
 0x429   :  { %p4780_p3 = pnand %p4778_p2, %p4775_p1 }
 0x42b   :  { %4783 = shalt.err (!%p4780_p3)
}
 0x42c   :  { %s4798_s4 = smov 4096   ;;  %s4799_s5 = smov 256  }
 0x42d   :  { %4167 = dma.vmem_to_hbm [thread:$0]  %s4162_s22, 8192, %s6333_s3, [#allocation4], %s4798_s4, %s4798_s4, %s4799_s5  }
 0x42e   :  { %4788 = dma.done.wait [#allocation4], 8192  }
 0x42f   :  { %4789 = vsyncadd [#allocation4], 4294959104 }
 0x430   :  { %4171 = vsyncpa [#allocation3], 1 }
 0x431   :  { %4172 = vsyncpa [#allocation6], 1 }
 0x432   :  { %4173 = vsyncpa [#allocation4], 1 }

</bundles_post_ra>
